<compile_context>
chip_gen: v5e
topology: v5e:2x2
jax: 0.10.0
libtpu: 0.0.40
codegen_flags: <defaults>
</compile_context>

<pallas_src>
import functools

import numpy as np
import jax
import jax.numpy as jnp
from jax.experimental import pallas as pl
from jax.experimental.pallas import tpu as pltpu


def _fspecial_gauss_1d(size, sigma):
    coords = np.arange(size, dtype=np.float32) - size // 2
    g = np.exp(-(coords ** 2) / (2.0 * sigma ** 2))
    return (g / g.sum()).astype(np.float32)


def _banded_filter(g, size):
    """(size - win + 1, size) matrix A with A[o, o + k] = g[k] (valid correlation)."""
    win = g.shape[0]
    out = size - win + 1
    m = np.zeros((out, size), dtype=np.float32)
    for o in range(out):
        m[o, o:o + win] = g
    return m


def _pool2_matrix(size):
    """(size // 2, size) matrix P with P[i, 2i] = P[i, 2i + 1] = 0.5 (2x avg pool)."""
    half = size // 2
    m = np.zeros((half, size), dtype=np.float32)
    for i in range(half):
        m[i, 2 * i] = 0.5
        m[i, 2 * i + 1] = 0.5
    return m


def _filter5(x, y, gh, gw):
    """Valid separable Gaussian filtering of [x, y, x*x, y*y, x*y] on the MXU."""
    h, _ = x.shape
    tensors = [x, y, x * x, y * y, x * y]
    if h % 8 == 0:
        # Fat path: one W-pass matmul over the sublane-stacked 5-tensor block.
        t = jnp.concatenate(tensors, axis=0)                          # (5H, W)
        tw = jnp.dot(t, gw, preferred_element_type=jnp.float32)       # (5H, Wo)
        return [jnp.dot(gh, tw[k * h:(k + 1) * h],
                        preferred_element_type=jnp.float32)           # (Ho, Wo)
                for k in range(5)]
    # Tiny deep levels (H not 8-aligned): per-tensor path, no concat/slices.
    return [jnp.dot(gh, jnp.dot(ti, gw, preferred_element_type=jnp.float32),
                    preferred_element_type=jnp.float32)
            for ti in tensors]


def _pool2(x, y, ph, pw):
    """Fused 2x2 average pool (F.avg_pool2d, kernel_size=2, even sizes) on the MXU."""
    h, _ = x.shape
    if h % 8 == 0:
        xy = jnp.concatenate([x, y], axis=0)                          # (2H, W)
        xyp = jnp.dot(xy, pw, preferred_element_type=jnp.float32)     # (2H, W/2)
        return (jnp.dot(ph, xyp[:h], preferred_element_type=jnp.float32),
                jnp.dot(ph, xyp[h:], preferred_element_type=jnp.float32))
    return (jnp.dot(ph, jnp.dot(x, pw, preferred_element_type=jnp.float32),
                    preferred_element_type=jnp.float32),
            jnp.dot(ph, jnp.dot(y, pw, preferred_element_type=jnp.float32),
                    preferred_element_type=jnp.float32))


def _ms_ssim_kernel(*refs, levels, c1, c2):
    """One image pair per grid step; the whole 5-level pyramid stays in VMEM."""
    n_g = 2 * levels
    n_p = 2 * (levels - 1)
    g_refs = refs[:n_g]
    p_refs = refs[n_g:n_g + n_p]
    x_ref, y_ref, out_ref = refs[n_g + n_p], refs[n_g + n_p + 1], refs[n_g + n_p + 2]

    x = x_ref[0]          # (H, W) f32
    y = y_ref[0]

    level_vals = []
    for l in range(levels):
        gh = g_refs[2 * l][...]        # (Ho, H) banded Gaussian (H pass)
        gw = g_refs[2 * l + 1][...]    # (W, Wo) banded Gaussian (W pass)
        ho, wo = gh.shape[0], gw.shape[1]

        mu1, mu2, e_xx, e_yy, e_xy = _filter5(x, y, gh, gw)

        mu1_sq = mu1 * mu1
        mu2_sq = mu2 * mu2
        mu1_mu2 = mu1 * mu2
        sigma1_sq = e_xx - mu1_sq      # compensation = 1.0; keep subtraction in f32
        sigma2_sq = e_yy - mu2_sq
        sigma12 = e_xy - mu1_mu2

        cs_map = (2.0 * sigma12 + c2) / (sigma1_sq + sigma2_sq + c2)
        inv_area = 1.0 / float(ho * wo)

        if l < levels - 1:
            # Only cs is consumed at non-final levels (matches reference).
            cs_mean = jnp.sum(cs_map) * inv_area
            level_vals.append(jnp.maximum(cs_mean, 0.0))
            # Fused 2x2 average pool for the next scale (stays in VMEM).
            ph = p_refs[2 * l][...]        # (H/2, H)
            pw = p_refs[2 * l + 1][...]    # (W, W/2)
            x, y = _pool2(x, y, ph, pw)
        else:
            ssim_map = ((2.0 * mu1_mu2 + c1) / (mu1_sq + mu2_sq + c1)) * cs_map
            ssim_mean = jnp.sum(ssim_map) * inv_area
            level_vals.append(jnp.maximum(ssim_mean, 0.0))

    # Lane-dense packed output: lanes 0..levels-1 carry relu(cs_0..L-2), relu(ssim_L-1).
    lane = jax.lax.broadcasted_iota(jnp.int32, (1, 128), 1)
    packed = jnp.zeros((1, 128), dtype=jnp.float32)
    for l, v in enumerate(level_vals):
        packed = packed + jnp.where(lane == l, v, 0.0)
    out_ref[...] = packed.reshape(1, 1, 128)


def ms_ssim_loss(X, Y, *, win_size=11, win_sigma=1.5, data_range=1.0,
                 weights=None, K=(0.01, 0.03)):
    """1 - MS-SSIM(X, Y). X, Y: (N, C, H, W) float (PyTorch NCHW), size_average=True."""
    assert X.shape == Y.shape and X.ndim == 4
    n, c, h, w = X.shape
    assert win_size % 2 == 1, "Window size should be odd."
    assert min(h, w) > (win_size - 1) * 2 ** 4, (
        "Image size should be larger than %d due to the 4 downsamplings in ms-ssim"
        % ((win_size - 1) * 2 ** 4))

    if weights is None:
        weights = [0.0448, 0.2856, 0.3001, 0.2363, 0.1333]
    weights_arr = jnp.asarray(weights, dtype=jnp.float32)
    levels = len(weights)

    g = _fspecial_gauss_1d(win_size, win_sigma)
    c1 = float((K[0] * data_range) ** 2)
    c2 = float((K[1] * data_range) ** 2)

    # Same 1-D window per channel (grouped conv in the reference) -> flatten N*C.
    b = n * c
    x = X.reshape(b, h, w).astype(jnp.float32)
    y = Y.reshape(b, h, w).astype(jnp.float32)

    # Per-level constant banded Gaussian / pool matrices (compile-time constants).
    const_np = []
    sizes = []
    hh, ww = h, w
    for l in range(levels):
        # TODO(synk): gaussian_filter's "skip smoothing if dim < win" warning path
        # is not implemented; we require every pyramid level to be >= win_size.
        assert hh >= win_size and ww >= win_size
        const_np += [_banded_filter(g, hh),        # Gh_l  (Ho, H)
                     _banded_filter(g, ww).T]      # Gw_l  (W, Wo)
        sizes.append((hh, ww))
        if l < levels - 1:
            # TODO(synk): odd-spatial padding path of F.avg_pool2d (padding=s%2) is
            # not implemented; the fused 2x2 pool assumes even H/W at every level.
            assert hh % 2 == 0 and ww % 2 == 0
            hh //= 2
            ww //= 2
    for l in range(levels - 1):
        hl, wl = sizes[l]
        const_np += [_pool2_matrix(hl),            # Ph_l  (H/2, H)
                     _pool2_matrix(wl).T]          # Pw_l  (W, W/2)

    const_arrays = [jnp.asarray(a) for a in const_np]
    in_specs = [pl.BlockSpec(a.shape, lambda i: (0, 0)) for a in const_np]
    in_specs += [pl.BlockSpec((1, h, w), lambda i: (i, 0, 0)),   # X image i
                 pl.BlockSpec((1, h, w), lambda i: (i, 0, 0))]   # Y image i

    out_shape = jax.ShapeDtypeStruct((b, 1, 128), jnp.float32)
    out_spec = pl.BlockSpec((1, 1, 128), lambda i: (i, 0, 0))

    # Advisory cost estimate (whole fused pyramid, whole batch).
    flops = 0
    divides = 0
    for l in range(levels):
        hl, wl = sizes[l]
        hol, wol = hl - win_size + 1, wl - win_size + 1
        flops += 5 * (2 * hl * wl * wol + 2 * hol * hl * wol) + 20 * hol * wol
        divides += (2 if l == levels - 1 else 1) * hol * wol
        if l < levels - 1:
            flops += 2 * (2 * hl * wl * (wl // 2) + 2 * (hl // 2) * hl * (wl // 2))
    flops *= b
    divides *= b
    bytes_accessed = 4 * (2 * b * h * w + b * 128
                          + sum(int(np.prod(a.shape)) for a in const_np))

    kernel = functools.partial(_ms_ssim_kernel, levels=levels, c1=c1, c2=c2)
    packed = pl.pallas_call(
        kernel,
        grid=(b,),
        out_shape=out_shape,
        in_specs=in_specs,
        out_specs=out_spec,
        compiler_params=pltpu.CompilerParams(
            dimension_semantics=("parallel",)),
        cost_estimate=pl.CostEstimate(
            flops=int(flops),
            transcendentals=int(divides),
            bytes_accessed=int(bytes_accessed)),
    )(*const_arrays, x, y)

    vals = packed[:, 0, :levels]                                    # (B, levels), >= 0
    ms_ssim_val = jnp.prod(vals ** weights_arr[None, :], axis=-1)   # (B,)
    return 1.0 - ms_ssim_val.mean()


if __name__ == "__main__":
    # MS-SSIM needs min(H, W) > (win_size - 1) * 16; use win_size=5 with 96x96
    # (96 > 64), batch=2, channels=2 -> B=4 grid steps (>=2 for the two v7x TCs),
    # pyramid 96/48/24/12/6 (all even).
    N, C, H, W = 2, 2, 96, 96
    WIN_SIZE, WIN_SIGMA = 5, 1.5

    key = jax.random.PRNGKey(0)
    kx, ky = jax.random.split(key)
    X = jax.random.uniform(kx, (N, C, H, W), dtype=jnp.float32)
    Y = jax.random.uniform(ky, (N, C, H, W), dtype=jnp.float32)

    loss_fn = jax.jit(functools.partial(
        ms_ssim_loss, win_size=WIN_SIZE, win_sigma=WIN_SIGMA, data_range=1.0))
    loss = loss_fn(X, Y)
    jax.block_until_ready(loss)
    print("KERNEL_OK")
</pallas_src>

<mosaic_0001>
module attributes {stable_mosaic.version = 11 : i64} {
  func.func @_ms_ssim_kernel(%arg0: i32, %arg1: memref<92x96xf32, #tpu.memory_space<vmem>>, %arg2: memref<96x92xf32, #tpu.memory_space<vmem>>, %arg3: memref<44x48xf32, #tpu.memory_space<vmem>>, %arg4: memref<48x44xf32, #tpu.memory_space<vmem>>, %arg5: memref<20x24xf32, #tpu.memory_space<vmem>>, %arg6: memref<24x20xf32, #tpu.memory_space<vmem>>, %arg7: memref<8x12xf32, #tpu.memory_space<vmem>>, %arg8: memref<12x8xf32, #tpu.memory_space<vmem>>, %arg9: memref<2x6xf32, #tpu.memory_space<vmem>>, %arg10: memref<6x2xf32, #tpu.memory_space<vmem>>, %arg11: memref<48x96xf32, #tpu.memory_space<vmem>>, %arg12: memref<96x48xf32, #tpu.memory_space<vmem>>, %arg13: memref<24x48xf32, #tpu.memory_space<vmem>>, %arg14: memref<48x24xf32, #tpu.memory_space<vmem>>, %arg15: memref<12x24xf32, #tpu.memory_space<vmem>>, %arg16: memref<24x12xf32, #tpu.memory_space<vmem>>, %arg17: memref<6x12xf32, #tpu.memory_space<vmem>>, %arg18: memref<12x6xf32, #tpu.memory_space<vmem>>, %arg19: memref<1x96x96xf32, #tpu.memory_space<vmem>>, %arg20: memref<1x96x96xf32, #tpu.memory_space<vmem>>, %arg21: memref<1x1x128xf32, #tpu.memory_space<vmem>>) attributes {dimension_semantics = [#tpu.dimension_semantics<parallel>], iteration_bounds = array<i64: 4>, scalar_prefetch = 0 : i64, scratch_operands = 0 : i64, tpu.core_type = #tpu.core_type<tc>, window_params = [{pipeline_mode = #tpu.pipeline_mode<synchronous>, transform_indices = @transform_0, window_bounds = array<i64: 92, 96>}, {pipeline_mode = #tpu.pipeline_mode<synchronous>, transform_indices = @transform_1, window_bounds = array<i64: 96, 92>}, {pipeline_mode = #tpu.pipeline_mode<synchronous>, transform_indices = @transform_2, window_bounds = array<i64: 44, 48>}, {pipeline_mode = #tpu.pipeline_mode<synchronous>, transform_indices = @transform_3, window_bounds = array<i64: 48, 44>}, {pipeline_mode = #tpu.pipeline_mode<synchronous>, transform_indices = @transform_4, window_bounds = array<i64: 20, 24>}, {pipeline_mode = #tpu.pipeline_mode<synchronous>, transform_indices = @transform_5, window_bounds = array<i64: 24, 20>}, {pipeline_mode = #tpu.pipeline_mode<synchronous>, transform_indices = @transform_6, window_bounds = array<i64: 8, 12>}, {pipeline_mode = #tpu.pipeline_mode<synchronous>, transform_indices = @transform_7, window_bounds = array<i64: 12, 8>}, {pipeline_mode = #tpu.pipeline_mode<synchronous>, transform_indices = @transform_8, window_bounds = array<i64: 2, 6>}, {pipeline_mode = #tpu.pipeline_mode<synchronous>, transform_indices = @transform_9, window_bounds = array<i64: 6, 2>}, {pipeline_mode = #tpu.pipeline_mode<synchronous>, transform_indices = @transform_10, window_bounds = array<i64: 48, 96>}, {pipeline_mode = #tpu.pipeline_mode<synchronous>, transform_indices = @transform_11, window_bounds = array<i64: 96, 48>}, {pipeline_mode = #tpu.pipeline_mode<synchronous>, transform_indices = @transform_12, window_bounds = array<i64: 24, 48>}, {pipeline_mode = #tpu.pipeline_mode<synchronous>, transform_indices = @transform_13, window_bounds = array<i64: 48, 24>}, {pipeline_mode = #tpu.pipeline_mode<synchronous>, transform_indices = @transform_14, window_bounds = array<i64: 12, 24>}, {pipeline_mode = #tpu.pipeline_mode<synchronous>, transform_indices = @transform_15, window_bounds = array<i64: 24, 12>}, {pipeline_mode = #tpu.pipeline_mode<synchronous>, transform_indices = @transform_16, window_bounds = array<i64: 6, 12>}, {pipeline_mode = #tpu.pipeline_mode<synchronous>, transform_indices = @transform_17, window_bounds = array<i64: 12, 6>}, {transform_indices = @transform_18, window_bounds = array<i64: 1, 96, 96>}, {transform_indices = @transform_19, window_bounds = array<i64: 1, 96, 96>}, {transform_indices = @transform_20, window_bounds = array<i64: 1, 1, 128>}]} {
    %c0 = arith.constant 0 : index
    %c0_0 = arith.constant 0 : index
    %c0_1 = arith.constant 0 : index
    %0 = vector.load %arg19[%c0, %c0_0, %c0_1] : memref<1x96x96xf32, #tpu.memory_space<vmem>>, vector<1x96x96xf32>
    %1 = vector.shape_cast %0 : vector<1x96x96xf32> to vector<96x96xf32>
    %c0_2 = arith.constant 0 : index
    %c0_3 = arith.constant 0 : index
    %c0_4 = arith.constant 0 : index
    %2 = vector.load %arg20[%c0_2, %c0_3, %c0_4] : memref<1x96x96xf32, #tpu.memory_space<vmem>>, vector<1x96x96xf32>
    %3 = vector.shape_cast %2 : vector<1x96x96xf32> to vector<96x96xf32>
    %c0_5 = arith.constant 0 : index
    %c0_6 = arith.constant 0 : index
    %4 = vector.load %arg1[%c0_5, %c0_6] : memref<92x96xf32, #tpu.memory_space<vmem>>, vector<92x96xf32>
    %c0_7 = arith.constant 0 : index
    %c0_8 = arith.constant 0 : index
    %5 = vector.load %arg2[%c0_7, %c0_8] : memref<96x92xf32, #tpu.memory_space<vmem>>, vector<96x92xf32>
    %6 = arith.mulf %1, %1 : vector<96x96xf32>
    %7 = arith.mulf %3, %3 : vector<96x96xf32>
    %8 = arith.mulf %1, %3 : vector<96x96xf32>
    %9 = tpu.concatenate %1, %3, %6, %7, %8 in 0 : vector<96x96xf32>, vector<96x96xf32>, vector<96x96xf32>, vector<96x96xf32>, vector<96x96xf32> -> vector<480x96xf32>
    %cst = arith.constant dense<0.000000e+00> : vector<480x92xf32>
    %10 = tpu.matmul %9, %5, %cst {dimension_numbers = #tpu.dot_dimension_numbers<[1], [0], [0], [1], [0, 0, 1, 1], [], []>} : vector<480x96xf32>, vector<96x92xf32>, vector<480x92xf32> -> vector<480x92xf32>
    %11 = vector.extract_strided_slice %10 {offsets = [0, 0], sizes = [96, 92], strides = [1, 1]} : vector<480x92xf32> to vector<96x92xf32>
    %cst_9 = arith.constant dense<0.000000e+00> : vector<92x92xf32>
    %12 = tpu.matmul %4, %11, %cst_9 {dimension_numbers = #tpu.dot_dimension_numbers<[1], [0], [0], [1], [0, 0, 1, 1], [], []>} : vector<92x96xf32>, vector<96x92xf32>, vector<92x92xf32> -> vector<92x92xf32>
    %13 = vector.extract_strided_slice %10 {offsets = [96, 0], sizes = [96, 92], strides = [1, 1]} : vector<480x92xf32> to vector<96x92xf32>
    %cst_10 = arith.constant dense<0.000000e+00> : vector<92x92xf32>
    %14 = tpu.matmul %4, %13, %cst_10 {dimension_numbers = #tpu.dot_dimension_numbers<[1], [0], [0], [1], [0, 0, 1, 1], [], []>} : vector<92x96xf32>, vector<96x92xf32>, vector<92x92xf32> -> vector<92x92xf32>
    %15 = vector.extract_strided_slice %10 {offsets = [192, 0], sizes = [96, 92], strides = [1, 1]} : vector<480x92xf32> to vector<96x92xf32>
    %cst_11 = arith.constant dense<0.000000e+00> : vector<92x92xf32>
    %16 = tpu.matmul %4, %15, %cst_11 {dimension_numbers = #tpu.dot_dimension_numbers<[1], [0], [0], [1], [0, 0, 1, 1], [], []>} : vector<92x96xf32>, vector<96x92xf32>, vector<92x92xf32> -> vector<92x92xf32>
    %17 = vector.extract_strided_slice %10 {offsets = [288, 0], sizes = [96, 92], strides = [1, 1]} : vector<480x92xf32> to vector<96x92xf32>
    %cst_12 = arith.constant dense<0.000000e+00> : vector<92x92xf32>
    %18 = tpu.matmul %4, %17, %cst_12 {dimension_numbers = #tpu.dot_dimension_numbers<[1], [0], [0], [1], [0, 0, 1, 1], [], []>} : vector<92x96xf32>, vector<96x92xf32>, vector<92x92xf32> -> vector<92x92xf32>
    %19 = vector.extract_strided_slice %10 {offsets = [384, 0], sizes = [96, 92], strides = [1, 1]} : vector<480x92xf32> to vector<96x92xf32>
    %cst_13 = arith.constant dense<0.000000e+00> : vector<92x92xf32>
    %20 = tpu.matmul %4, %19, %cst_13 {dimension_numbers = #tpu.dot_dimension_numbers<[1], [0], [0], [1], [0, 0, 1, 1], [], []>} : vector<92x96xf32>, vector<96x92xf32>, vector<92x92xf32> -> vector<92x92xf32>
    %21 = arith.mulf %12, %12 : vector<92x92xf32>
    %22 = arith.mulf %14, %14 : vector<92x92xf32>
    %23 = arith.mulf %12, %14 : vector<92x92xf32>
    %24 = arith.subf %16, %21 : vector<92x92xf32>
    %25 = arith.subf %18, %22 : vector<92x92xf32>
    %26 = arith.subf %20, %23 : vector<92x92xf32>
    %cst_14 = arith.constant 2.000000e+00 : f32
    %27 = vector.broadcast %cst_14 : f32 to vector<92x92xf32>
    %28 = arith.mulf %27, %26 : vector<92x92xf32>
    %cst_15 = arith.constant 8.99999984E-4 : f32
    %29 = vector.broadcast %cst_15 : f32 to vector<92x92xf32>
    %30 = arith.addf %28, %29 : vector<92x92xf32>
    %31 = arith.addf %24, %25 : vector<92x92xf32>
    %cst_16 = arith.constant 8.99999984E-4 : f32
    %32 = vector.broadcast %cst_16 : f32 to vector<92x92xf32>
    %33 = arith.addf %31, %32 : vector<92x92xf32>
    %34 = arith.divf %30, %33 : vector<92x92xf32>
    %35 = vector.shape_cast %34 : vector<92x92xf32> to vector<1x92x92xf32>
    %cst_17 = arith.constant dense<0.000000e+00> : vector<1xf32>
    %36 = vector.multi_reduction <add>, %35, %cst_17 [1, 2] : vector<1x92x92xf32> to vector<1xf32>
    %37 = vector.shape_cast %36 : vector<1xf32> to vector<1x1x1xf32>
    %38 = vector.extract %37[0, 0, 0] : f32 from vector<1x1x1xf32>
    %cst_18 = arith.constant 1.18147451E-4 : f32
    %39 = arith.mulf %38, %cst_18 : f32
    %cst_19 = arith.constant 0.000000e+00 : f32
    %40 = arith.maximumf %39, %cst_19 : f32
    %c0_20 = arith.constant 0 : index
    %c0_21 = arith.constant 0 : index
    %41 = vector.load %arg11[%c0_20, %c0_21] : memref<48x96xf32, #tpu.memory_space<vmem>>, vector<48x96xf32>
    %c0_22 = arith.constant 0 : index
    %c0_23 = arith.constant 0 : index
    %42 = vector.load %arg12[%c0_22, %c0_23] : memref<96x48xf32, #tpu.memory_space<vmem>>, vector<96x48xf32>
    %43 = tpu.concatenate %1, %3 in 0 : vector<96x96xf32>, vector<96x96xf32> -> vector<192x96xf32>
    %cst_24 = arith.constant dense<0.000000e+00> : vector<192x48xf32>
    %44 = tpu.matmul %43, %42, %cst_24 {dimension_numbers = #tpu.dot_dimension_numbers<[1], [0], [0], [1], [0, 0, 1, 1], [], []>} : vector<192x96xf32>, vector<96x48xf32>, vector<192x48xf32> -> vector<192x48xf32>
    %45 = vector.extract_strided_slice %44 {offsets = [0, 0], sizes = [96, 48], strides = [1, 1]} : vector<192x48xf32> to vector<96x48xf32>
    %cst_25 = arith.constant dense<0.000000e+00> : vector<48x48xf32>
    %46 = tpu.matmul %41, %45, %cst_25 {dimension_numbers = #tpu.dot_dimension_numbers<[1], [0], [0], [1], [0, 0, 1, 1], [], []>} : vector<48x96xf32>, vector<96x48xf32>, vector<48x48xf32> -> vector<48x48xf32>
    %47 = vector.extract_strided_slice %44 {offsets = [96, 0], sizes = [96, 48], strides = [1, 1]} : vector<192x48xf32> to vector<96x48xf32>
    %cst_26 = arith.constant dense<0.000000e+00> : vector<48x48xf32>
    %48 = tpu.matmul %41, %47, %cst_26 {dimension_numbers = #tpu.dot_dimension_numbers<[1], [0], [0], [1], [0, 0, 1, 1], [], []>} : vector<48x96xf32>, vector<96x48xf32>, vector<48x48xf32> -> vector<48x48xf32>
    %c0_27 = arith.constant 0 : index
    %c0_28 = arith.constant 0 : index
    %49 = vector.load %arg3[%c0_27, %c0_28] : memref<44x48xf32, #tpu.memory_space<vmem>>, vector<44x48xf32>
    %c0_29 = arith.constant 0 : index
    %c0_30 = arith.constant 0 : index
    %50 = vector.load %arg4[%c0_29, %c0_30] : memref<48x44xf32, #tpu.memory_space<vmem>>, vector<48x44xf32>
    %51 = arith.mulf %46, %46 : vector<48x48xf32>
    %52 = arith.mulf %48, %48 : vector<48x48xf32>
    %53 = arith.mulf %46, %48 : vector<48x48xf32>
    %54 = tpu.concatenate %46, %48, %51, %52, %53 in 0 : vector<48x48xf32>, vector<48x48xf32>, vector<48x48xf32>, vector<48x48xf32>, vector<48x48xf32> -> vector<240x48xf32>
    %cst_31 = arith.constant dense<0.000000e+00> : vector<240x44xf32>
    %55 = tpu.matmul %54, %50, %cst_31 {dimension_numbers = #tpu.dot_dimension_numbers<[1], [0], [0], [1], [0, 0, 1, 1], [], []>} : vector<240x48xf32>, vector<48x44xf32>, vector<240x44xf32> -> vector<240x44xf32>
    %56 = vector.extract_strided_slice %55 {offsets = [0, 0], sizes = [48, 44], strides = [1, 1]} : vector<240x44xf32> to vector<48x44xf32>
    %cst_32 = arith.constant dense<0.000000e+00> : vector<44x44xf32>
    %57 = tpu.matmul %49, %56, %cst_32 {dimension_numbers = #tpu.dot_dimension_numbers<[1], [0], [0], [1], [0, 0, 1, 1], [], []>} : vector<44x48xf32>, vector<48x44xf32>, vector<44x44xf32> -> vector<44x44xf32>
    %58 = vector.extract_strided_slice %55 {offsets = [48, 0], sizes = [48, 44], strides = [1, 1]} : vector<240x44xf32> to vector<48x44xf32>
    %cst_33 = arith.constant dense<0.000000e+00> : vector<44x44xf32>
    %59 = tpu.matmul %49, %58, %cst_33 {dimension_numbers = #tpu.dot_dimension_numbers<[1], [0], [0], [1], [0, 0, 1, 1], [], []>} : vector<44x48xf32>, vector<48x44xf32>, vector<44x44xf32> -> vector<44x44xf32>
    %60 = vector.extract_strided_slice %55 {offsets = [96, 0], sizes = [48, 44], strides = [1, 1]} : vector<240x44xf32> to vector<48x44xf32>
    %cst_34 = arith.constant dense<0.000000e+00> : vector<44x44xf32>
    %61 = tpu.matmul %49, %60, %cst_34 {dimension_numbers = #tpu.dot_dimension_numbers<[1], [0], [0], [1], [0, 0, 1, 1], [], []>} : vector<44x48xf32>, vector<48x44xf32>, vector<44x44xf32> -> vector<44x44xf32>
    %62 = vector.extract_strided_slice %55 {offsets = [144, 0], sizes = [48, 44], strides = [1, 1]} : vector<240x44xf32> to vector<48x44xf32>
    %cst_35 = arith.constant dense<0.000000e+00> : vector<44x44xf32>
    %63 = tpu.matmul %49, %62, %cst_35 {dimension_numbers = #tpu.dot_dimension_numbers<[1], [0], [0], [1], [0, 0, 1, 1], [], []>} : vector<44x48xf32>, vector<48x44xf32>, vector<44x44xf32> -> vector<44x44xf32>
    %64 = vector.extract_strided_slice %55 {offsets = [192, 0], sizes = [48, 44], strides = [1, 1]} : vector<240x44xf32> to vector<48x44xf32>
    %cst_36 = arith.constant dense<0.000000e+00> : vector<44x44xf32>
    %65 = tpu.matmul %49, %64, %cst_36 {dimension_numbers = #tpu.dot_dimension_numbers<[1], [0], [0], [1], [0, 0, 1, 1], [], []>} : vector<44x48xf32>, vector<48x44xf32>, vector<44x44xf32> -> vector<44x44xf32>
    %66 = arith.mulf %57, %57 : vector<44x44xf32>
    %67 = arith.mulf %59, %59 : vector<44x44xf32>
    %68 = arith.mulf %57, %59 : vector<44x44xf32>
    %69 = arith.subf %61, %66 : vector<44x44xf32>
    %70 = arith.subf %63, %67 : vector<44x44xf32>
    %71 = arith.subf %65, %68 : vector<44x44xf32>
    %cst_37 = arith.constant 2.000000e+00 : f32
    %72 = vector.broadcast %cst_37 : f32 to vector<44x44xf32>
    %73 = arith.mulf %72, %71 : vector<44x44xf32>
    %cst_38 = arith.constant 8.99999984E-4 : f32
    %74 = vector.broadcast %cst_38 : f32 to vector<44x44xf32>
    %75 = arith.addf %73, %74 : vector<44x44xf32>
    %76 = arith.addf %69, %70 : vector<44x44xf32>
    %cst_39 = arith.constant 8.99999984E-4 : f32
    %77 = vector.broadcast %cst_39 : f32 to vector<44x44xf32>
    %78 = arith.addf %76, %77 : vector<44x44xf32>
    %79 = arith.divf %75, %78 : vector<44x44xf32>
    %80 = vector.shape_cast %79 : vector<44x44xf32> to vector<1x44x44xf32>
    %cst_40 = arith.constant dense<0.000000e+00> : vector<1xf32>
    %81 = vector.multi_reduction <add>, %80, %cst_40 [1, 2] : vector<1x44x44xf32> to vector<1xf32>
    %82 = vector.shape_cast %81 : vector<1xf32> to vector<1x1x1xf32>
    %83 = vector.extract %82[0, 0, 0] : f32 from vector<1x1x1xf32>
    %cst_41 = arith.constant 5.16528904E-4 : f32
    %84 = arith.mulf %83, %cst_41 : f32
    %cst_42 = arith.constant 0.000000e+00 : f32
    %85 = arith.maximumf %84, %cst_42 : f32
    %c0_43 = arith.constant 0 : index
    %c0_44 = arith.constant 0 : index
    %86 = vector.load %arg13[%c0_43, %c0_44] : memref<24x48xf32, #tpu.memory_space<vmem>>, vector<24x48xf32>
    %c0_45 = arith.constant 0 : index
    %c0_46 = arith.constant 0 : index
    %87 = vector.load %arg14[%c0_45, %c0_46] : memref<48x24xf32, #tpu.memory_space<vmem>>, vector<48x24xf32>
    %88 = tpu.concatenate %46, %48 in 0 : vector<48x48xf32>, vector<48x48xf32> -> vector<96x48xf32>
    %cst_47 = arith.constant dense<0.000000e+00> : vector<96x24xf32>
    %89 = tpu.matmul %88, %87, %cst_47 {dimension_numbers = #tpu.dot_dimension_numbers<[1], [0], [0], [1], [0, 0, 1, 1], [], []>} : vector<96x48xf32>, vector<48x24xf32>, vector<96x24xf32> -> vector<96x24xf32>
    %90 = vector.extract_strided_slice %89 {offsets = [0, 0], sizes = [48, 24], strides = [1, 1]} : vector<96x24xf32> to vector<48x24xf32>
    %cst_48 = arith.constant dense<0.000000e+00> : vector<24x24xf32>
    %91 = tpu.matmul %86, %90, %cst_48 {dimension_numbers = #tpu.dot_dimension_numbers<[1], [0], [0], [1], [0, 0, 1, 1], [], []>} : vector<24x48xf32>, vector<48x24xf32>, vector<24x24xf32> -> vector<24x24xf32>
    %92 = vector.extract_strided_slice %89 {offsets = [48, 0], sizes = [48, 24], strides = [1, 1]} : vector<96x24xf32> to vector<48x24xf32>
    %cst_49 = arith.constant dense<0.000000e+00> : vector<24x24xf32>
    %93 = tpu.matmul %86, %92, %cst_49 {dimension_numbers = #tpu.dot_dimension_numbers<[1], [0], [0], [1], [0, 0, 1, 1], [], []>} : vector<24x48xf32>, vector<48x24xf32>, vector<24x24xf32> -> vector<24x24xf32>
    %c0_50 = arith.constant 0 : index
    %c0_51 = arith.constant 0 : index
    %94 = vector.load %arg5[%c0_50, %c0_51] : memref<20x24xf32, #tpu.memory_space<vmem>>, vector<20x24xf32>
    %c0_52 = arith.constant 0 : index
    %c0_53 = arith.constant 0 : index
    %95 = vector.load %arg6[%c0_52, %c0_53] : memref<24x20xf32, #tpu.memory_space<vmem>>, vector<24x20xf32>
    %96 = arith.mulf %91, %91 : vector<24x24xf32>
    %97 = arith.mulf %93, %93 : vector<24x24xf32>
    %98 = arith.mulf %91, %93 : vector<24x24xf32>
    %99 = tpu.concatenate %91, %93, %96, %97, %98 in 0 : vector<24x24xf32>, vector<24x24xf32>, vector<24x24xf32>, vector<24x24xf32>, vector<24x24xf32> -> vector<120x24xf32>
    %cst_54 = arith.constant dense<0.000000e+00> : vector<120x20xf32>
    %100 = tpu.matmul %99, %95, %cst_54 {dimension_numbers = #tpu.dot_dimension_numbers<[1], [0], [0], [1], [0, 0, 1, 1], [], []>} : vector<120x24xf32>, vector<24x20xf32>, vector<120x20xf32> -> vector<120x20xf32>
    %101 = vector.extract_strided_slice %100 {offsets = [0, 0], sizes = [24, 20], strides = [1, 1]} : vector<120x20xf32> to vector<24x20xf32>
    %cst_55 = arith.constant dense<0.000000e+00> : vector<20x20xf32>
    %102 = tpu.matmul %94, %101, %cst_55 {dimension_numbers = #tpu.dot_dimension_numbers<[1], [0], [0], [1], [0, 0, 1, 1], [], []>} : vector<20x24xf32>, vector<24x20xf32>, vector<20x20xf32> -> vector<20x20xf32>
    %103 = vector.extract_strided_slice %100 {offsets = [24, 0], sizes = [24, 20], strides = [1, 1]} : vector<120x20xf32> to vector<24x20xf32>
    %cst_56 = arith.constant dense<0.000000e+00> : vector<20x20xf32>
    %104 = tpu.matmul %94, %103, %cst_56 {dimension_numbers = #tpu.dot_dimension_numbers<[1], [0], [0], [1], [0, 0, 1, 1], [], []>} : vector<20x24xf32>, vector<24x20xf32>, vector<20x20xf32> -> vector<20x20xf32>
    %105 = vector.extract_strided_slice %100 {offsets = [48, 0], sizes = [24, 20], strides = [1, 1]} : vector<120x20xf32> to vector<24x20xf32>
    %cst_57 = arith.constant dense<0.000000e+00> : vector<20x20xf32>
    %106 = tpu.matmul %94, %105, %cst_57 {dimension_numbers = #tpu.dot_dimension_numbers<[1], [0], [0], [1], [0, 0, 1, 1], [], []>} : vector<20x24xf32>, vector<24x20xf32>, vector<20x20xf32> -> vector<20x20xf32>
    %107 = vector.extract_strided_slice %100 {offsets = [72, 0], sizes = [24, 20], strides = [1, 1]} : vector<120x20xf32> to vector<24x20xf32>
    %cst_58 = arith.constant dense<0.000000e+00> : vector<20x20xf32>
    %108 = tpu.matmul %94, %107, %cst_58 {dimension_numbers = #tpu.dot_dimension_numbers<[1], [0], [0], [1], [0, 0, 1, 1], [], []>} : vector<20x24xf32>, vector<24x20xf32>, vector<20x20xf32> -> vector<20x20xf32>
    %109 = vector.extract_strided_slice %100 {offsets = [96, 0], sizes = [24, 20], strides = [1, 1]} : vector<120x20xf32> to vector<24x20xf32>
    %cst_59 = arith.constant dense<0.000000e+00> : vector<20x20xf32>
    %110 = tpu.matmul %94, %109, %cst_59 {dimension_numbers = #tpu.dot_dimension_numbers<[1], [0], [0], [1], [0, 0, 1, 1], [], []>} : vector<20x24xf32>, vector<24x20xf32>, vector<20x20xf32> -> vector<20x20xf32>
    %111 = arith.mulf %102, %102 : vector<20x20xf32>
    %112 = arith.mulf %104, %104 : vector<20x20xf32>
    %113 = arith.mulf %102, %104 : vector<20x20xf32>
    %114 = arith.subf %106, %111 : vector<20x20xf32>
    %115 = arith.subf %108, %112 : vector<20x20xf32>
    %116 = arith.subf %110, %113 : vector<20x20xf32>
    %cst_60 = arith.constant 2.000000e+00 : f32
    %117 = vector.broadcast %cst_60 : f32 to vector<20x20xf32>
    %118 = arith.mulf %117, %116 : vector<20x20xf32>
    %cst_61 = arith.constant 8.99999984E-4 : f32
    %119 = vector.broadcast %cst_61 : f32 to vector<20x20xf32>
    %120 = arith.addf %118, %119 : vector<20x20xf32>
    %121 = arith.addf %114, %115 : vector<20x20xf32>
    %cst_62 = arith.constant 8.99999984E-4 : f32
    %122 = vector.broadcast %cst_62 : f32 to vector<20x20xf32>
    %123 = arith.addf %121, %122 : vector<20x20xf32>
    %124 = arith.divf %120, %123 : vector<20x20xf32>
    %125 = vector.shape_cast %124 : vector<20x20xf32> to vector<1x20x20xf32>
    %cst_63 = arith.constant dense<0.000000e+00> : vector<1xf32>
    %126 = vector.multi_reduction <add>, %125, %cst_63 [1, 2] : vector<1x20x20xf32> to vector<1xf32>
    %127 = vector.shape_cast %126 : vector<1xf32> to vector<1x1x1xf32>
    %128 = vector.extract %127[0, 0, 0] : f32 from vector<1x1x1xf32>
    %cst_64 = arith.constant 2.500000e-03 : f32
    %129 = arith.mulf %128, %cst_64 : f32
    %cst_65 = arith.constant 0.000000e+00 : f32
    %130 = arith.maximumf %129, %cst_65 : f32
    %c0_66 = arith.constant 0 : index
    %c0_67 = arith.constant 0 : index
    %131 = vector.load %arg15[%c0_66, %c0_67] : memref<12x24xf32, #tpu.memory_space<vmem>>, vector<12x24xf32>
    %c0_68 = arith.constant 0 : index
    %c0_69 = arith.constant 0 : index
    %132 = vector.load %arg16[%c0_68, %c0_69] : memref<24x12xf32, #tpu.memory_space<vmem>>, vector<24x12xf32>
    %133 = tpu.concatenate %91, %93 in 0 : vector<24x24xf32>, vector<24x24xf32> -> vector<48x24xf32>
    %cst_70 = arith.constant dense<0.000000e+00> : vector<48x12xf32>
    %134 = tpu.matmul %133, %132, %cst_70 {dimension_numbers = #tpu.dot_dimension_numbers<[1], [0], [0], [1], [0, 0, 1, 1], [], []>} : vector<48x24xf32>, vector<24x12xf32>, vector<48x12xf32> -> vector<48x12xf32>
    %135 = vector.extract_strided_slice %134 {offsets = [0, 0], sizes = [24, 12], strides = [1, 1]} : vector<48x12xf32> to vector<24x12xf32>
    %cst_71 = arith.constant dense<0.000000e+00> : vector<12x12xf32>
    %136 = tpu.matmul %131, %135, %cst_71 {dimension_numbers = #tpu.dot_dimension_numbers<[1], [0], [0], [1], [0, 0, 1, 1], [], []>} : vector<12x24xf32>, vector<24x12xf32>, vector<12x12xf32> -> vector<12x12xf32>
    %137 = vector.extract_strided_slice %134 {offsets = [24, 0], sizes = [24, 12], strides = [1, 1]} : vector<48x12xf32> to vector<24x12xf32>
    %cst_72 = arith.constant dense<0.000000e+00> : vector<12x12xf32>
    %138 = tpu.matmul %131, %137, %cst_72 {dimension_numbers = #tpu.dot_dimension_numbers<[1], [0], [0], [1], [0, 0, 1, 1], [], []>} : vector<12x24xf32>, vector<24x12xf32>, vector<12x12xf32> -> vector<12x12xf32>
    %c0_73 = arith.constant 0 : index
    %c0_74 = arith.constant 0 : index
    %139 = vector.load %arg7[%c0_73, %c0_74] : memref<8x12xf32, #tpu.memory_space<vmem>>, vector<8x12xf32>
    %c0_75 = arith.constant 0 : index
    %c0_76 = arith.constant 0 : index
    %140 = vector.load %arg8[%c0_75, %c0_76] : memref<12x8xf32, #tpu.memory_space<vmem>>, vector<12x8xf32>
    %141 = arith.mulf %136, %136 : vector<12x12xf32>
    %142 = arith.mulf %138, %138 : vector<12x12xf32>
    %143 = arith.mulf %136, %138 : vector<12x12xf32>
    %cst_77 = arith.constant dense<0.000000e+00> : vector<12x8xf32>
    %144 = tpu.matmul %136, %140, %cst_77 {dimension_numbers = #tpu.dot_dimension_numbers<[1], [0], [0], [1], [0, 0, 1, 1], [], []>} : vector<12x12xf32>, vector<12x8xf32>, vector<12x8xf32> -> vector<12x8xf32>
    %cst_78 = arith.constant dense<0.000000e+00> : vector<8x8xf32>
    %145 = tpu.matmul %139, %144, %cst_78 {dimension_numbers = #tpu.dot_dimension_numbers<[1], [0], [0], [1], [0, 0, 1, 1], [], []>} : vector<8x12xf32>, vector<12x8xf32>, vector<8x8xf32> -> vector<8x8xf32>
    %cst_79 = arith.constant dense<0.000000e+00> : vector<12x8xf32>
    %146 = tpu.matmul %138, %140, %cst_79 {dimension_numbers = #tpu.dot_dimension_numbers<[1], [0], [0], [1], [0, 0, 1, 1], [], []>} : vector<12x12xf32>, vector<12x8xf32>, vector<12x8xf32> -> vector<12x8xf32>
    %cst_80 = arith.constant dense<0.000000e+00> : vector<8x8xf32>
    %147 = tpu.matmul %139, %146, %cst_80 {dimension_numbers = #tpu.dot_dimension_numbers<[1], [0], [0], [1], [0, 0, 1, 1], [], []>} : vector<8x12xf32>, vector<12x8xf32>, vector<8x8xf32> -> vector<8x8xf32>
    %cst_81 = arith.constant dense<0.000000e+00> : vector<12x8xf32>
    %148 = tpu.matmul %141, %140, %cst_81 {dimension_numbers = #tpu.dot_dimension_numbers<[1], [0], [0], [1], [0, 0, 1, 1], [], []>} : vector<12x12xf32>, vector<12x8xf32>, vector<12x8xf32> -> vector<12x8xf32>
    %cst_82 = arith.constant dense<0.000000e+00> : vector<8x8xf32>
    %149 = tpu.matmul %139, %148, %cst_82 {dimension_numbers = #tpu.dot_dimension_numbers<[1], [0], [0], [1], [0, 0, 1, 1], [], []>} : vector<8x12xf32>, vector<12x8xf32>, vector<8x8xf32> -> vector<8x8xf32>
    %cst_83 = arith.constant dense<0.000000e+00> : vector<12x8xf32>
    %150 = tpu.matmul %142, %140, %cst_83 {dimension_numbers = #tpu.dot_dimension_numbers<[1], [0], [0], [1], [0, 0, 1, 1], [], []>} : vector<12x12xf32>, vector<12x8xf32>, vector<12x8xf32> -> vector<12x8xf32>
    %cst_84 = arith.constant dense<0.000000e+00> : vector<8x8xf32>
    %151 = tpu.matmul %139, %150, %cst_84 {dimension_numbers = #tpu.dot_dimension_numbers<[1], [0], [0], [1], [0, 0, 1, 1], [], []>} : vector<8x12xf32>, vector<12x8xf32>, vector<8x8xf32> -> vector<8x8xf32>
    %cst_85 = arith.constant dense<0.000000e+00> : vector<12x8xf32>
    %152 = tpu.matmul %143, %140, %cst_85 {dimension_numbers = #tpu.dot_dimension_numbers<[1], [0], [0], [1], [0, 0, 1, 1], [], []>} : vector<12x12xf32>, vector<12x8xf32>, vector<12x8xf32> -> vector<12x8xf32>
    %cst_86 = arith.constant dense<0.000000e+00> : vector<8x8xf32>
    %153 = tpu.matmul %139, %152, %cst_86 {dimension_numbers = #tpu.dot_dimension_numbers<[1], [0], [0], [1], [0, 0, 1, 1], [], []>} : vector<8x12xf32>, vector<12x8xf32>, vector<8x8xf32> -> vector<8x8xf32>
    %154 = arith.mulf %145, %145 : vector<8x8xf32>
    %155 = arith.mulf %147, %147 : vector<8x8xf32>
    %156 = arith.mulf %145, %147 : vector<8x8xf32>
    %157 = arith.subf %149, %154 : vector<8x8xf32>
    %158 = arith.subf %151, %155 : vector<8x8xf32>
    %159 = arith.subf %153, %156 : vector<8x8xf32>
    %cst_87 = arith.constant 2.000000e+00 : f32
    %160 = vector.broadcast %cst_87 : f32 to vector<8x8xf32>
    %161 = arith.mulf %160, %159 : vector<8x8xf32>
    %cst_88 = arith.constant 8.99999984E-4 : f32
    %162 = vector.broadcast %cst_88 : f32 to vector<8x8xf32>
    %163 = arith.addf %161, %162 : vector<8x8xf32>
    %164 = arith.addf %157, %158 : vector<8x8xf32>
    %cst_89 = arith.constant 8.99999984E-4 : f32
    %165 = vector.broadcast %cst_89 : f32 to vector<8x8xf32>
    %166 = arith.addf %164, %165 : vector<8x8xf32>
    %167 = arith.divf %163, %166 : vector<8x8xf32>
    %168 = vector.shape_cast %167 : vector<8x8xf32> to vector<1x8x8xf32>
    %cst_90 = arith.constant dense<0.000000e+00> : vector<1xf32>
    %169 = vector.multi_reduction <add>, %168, %cst_90 [1, 2] : vector<1x8x8xf32> to vector<1xf32>
    %170 = vector.shape_cast %169 : vector<1xf32> to vector<1x1x1xf32>
    %171 = vector.extract %170[0, 0, 0] : f32 from vector<1x1x1xf32>
    %cst_91 = arith.constant 1.562500e-02 : f32
    %172 = arith.mulf %171, %cst_91 : f32
    %cst_92 = arith.constant 0.000000e+00 : f32
    %173 = arith.maximumf %172, %cst_92 : f32
    %c0_93 = arith.constant 0 : index
    %c0_94 = arith.constant 0 : index
    %174 = vector.load %arg17[%c0_93, %c0_94] : memref<6x12xf32, #tpu.memory_space<vmem>>, vector<6x12xf32>
    %c0_95 = arith.constant 0 : index
    %c0_96 = arith.constant 0 : index
    %175 = vector.load %arg18[%c0_95, %c0_96] : memref<12x6xf32, #tpu.memory_space<vmem>>, vector<12x6xf32>
    %cst_97 = arith.constant dense<0.000000e+00> : vector<12x6xf32>
    %176 = tpu.matmul %136, %175, %cst_97 {dimension_numbers = #tpu.dot_dimension_numbers<[1], [0], [0], [1], [0, 0, 1, 1], [], []>} : vector<12x12xf32>, vector<12x6xf32>, vector<12x6xf32> -> vector<12x6xf32>
    %cst_98 = arith.constant dense<0.000000e+00> : vector<6x6xf32>
    %177 = tpu.matmul %174, %176, %cst_98 {dimension_numbers = #tpu.dot_dimension_numbers<[1], [0], [0], [1], [0, 0, 1, 1], [], []>} : vector<6x12xf32>, vector<12x6xf32>, vector<6x6xf32> -> vector<6x6xf32>
    %cst_99 = arith.constant dense<0.000000e+00> : vector<12x6xf32>
    %178 = tpu.matmul %138, %175, %cst_99 {dimension_numbers = #tpu.dot_dimension_numbers<[1], [0], [0], [1], [0, 0, 1, 1], [], []>} : vector<12x12xf32>, vector<12x6xf32>, vector<12x6xf32> -> vector<12x6xf32>
    %cst_100 = arith.constant dense<0.000000e+00> : vector<6x6xf32>
    %179 = tpu.matmul %174, %178, %cst_100 {dimension_numbers = #tpu.dot_dimension_numbers<[1], [0], [0], [1], [0, 0, 1, 1], [], []>} : vector<6x12xf32>, vector<12x6xf32>, vector<6x6xf32> -> vector<6x6xf32>
    %c0_101 = arith.constant 0 : index
    %c0_102 = arith.constant 0 : index
    %180 = vector.load %arg9[%c0_101, %c0_102] : memref<2x6xf32, #tpu.memory_space<vmem>>, vector<2x6xf32>
    %c0_103 = arith.constant 0 : index
    %c0_104 = arith.constant 0 : index
    %181 = vector.load %arg10[%c0_103, %c0_104] : memref<6x2xf32, #tpu.memory_space<vmem>>, vector<6x2xf32>
    %182 = arith.mulf %177, %177 : vector<6x6xf32>
    %183 = arith.mulf %179, %179 : vector<6x6xf32>
    %184 = arith.mulf %177, %179 : vector<6x6xf32>
    %cst_105 = arith.constant dense<0.000000e+00> : vector<6x2xf32>
    %185 = tpu.matmul %177, %181, %cst_105 {dimension_numbers = #tpu.dot_dimension_numbers<[1], [0], [0], [1], [0, 0, 1, 1], [], []>} : vector<6x6xf32>, vector<6x2xf32>, vector<6x2xf32> -> vector<6x2xf32>
    %cst_106 = arith.constant dense<0.000000e+00> : vector<2x2xf32>
    %186 = tpu.matmul %180, %185, %cst_106 {dimension_numbers = #tpu.dot_dimension_numbers<[1], [0], [0], [1], [0, 0, 1, 1], [], []>} : vector<2x6xf32>, vector<6x2xf32>, vector<2x2xf32> -> vector<2x2xf32>
    %cst_107 = arith.constant dense<0.000000e+00> : vector<6x2xf32>
    %187 = tpu.matmul %179, %181, %cst_107 {dimension_numbers = #tpu.dot_dimension_numbers<[1], [0], [0], [1], [0, 0, 1, 1], [], []>} : vector<6x6xf32>, vector<6x2xf32>, vector<6x2xf32> -> vector<6x2xf32>
    %cst_108 = arith.constant dense<0.000000e+00> : vector<2x2xf32>
    %188 = tpu.matmul %180, %187, %cst_108 {dimension_numbers = #tpu.dot_dimension_numbers<[1], [0], [0], [1], [0, 0, 1, 1], [], []>} : vector<2x6xf32>, vector<6x2xf32>, vector<2x2xf32> -> vector<2x2xf32>
    %cst_109 = arith.constant dense<0.000000e+00> : vector<6x2xf32>
    %189 = tpu.matmul %182, %181, %cst_109 {dimension_numbers = #tpu.dot_dimension_numbers<[1], [0], [0], [1], [0, 0, 1, 1], [], []>} : vector<6x6xf32>, vector<6x2xf32>, vector<6x2xf32> -> vector<6x2xf32>
    %cst_110 = arith.constant dense<0.000000e+00> : vector<2x2xf32>
    %190 = tpu.matmul %180, %189, %cst_110 {dimension_numbers = #tpu.dot_dimension_numbers<[1], [0], [0], [1], [0, 0, 1, 1], [], []>} : vector<2x6xf32>, vector<6x2xf32>, vector<2x2xf32> -> vector<2x2xf32>
    %cst_111 = arith.constant dense<0.000000e+00> : vector<6x2xf32>
    %191 = tpu.matmul %183, %181, %cst_111 {dimension_numbers = #tpu.dot_dimension_numbers<[1], [0], [0], [1], [0, 0, 1, 1], [], []>} : vector<6x6xf32>, vector<6x2xf32>, vector<6x2xf32> -> vector<6x2xf32>
    %cst_112 = arith.constant dense<0.000000e+00> : vector<2x2xf32>
    %192 = tpu.matmul %180, %191, %cst_112 {dimension_numbers = #tpu.dot_dimension_numbers<[1], [0], [0], [1], [0, 0, 1, 1], [], []>} : vector<2x6xf32>, vector<6x2xf32>, vector<2x2xf32> -> vector<2x2xf32>
    %cst_113 = arith.constant dense<0.000000e+00> : vector<6x2xf32>
    %193 = tpu.matmul %184, %181, %cst_113 {dimension_numbers = #tpu.dot_dimension_numbers<[1], [0], [0], [1], [0, 0, 1, 1], [], []>} : vector<6x6xf32>, vector<6x2xf32>, vector<6x2xf32> -> vector<6x2xf32>
    %cst_114 = arith.constant dense<0.000000e+00> : vector<2x2xf32>
    %194 = tpu.matmul %180, %193, %cst_114 {dimension_numbers = #tpu.dot_dimension_numbers<[1], [0], [0], [1], [0, 0, 1, 1], [], []>} : vector<2x6xf32>, vector<6x2xf32>, vector<2x2xf32> -> vector<2x2xf32>
    %195 = arith.mulf %186, %186 : vector<2x2xf32>
    %196 = arith.mulf %188, %188 : vector<2x2xf32>
    %197 = arith.mulf %186, %188 : vector<2x2xf32>
    %198 = arith.subf %190, %195 : vector<2x2xf32>
    %199 = arith.subf %192, %196 : vector<2x2xf32>
    %200 = arith.subf %194, %197 : vector<2x2xf32>
    %cst_115 = arith.constant 2.000000e+00 : f32
    %201 = vector.broadcast %cst_115 : f32 to vector<2x2xf32>
    %202 = arith.mulf %201, %200 : vector<2x2xf32>
    %cst_116 = arith.constant 8.99999984E-4 : f32
    %203 = vector.broadcast %cst_116 : f32 to vector<2x2xf32>
    %204 = arith.addf %202, %203 : vector<2x2xf32>
    %205 = arith.addf %198, %199 : vector<2x2xf32>
    %cst_117 = arith.constant 8.99999984E-4 : f32
    %206 = vector.broadcast %cst_117 : f32 to vector<2x2xf32>
    %207 = arith.addf %205, %206 : vector<2x2xf32>
    %208 = arith.divf %204, %207 : vector<2x2xf32>
    %cst_118 = arith.constant 2.000000e+00 : f32
    %209 = vector.broadcast %cst_118 : f32 to vector<2x2xf32>
    %210 = arith.mulf %209, %197 : vector<2x2xf32>
    %cst_119 = arith.constant 9.99999974E-5 : f32
    %211 = vector.broadcast %cst_119 : f32 to vector<2x2xf32>
    %212 = arith.addf %210, %211 : vector<2x2xf32>
    %213 = arith.addf %195, %196 : vector<2x2xf32>
    %cst_120 = arith.constant 9.99999974E-5 : f32
    %214 = vector.broadcast %cst_120 : f32 to vector<2x2xf32>
    %215 = arith.addf %213, %214 : vector<2x2xf32>
    %216 = arith.divf %212, %215 : vector<2x2xf32>
    %217 = arith.mulf %216, %208 : vector<2x2xf32>
    %218 = vector.shape_cast %217 : vector<2x2xf32> to vector<1x2x2xf32>
    %cst_121 = arith.constant dense<0.000000e+00> : vector<1xf32>
    %219 = vector.multi_reduction <add>, %218, %cst_121 [1, 2] : vector<1x2x2xf32> to vector<1xf32>
    %220 = vector.shape_cast %219 : vector<1xf32> to vector<1x1x1xf32>
    %221 = vector.extract %220[0, 0, 0] : f32 from vector<1x1x1xf32>
    %cst_122 = arith.constant 2.500000e-01 : f32
    %222 = arith.mulf %221, %cst_122 : f32
    %cst_123 = arith.constant 0.000000e+00 : f32
    %223 = arith.maximumf %222, %cst_123 : f32
    %224 = tpu.iota {dimensions = array<i32: 1>} : vector<1x128xi32>
    %cst_124 = arith.constant 0.000000e+00 : f32
    %225 = vector.broadcast %cst_124 : f32 to vector<1x128xf32>
    %c0_i32 = arith.constant 0 : i32
    %226 = vector.broadcast %c0_i32 : i32 to vector<1x128xi32>
    %227 = arith.cmpi eq, %224, %226 : vector<1x128xi32>
    %cst_125 = arith.constant 0.000000e+00 : f32
    %228 = vector.broadcast %40 : f32 to vector<1x128xf32>
    %229 = vector.broadcast %cst_125 : f32 to vector<1x128xf32>
    %230 = arith.select %227, %228, %229 : vector<1x128xi1>, vector<1x128xf32>
    %231 = arith.addf %225, %230 : vector<1x128xf32>
    %c1_i32 = arith.constant 1 : i32
    %232 = vector.broadcast %c1_i32 : i32 to vector<1x128xi32>
    %233 = arith.cmpi eq, %224, %232 : vector<1x128xi32>
    %cst_126 = arith.constant 0.000000e+00 : f32
    %234 = vector.broadcast %85 : f32 to vector<1x128xf32>
    %235 = vector.broadcast %cst_126 : f32 to vector<1x128xf32>
    %236 = arith.select %233, %234, %235 : vector<1x128xi1>, vector<1x128xf32>
    %237 = arith.addf %231, %236 : vector<1x128xf32>
    %c2_i32 = arith.constant 2 : i32
    %238 = vector.broadcast %c2_i32 : i32 to vector<1x128xi32>
    %239 = arith.cmpi eq, %224, %238 : vector<1x128xi32>
    %cst_127 = arith.constant 0.000000e+00 : f32
    %240 = vector.broadcast %130 : f32 to vector<1x128xf32>
    %241 = vector.broadcast %cst_127 : f32 to vector<1x128xf32>
    %242 = arith.select %239, %240, %241 : vector<1x128xi1>, vector<1x128xf32>
    %243 = arith.addf %237, %242 : vector<1x128xf32>
    %c3_i32 = arith.constant 3 : i32
    %244 = vector.broadcast %c3_i32 : i32 to vector<1x128xi32>
    %245 = arith.cmpi eq, %224, %244 : vector<1x128xi32>
    %cst_128 = arith.constant 0.000000e+00 : f32
    %246 = vector.broadcast %173 : f32 to vector<1x128xf32>
    %247 = vector.broadcast %cst_128 : f32 to vector<1x128xf32>
    %248 = arith.select %245, %246, %247 : vector<1x128xi1>, vector<1x128xf32>
    %249 = arith.addf %243, %248 : vector<1x128xf32>
    %c4_i32 = arith.constant 4 : i32
    %250 = vector.broadcast %c4_i32 : i32 to vector<1x128xi32>
    %251 = arith.cmpi eq, %224, %250 : vector<1x128xi32>
    %cst_129 = arith.constant 0.000000e+00 : f32
    %252 = vector.broadcast %223 : f32 to vector<1x128xf32>
    %253 = vector.broadcast %cst_129 : f32 to vector<1x128xf32>
    %254 = arith.select %251, %252, %253 : vector<1x128xi1>, vector<1x128xf32>
    %255 = arith.addf %249, %254 : vector<1x128xf32>
    %256 = vector.shape_cast %255 : vector<1x128xf32> to vector<1x1x128xf32>
    %c0_130 = arith.constant 0 : index
    %c0_131 = arith.constant 0 : index
    %c0_132 = arith.constant 0 : index
    %257 = vector.load %arg21[%c0_130, %c0_131, %c0_132] : memref<1x1x128xf32, #tpu.memory_space<vmem>>, vector<1x1x128xf32>
    tpu.vector_store %arg21[%c0_130, %c0_131, %c0_132], %256 {strides = array<i32>} : memref<1x1x128xf32, #tpu.memory_space<vmem>>, vector<1x1x128xf32>,
    return
  }
  func.func @transform_0(%arg0: i32) -> (i32, i32) {
    %c0_i32 = arith.constant 0 : i32
    %c0_i32_0 = arith.constant 0 : i32
    %c0_i32_1 = arith.constant 0 : i32
    return %c0_i32, %c0_i32_0 : i32, i32
  }
  func.func @transform_1(%arg0: i32) -> (i32, i32) {
    %c0_i32 = arith.constant 0 : i32
    %c0_i32_0 = arith.constant 0 : i32
    %c0_i32_1 = arith.constant 0 : i32
    return %c0_i32, %c0_i32_0 : i32, i32
  }
  func.func @transform_2(%arg0: i32) -> (i32, i32) {
    %c0_i32 = arith.constant 0 : i32
    %c0_i32_0 = arith.constant 0 : i32
    %c0_i32_1 = arith.constant 0 : i32
    return %c0_i32, %c0_i32_0 : i32, i32
  }
  func.func @transform_3(%arg0: i32) -> (i32, i32) {
    %c0_i32 = arith.constant 0 : i32
    %c0_i32_0 = arith.constant 0 : i32
    %c0_i32_1 = arith.constant 0 : i32
    return %c0_i32, %c0_i32_0 : i32, i32
  }
  func.func @transform_4(%arg0: i32) -> (i32, i32) {
    %c0_i32 = arith.constant 0 : i32
    %c0_i32_0 = arith.constant 0 : i32
    %c0_i32_1 = arith.constant 0 : i32
    return %c0_i32, %c0_i32_0 : i32, i32
  }
  func.func @transform_5(%arg0: i32) -> (i32, i32) {
    %c0_i32 = arith.constant 0 : i32
    %c0_i32_0 = arith.constant 0 : i32
    %c0_i32_1 = arith.constant 0 : i32
    return %c0_i32, %c0_i32_0 : i32, i32
  }
  func.func @transform_6(%arg0: i32) -> (i32, i32) {
    %c0_i32 = arith.constant 0 : i32
    %c0_i32_0 = arith.constant 0 : i32
    %c0_i32_1 = arith.constant 0 : i32
    return %c0_i32, %c0_i32_0 : i32, i32
  }
  func.func @transform_7(%arg0: i32) -> (i32, i32) {
    %c0_i32 = arith.constant 0 : i32
    %c0_i32_0 = arith.constant 0 : i32
    %c0_i32_1 = arith.constant 0 : i32
    return %c0_i32, %c0_i32_0 : i32, i32
  }
  func.func @transform_8(%arg0: i32) -> (i32, i32) {
    %c0_i32 = arith.constant 0 : i32
    %c0_i32_0 = arith.constant 0 : i32
    %c0_i32_1 = arith.constant 0 : i32
    return %c0_i32, %c0_i32_0 : i32, i32
  }
  func.func @transform_9(%arg0: i32) -> (i32, i32) {
    %c0_i32 = arith.constant 0 : i32
    %c0_i32_0 = arith.constant 0 : i32
    %c0_i32_1 = arith.constant 0 : i32
    return %c0_i32, %c0_i32_0 : i32, i32
  }
  func.func @transform_10(%arg0: i32) -> (i32, i32) {
    %c0_i32 = arith.constant 0 : i32
    %c0_i32_0 = arith.constant 0 : i32
    %c0_i32_1 = arith.constant 0 : i32
    return %c0_i32, %c0_i32_0 : i32, i32
  }
  func.func @transform_11(%arg0: i32) -> (i32, i32) {
    %c0_i32 = arith.constant 0 : i32
    %c0_i32_0 = arith.constant 0 : i32
    %c0_i32_1 = arith.constant 0 : i32
    return %c0_i32, %c0_i32_0 : i32, i32
  }
  func.func @transform_12(%arg0: i32) -> (i32, i32) {
    %c0_i32 = arith.constant 0 : i32
    %c0_i32_0 = arith.constant 0 : i32
    %c0_i32_1 = arith.constant 0 : i32
    return %c0_i32, %c0_i32_0 : i32, i32
  }
  func.func @transform_13(%arg0: i32) -> (i32, i32) {
    %c0_i32 = arith.constant 0 : i32
    %c0_i32_0 = arith.constant 0 : i32
    %c0_i32_1 = arith.constant 0 : i32
    return %c0_i32, %c0_i32_0 : i32, i32
  }
  func.func @transform_14(%arg0: i32) -> (i32, i32) {
    %c0_i32 = arith.constant 0 : i32
    %c0_i32_0 = arith.constant 0 : i32
    %c0_i32_1 = arith.constant 0 : i32
    return %c0_i32, %c0_i32_0 : i32, i32
  }
  func.func @transform_15(%arg0: i32) -> (i32, i32) {
    %c0_i32 = arith.constant 0 : i32
    %c0_i32_0 = arith.constant 0 : i32
    %c0_i32_1 = arith.constant 0 : i32
    return %c0_i32, %c0_i32_0 : i32, i32
  }
  func.func @transform_16(%arg0: i32) -> (i32, i32) {
    %c0_i32 = arith.constant 0 : i32
    %c0_i32_0 = arith.constant 0 : i32
    %c0_i32_1 = arith.constant 0 : i32
    return %c0_i32, %c0_i32_0 : i32, i32
  }
  func.func @transform_17(%arg0: i32) -> (i32, i32) {
    %c0_i32 = arith.constant 0 : i32
    %c0_i32_0 = arith.constant 0 : i32
    %c0_i32_1 = arith.constant 0 : i32
    return %c0_i32, %c0_i32_0 : i32, i32
  }
  func.func @transform_18(%arg0: i32) -> (i32, i32, i32) {
    %c0_i32 = arith.constant 0 : i32
    %c0_i32_0 = arith.constant 0 : i32
    %c0_i32_1 = arith.constant 0 : i32
    return %arg0, %c0_i32, %c0_i32_0 : i32, i32, i32
  }
  func.func @transform_19(%arg0: i32) -> (i32, i32, i32) {
    %c0_i32 = arith.constant 0 : i32
    %c0_i32_0 = arith.constant 0 : i32
    %c0_i32_1 = arith.constant 0 : i32
    return %arg0, %c0_i32, %c0_i32_0 : i32, i32, i32
  }
  func.func @transform_20(%arg0: i32) -> (i32, i32, i32) {
    %c0_i32 = arith.constant 0 : i32
    %c0_i32_0 = arith.constant 0 : i32
    %c0_i32_1 = arith.constant 0 : i32
    return %arg0, %c0_i32, %c0_i32_0 : i32, i32, i32
  }
}

</mosaic_0001>

<bundles_post_ra>
// kernel: ms_ssim_loss.1
= control target key start
LH: loop header
LB: loop body
LE: loop exit
PB: predicated region body
PF: predicated region fallthrough
CT: control target
= control target key end

     0   :  { %s7589_s0 = inlined_call_operand.hbm [shape: f32[92,96], index: 0, kind: input, shape index: {}]   ;;  %s7590_s1 = inlined_call_operand.hbm [shape: f32[96,92], index: 1, kind: input, shape index: {}]   ;;  %s7591_s2 = inlined_call_operand.hbm [shape: f32[44,48], index: 2, kind: input, shape index: {}]   ;;  %s7592_s3 = inlined_call_operand.hbm [shape: f32[48,44], index: 3, kind: input, shape index: {}]   ;;  %s7593_s4 = inlined_call_operand.hbm [shape: f32[20,24], index: 4, kind: input, shape index: {}]   ;;  %s7594_s5 = inlined_call_operand.hbm [shape: f32[24,20], index: 5, kind: input, shape index: {}]   ;;  %s7595_s6 = inlined_call_operand.hbm [shape: f32[8,12], index: 6, kind: input, shape index: {}]   ;;  %s7596_s7 = inlined_call_operand.hbm [shape: f32[12,8], index: 7, kind: input, shape index: {}]   ;;  %s7597_s8 = inlined_call_operand.hbm [shape: f32[2,6], index: 8, kind: input, shape index: {}]   ;;  %s7598_s9 = inlined_call_operand.hbm [shape: f32[6,2], index: 9, kind: input, shape index: {}]   ;;  %s7599_s10 = inlined_call_operand.hbm [shape: f32[48,96], index: 10, kind: input, shape index: {}]   ;;  %s7600_s11 = inlined_call_operand.hbm [shape: f32[96,48], index: 11, kind: input, shape index: {}]   ;;  %s7601_s12 = inlined_call_operand.hbm [shape: f32[24,48], index: 12, kind: input, shape index: {}]   ;;  %s7602_s13 = inlined_call_operand.hbm [shape: f32[48,24], index: 13, kind: input, shape index: {}]   ;;  %s7603_s14 = inlined_call_operand.hbm [shape: f32[12,24], index: 14, kind: input, shape index: {}]   ;;  %s7604_s15 = inlined_call_operand.hbm [shape: f32[24,12], index: 15, kind: input, shape index: {}]   ;;  %s7605_s16 = inlined_call_operand.vmem [shape: f32[6,12], index: 16, kind: input, shape index: {}]   ;;  %s7606_s17 = inlined_call_operand.vmem [shape: f32[12,6], index: 17, kind: input, shape index: {}]   ;;  %s7607_s18 = inlined_call_operand.hbm [shape: f32[4,96,96], index: 18, kind: input, shape index: {}]   ;;  %s7608_s19 = inlined_call_operand.hbm [shape: f32[4,96,96], index: 19, kind: input, shape index: {}]   ;;  %s7609_s20 = inlined_call_operand.vmem [shape: f32[4,1,128], index: 20, kind: output, shape index: {}]  }
   0x1   :  { %7619 = sst [smem:[#allocation42_spill]] %s7589_s0 }
   0x2   :  { %7620 = sst [smem:[#allocation43_spill]] %s7590_s1 }
   0x3   :  { %7621 = sst [smem:[#allocation44_spill]] %s7591_s2 }
   0x4   :  { %7622 = sst [smem:[#allocation45_spill]] %s7592_s3 }
   0x5   :  { %7623 = sst [smem:[#allocation46_spill]] %s7593_s4 }
   0x6   :  { %7624 = sst [smem:[#allocation47_spill]] %s7594_s5 }
   0x7   :  { %7625 = sst [smem:[#allocation48_spill]] %s7595_s6 }
   0x8   :  { %7626 = sst [smem:[#allocation49_spill]] %s7596_s7 }
   0x9   :  { %7627 = sst [smem:[#allocation50_spill]] %s7597_s8 }
   0xa   :  { %7628 = sst [smem:[#allocation51_spill]] %s7598_s9 }
   0xb   :  { %7629 = sst [smem:[#allocation52_spill]] %s7600_s11 }
   0xc   :  { %7630 = sst [smem:[#allocation53_spill]] %s7602_s13 }
   0xd   :  { %7631 = sst [smem:[#allocation54_spill]] %s7604_s15 }
   0xe   :  { %7632 = sst [smem:[#allocation55_spill]] %s7605_s16 }
   0xf   :  { %7633 = sst [smem:[#allocation56_spill]] %s7606_s17 }
  0x10   :  { %7634 = sst [smem:[#allocation57_spill]] %s7608_s19 }
  0x11   :  { %7635 = sst [smem:[#allocation58_spill]] %s7609_s20 }
  0x12   :  { %25 = vsyncpa [#allocation3], 0 }
  0x13   :  { %26 = vsyncpa [#allocation5], 0 }
  0x14   :  { %27 = vsyncpa [#allocation8], 0 }
  0x15   :  { %28 = vsyncpa [#allocation11], 0 }
  0x16   :  { %29 = vsyncpa [#allocation14], 0 }
  0x17   :  { %30 = vsyncpa [#allocation17], 0 }
  0x18   :  { %31 = vsyncpa [#allocation20], 0 }
  0x19   :  { %32 = vsyncpa [#allocation23], 0 }
  0x1a   :  { %33 = vsyncpa [#allocation26], 0  ;;  %s5749_s1 = smov 0   ;;  %s5751_s22 = smov 0  }
  0x1b   :  { %s5753_s23 = smov 0   ;;  %s5755_s24 = smov 0  }
  0x1c LB: > { %s7636_s3 = sld [smem:[#allocation42_spill]]  ;;  %s5773_s27 = sadd.s32 4294967295, %s5623_s24   ;;  %s5623_s24 = sphi %s5755_s24, %s7693_s24   ;;  %s5619_s23 = sphi %s5753_s23, %s7692_s23   ;;  %s5615_s22 = sphi %s5751_s22, %s7691_s22   ;;  %s5611_s1 = sphi %s5749_s1, %s7690_s1  }
  0x1d   : > { %p4374_p0 = scmp.ge.s32.totalorder %s5623_s24, 1  ;;  %p438_p1 = scmp.eq.s32.totalorder %s5773_s27, 0 }
  0x1e   : > { %p500_p2 = scmp.lt.s32.totalorder %s5623_s24, 5  ;;  %s5625_s4 = smov [#allocation2]  }
  0x1f   : > { %s513_s29 = sshll.u32 %s5625_s4, 4  ;;  %s7639_s21 = sld [smem:[#allocation43_spill]]  ;;  %s514_s29 = int_to_ptr.vmem [resolvable:$true] %s513_s29 }
  0x20   : > { %p5778_p3 = pnand %p4374_p0, %p500_p2  ;;  %s7641_s16 = sld [smem:[#allocation45_spill]] }
  0x21   : > { %s5626_s17 = smov [#allocation4]   ;;  %s7613_s19 = smov 128  }
  0x22   : > { %s511_s26 = sshll.u32 %s7636_s3, 4  ;;  %p4825_p4 = pneg %p5778_p3  ;;  %s512_s26 = int_to_ptr.hbm [resolvable:$true] %s511_s26 }
  0x23   : > { %s7637_s28 = scalar_select %p5778_p3, 1, 0 }
  0x24   : > { %p5789_p5 = pnand %p4825_p4, %p438_p1  ;;  %s7615_s15 = smov 8  }
  0x25   : > { %7638 = sst [smem:[#allocation39_spill]] %s7637_s28  ;;  %s525_s2 = sshll.u32 %s7639_s21, 4  ;;  %s526_s2 = int_to_ptr.hbm [resolvable:$true] %s525_s2 }
  0x26   : > { %s553_s4 = sshll.u32 %s7641_s16, 4  ;;  %s527_s28 = sshll.u32 %s5626_s17, 4  ;;  %s528_s28 = int_to_ptr.vmem [resolvable:$true] %s527_s28  ;;  %s554_s4 = int_to_ptr.hbm [resolvable:$true] %s553_s4 }
  0x27   : > { %4828 = dma.hbm_to_vmem [thread:$0]  (!%p5789_p5), %s512_s26, 1536, %s514_s29, [#allocation3], %s7613_s19, %s7613_s19, %s7615_s15  }
  0x28   : > { %4831 = dma.hbm_to_vmem [thread:$0]  (!%p5789_p5), %s526_s2, 1536, %s528_s28, [#allocation5], %s7613_s19, %s7613_s19, %s7615_s15  }
  0x29   : > { %s7642_s5 = sld [smem:[#allocation47_spill]]  ;;  %s5629_s17 = smov [#allocation7]  }
  0x2a   : > { %s555_s0 = sshll.u32 %s5629_s17, 4  ;;  %s5630_s26 = smov [#allocation10]   ;;  %s556_s0 = int_to_ptr.vmem [resolvable:$true] %s555_s0 }
  0x2b   : > { %4837 = dma.hbm_to_vmem [thread:$0]  (!%p5789_p5), %s554_s4, 768, %s556_s0, [#allocation8], %s7613_s19, %s7613_s19, %s7615_s15  }
  0x2c   : > { %s583_s29 = sshll.u32 %s5630_s26, 4  ;;  %s7643_s7 = sld [smem:[#allocation49_spill]]  ;;  %s584_s29 = int_to_ptr.vmem [resolvable:$true] %s583_s29 }
  0x2d   : > { %s7644_s9 = sld [smem:[#allocation51_spill]]  ;;  %s5631_s17 = smov [#allocation13]  }
  0x2e   : > { %s609_s4 = sshll.u32 %s5631_s17, 4  ;;  %s5632_s0 = smov [#allocation16]   ;;  %s610_s4 = int_to_ptr.vmem [resolvable:$true] %s609_s4 }
  0x2f   : > { %s581_s16 = sshll.u32 %s7642_s5, 4  ;;  %s636_s26 = sshll.u32 %s5632_s0, 4  ;;  %s582_s16 = int_to_ptr.hbm [resolvable:$true] %s581_s16  ;;  %s637_s26 = int_to_ptr.vmem [resolvable:$true] %s636_s26 }
  0x30   : > { %4843 = dma.hbm_to_vmem [thread:$0]  (!%p5789_p5), %s582_s16, 384, %s584_s29, [#allocation11], %s7613_s19, %s7613_s19, %s7615_s15  }
  0x31   : > { %s7645_s11 = sld [smem:[#allocation52_spill]]  ;;  %s5633_s30 = smov [#allocation19]  }
  0x32   : > { %s607_s28 = sshll.u32 %s7643_s7, 4  ;;  %s7646_s13 = sld [smem:[#allocation53_spill]]  ;;  %s608_s28 = int_to_ptr.hbm [resolvable:$true] %s607_s28 }
  0x33   : > { %s634_s20 = sshll.u32 %s7644_s9, 4  ;;  %s661_s17 = sshll.u32 %s5633_s30, 4  ;;  %s635_s20 = int_to_ptr.hbm [resolvable:$true] %s634_s20  ;;  %s662_s17 = int_to_ptr.vmem [resolvable:$true] %s661_s17 }
  0x34   : > { %4849 = dma.hbm_to_vmem [thread:$0]  (!%p5789_p5), %s608_s28, 256, %s610_s4, [#allocation14], %s7613_s19, %s7613_s19, %s7615_s15  }
  0x35   : > { %4855 = dma.hbm_to_vmem [thread:$0]  (!%p5789_p5), %s635_s20, 128, %s637_s26, [#allocation17]  }
  0x36   : > { %s5634_s20 = smov [#allocation22]   ;;  %s5849_s0 = sadd.s32 1, %s5623_s24  }
  0x37   : > { %s659_s29 = sshll.u32 %s7645_s11, 4  ;;  %s689_s4 = sshll.u32 %s5634_s20, 4  ;;  %s660_s29 = int_to_ptr.hbm [resolvable:$true] %s659_s29  ;;  %s690_s4 = int_to_ptr.vmem [resolvable:$true] %s689_s4 }
  0x38   : > { %s687_s28 = sshll.u32 %s7646_s13, 4  ;;  %s424_s26 = sadd.s32 1, %s5619_s23  ;;  %s688_s28 = int_to_ptr.hbm [resolvable:$true] %s687_s28 }
  0x39   : > { %4861 = dma.hbm_to_vmem [thread:$0]  (!%p5789_p5), %s660_s29, 1536, %s662_s17, [#allocation20], %s7613_s19, %s7613_s19, %s7615_s15  }
  0x3a   : > { %4867 = dma.hbm_to_vmem [thread:$0]  (!%p5789_p5), %s688_s28, 768, %s690_s4, [#allocation23], %s7613_s19, %s7613_s19, %s7615_s15  }
  0x3b   : > { %s421_s21 = ssub.s32 %s5623_s24, %s5849_s0  ;;  %p431_p6 = scmp.ne.s32.totalorder %s5619_s23, %s5615_s22 }
  0x3c   : > { %p422_p7 = scmp.eq.s32.totalorder %s421_s21, 0  ;;  %p432_p8 = scmp.eq.s32.totalorder %s5623_s24, 0 }
  0x3d   : > { %p437_p9 = scmp.ne.s32.totalorder %s5615_s22, %s5611_s1  ;;  %p4897_p10 = scmp.lt.s32.totalorder %s5623_s24, 4 }
  0x3e   : > { %s5861_s16 = scalar_select %p422_p7, %s5619_s23, %s424_s26  }
  0x3f   : > { %p433_p11 = por %p432_p8, %p431_p6  ;;  %p5865_p12 = por %p438_p1, %p437_p9 }
  0x40   : > { %s737_s3 = sand.u32 1, %s5623_s24   ;;  %s739_s2 = sand.u32 1, %s5619_s23  }
  0x41   : > { %s5871_s28 = smul.u32 96, %s739_s2  ;;  %p5874_p13 = pnand %p4897_p10, %p433_p11 }
  0x42   : > { %s7617_s30 = smul.u32 96, %s5623_s24  ;;  %s7649_s4 = sld [smem:[#allocation44_spill]] }
  0x43   : > { %s741_s5 = scalar_lea.vmem [#allocation27], %s5871_s28  ;;  %s5887_s9 = scalar_lea.sflag [#allocation3], %s737_s3 }
  0x44   : > { %s746_s15 = scalar_lea.hbm %s7607_s18, %s7617_s30  ;;  %s749_s2 = sshll.u32 %s741_s5, 4  ;;  %s750_s2 = int_to_ptr.vmem [resolvable:$true] %s749_s2 }
  0x45   : > { %s747_s7 = sshll.u32 %s746_s15, 4  ;;  %p5257_p2 = pneg %p5874_p13  ;;  %s748_s7 = int_to_ptr.hbm [resolvable:$true] %s747_s7 }
  0x46   : > { %s5253_s11 = sshra.s32 %s748_s7, 4  ;;  %s5260_s20 = scalar_lea.hbm %s7607_s18, 384  ;;  %s5254_s11 = int_to_ptr.hbm [resolvable:$true] %s5253_s11 }
  0x47   : > { %s5255_s13 = scalar_lea.hbm %s5254_s11, 96  ;;  %p5261_p7 = scmp.lt.s32.totalorder %s5254_s11, %s7607_s18 }
  0x48   : > { %s539_s26 = sshll.u32 %s7649_s4, 4  ;;  %p5256_p0 = scmp.ne.s32.totalorder %s5254_s11, %s5255_s13  ;;  %s540_s26 = int_to_ptr.hbm [resolvable:$true] %s539_s26 }
  0x49   : > { %p5262_p8 = scmp.lt.s32.totalorder %s5260_s20, %s5255_s13 }
  0x4a   : > { %p5258_p4 = pnand %p5257_p2, %p5256_p0 }
  0x4b   : > { %p5263_p9 = por %p5262_p8, %p5261_p7 }
  0x4c   : > { %p5259_p6 = pneg %p5258_p4 }
  0x4e   : > { %p5264_p10 = pnand %p5263_p9, %p5259_p6 }
  0x50   : > { %5267 = shalt.err (!%p5264_p10)
}
  0x51   : > { %s7650_s3 = smov 8   ;;  %s7651_s4 = smov 128  }
  0x52   : > { %4877 = dma.hbm_to_vmem [thread:$0]  (!%p5874_p13), %s748_s7, 1536, %s750_s2, %s5887_s9, %s7651_s4, %s7651_s4, %s7650_s3  }
  0x53   : > { %s5635_s21 = smov [#allocation6]   ;;  %s7652_s5 = sld [smem:[#allocation46_spill]] }
  0x54   : > { %s541_s1 = sshll.u32 %s5635_s21, 4  ;;  %s7653_s6 = sld [smem:[#allocation48_spill]]  ;;  %s542_s1 = int_to_ptr.vmem [resolvable:$true] %s541_s1 }
  0x55   : > { %4834 = dma.hbm_to_vmem [thread:$0]  (!%p5789_p5), %s540_s26, 768, %s542_s1, [#allocation5], %s7651_s4, %s7651_s4, %s7650_s3  }
  0x56   : > { %s5636_s7 = smov [#allocation9]   ;;  %s5637_s30 = smov [#allocation12]  }
  0x57   : > { %s569_s2 = sshll.u32 %s5636_s7, 4  ;;  %s598_s21 = sshll.u32 %s5637_s30, 4  ;;  %s570_s2 = int_to_ptr.vmem [resolvable:$true] %s569_s2  ;;  %s599_s21 = int_to_ptr.vmem [resolvable:$true] %s598_s21 }
  0x58   : > { %s7654_s8 = sld [smem:[#allocation50_spill]]  ;;  %s645_s20 = sshll.u32 %s7599_s10, 4  ;;  %s646_s20 = int_to_ptr.hbm [resolvable:$true] %s645_s20 }
  0x59   : > { %s567_s11 = sshll.u32 %s7652_s5, 4  ;;  %s5638_s7 = smov [#allocation15]   ;;  %s568_s11 = int_to_ptr.hbm [resolvable:$true] %s567_s11 }
  0x5a   : > { %s596_s15 = sshll.u32 %s7653_s6, 4  ;;  %s624_s6 = sshll.u32 %s5638_s7, 4  ;;  %s597_s15 = int_to_ptr.hbm [resolvable:$true] %s596_s15  ;;  %s625_s6 = int_to_ptr.vmem [resolvable:$true] %s624_s6 }
  0x5b   : > { %4840 = dma.hbm_to_vmem [thread:$0]  (!%p5789_p5), %s568_s11, 384, %s570_s2, [#allocation8], %s7651_s4, %s7651_s4, %s7650_s3  }
  0x5c   : > { %4846 = dma.hbm_to_vmem [thread:$0]  (!%p5789_p5), %s597_s15, 128, %s599_s21, [#allocation11]  }
  0x5d   : > { %s5639_s11 = smov [#allocation18]   ;;  %s673_s5 = sshll.u32 %s7601_s12, 4  ;;  %s674_s5 = int_to_ptr.hbm [resolvable:$true] %s673_s5 }
  0x5e   : > { %s622_s26 = sshll.u32 %s7654_s8, 4  ;;  %s647_s2 = sshll.u32 %s5639_s11, 4  ;;  %s623_s26 = int_to_ptr.hbm [resolvable:$true] %s622_s26  ;;  %s648_s2 = int_to_ptr.vmem [resolvable:$true] %s647_s2 }
  0x5f   : > { %4852 = dma.hbm_to_vmem [thread:$0]  (!%p5789_p5), %s623_s26, 32, %s625_s6, [#allocation14]  }
  0x60   : > { %4858 = dma.hbm_to_vmem [thread:$0]  (!%p5789_p5), %s646_s20, 768, %s648_s2, [#allocation17], %s7651_s4, %s7651_s4, %s7650_s3  }
  0x61   : > { %s701_s1 = sshll.u32 %s7603_s14, 4  ;;  %s5640_s6 = smov [#allocation21]   ;;  %s702_s1 = int_to_ptr.hbm [resolvable:$true] %s701_s1 }
  0x62   : > { %s675_s26 = sshll.u32 %s5640_s6, 4  ;;  %s5641_s13 = smov [#allocation24]   ;;  %s676_s26 = int_to_ptr.vmem [resolvable:$true] %s675_s26 }
  0x63   : > { %4864 = dma.hbm_to_vmem [thread:$0]  (!%p5789_p5), %s674_s5, 384, %s676_s26, [#allocation20], %s7651_s4, %s7651_s4, %s7650_s3  }
  0x64   : > { %s703_s7 = sshll.u32 %s5641_s13, 4  ;;  %s7655_s20 = sld [smem:[#allocation54_spill]]  ;;  %s704_s7 = int_to_ptr.vmem [resolvable:$true] %s703_s7 }
  0x65   : > { %4870 = dma.hbm_to_vmem [thread:$0]  (!%p5789_p5), %s702_s1, 256, %s704_s7, [#allocation23], %s7651_s4, %s7651_s4, %s7650_s3  }
  0x66   : > { %s5642_s19 = smov [#allocation25]   ;;  %s7656_s21 = smul.u32 96, %s5623_s24 }
  0x67   : > { %s717_s15 = sshll.u32 %s5642_s19, 4  ;;  %s7657_s5 = sld [smem:[#allocation57_spill]]  ;;  %s718_s15 = int_to_ptr.vmem [resolvable:$true] %s717_s15 }
  0x68   : > { %s763_s11 = scalar_lea.vmem [#allocation28], %s5871_s28 }
  0x69   : > { %s771_s30 = sshll.u32 %s763_s11, 4  ;;  %s772_s30 = int_to_ptr.vmem [resolvable:$true] %s771_s30 }
  0x6a   : > { %s715_s2 = sshll.u32 %s7655_s20, 4  ;;  %s716_s2 = int_to_ptr.hbm [resolvable:$true] %s715_s2 }
  0x6b   : > { %4873 = dma.hbm_to_vmem [thread:$0]  (!%p5789_p5), %s716_s2, 384, %s718_s15, [#allocation26], %s7651_s4, %s7651_s4, %s7650_s3  }
  0x6d   : > { %s768_s26 = scalar_lea.hbm %s7657_s5, %s7656_s21  ;;  %s5530_s25 = scalar_lea.hbm %s7657_s5, 384 }
  0x6e   : > { %s769_s13 = sshll.u32 %s768_s26, 4  ;;  %s770_s13 = int_to_ptr.hbm [resolvable:$true] %s769_s13 }
  0x6f   : > { %s5523_s20 = sshra.s32 %s770_s13, 4  ;;  %s5524_s20 = int_to_ptr.hbm [resolvable:$true] %s5523_s20 }
  0x70   : > { %s5525_s1 = scalar_lea.hbm %s5524_s20, 96  ;;  %p5531_p5 = scmp.lt.s32.totalorder %s5524_s20, %s7657_s5 }
  0x71   : > { %p5526_p11 = scmp.ne.s32.totalorder %s5524_s20, %s5525_s1  ;;  %p5532_p6 = scmp.lt.s32.totalorder %s5530_s25, %s5525_s1 }
  0x73   : > { %p5528_p0 = pnand %p5526_p11, %p5257_p2  ;;  %p5533_p7 = por %p5532_p6, %p5531_p5 }
  0x75   : > { %p5529_p4 = pneg %p5528_p0 }
  0x77   : > { %p5534_p8 = pnand %p5533_p7, %p5529_p4 }
  0x79   : > { %5537 = shalt.err (!%p5534_p8)
}
  0x7a   : > { %4880 = dma.hbm_to_vmem [thread:$0]  (!%p5874_p13), %s770_s13, 1536, %s772_s30, %s5887_s9, %s7651_s4, %s7651_s4, %s7650_s3  }
  0x7b   : > { %783 = sbr.rel (%p5778_p3) target bundleno = 3525 (0xdc5), region = 100 }
  0x80   : > { %5570 = dma.done.wait (%p438_p1), [#allocation3], 1536  }
  0x81   : > { %5572 = vsyncadd (%p438_p1), [#allocation3], 4294965760 }
  0x82   : > { %5574 = dma.done.wait (%p438_p1), [#allocation5], 2304  }
  0x83   : > { %5576 = vsyncadd (%p438_p1), [#allocation5], 4294964992 }
  0x84   : > { %5578 = dma.done.wait (%p438_p1), [#allocation8], 1152  }
  0x85   : > { %5580 = vsyncadd (%p438_p1), [#allocation8], 4294966144 }
  0x86   : > { %5582 = dma.done.wait (%p438_p1), [#allocation11], 512  }
  0x87   : > { %5584 = vsyncadd (%p438_p1), [#allocation11], 4294966784 }
  0x88   : > { %5586 = dma.done.wait (%p438_p1), [#allocation14], 288  }
  0x89   : > { %5588 = vsyncadd (%p438_p1), [#allocation14], 4294967008 }
  0x8a   : > { %5590 = dma.done.wait (%p438_p1), [#allocation17], 896  }
  0x8b   : > { %5592 = vsyncadd (%p438_p1), [#allocation17], 4294966400 }
  0x8c   : > { %5594 = dma.done.wait (%p438_p1), [#allocation20], 1920  }
  0x8d   : > { %5596 = vsyncadd (%p438_p1), [#allocation20], 4294965376 }
  0x8e   : > { %5598 = dma.done.wait (%p438_p1), [#allocation23], 1024  }
  0x8f   : > { %5600 = vsyncadd (%p438_p1), [#allocation23], 4294966272 }
  0x90   : > { %5602 = dma.done.wait (%p438_p1), [#allocation26], 384  }
  0x91   : > { %5604 = vsyncadd (%p438_p1), [#allocation26], 4294966912  ;;  %s865_s9 = sand.u32 1, %s5773_s27   ;;  %s867_s17 = sand.u32 1, %s5615_s22  }
  0x92   : > { %s6022_s3 = smul.u32 96, %s867_s17  ;;  %s866_s4 = scalar_lea.sflag [#allocation3], %s865_s9 }
  0x94   : > { %s6025_s2 = scalar_lea.vmem [#allocation27], %s6022_s3 }
  0x95   : > { %5606 = dma.done.wait (%p5865_p12), %s866_s4, 3072  }
  0x96   : > { %5608 = vsyncadd (%p5865_p12), %s866_s4, 4294964224  ;;  %v990_v0 = vld [vmem:[#allocation4 + $0x58] sm:$0xff]  ;;  %v989_v1 = vld [vmem:[#allocation4 + $0x50] sm:$0xff]  ;;  %vm1027_vm0 = vcmask 785408   ;;  %s6092_s29 = scalar_lea.vmem [#allocation28], %s6022_s3  ;;  %vm2006_vm9 = vcmask 752640  }
  0x97   : > { %1212 = vmatpush.msra.mxu0 %v990_v0  ;;  %v988_v2 = vld [vmem:[#allocation4 + $0x48] sm:$0xff]  ;;  %v987_v3 = vld [vmem:[#allocation4 + $0x40] sm:$0xff]  ;;  %v986_v4 = vld [vmem:[#allocation4 + $0x38] sm:$0xff]  ;;  %s7687_s6 = sld [smem:[#allocation56_spill]]  ;;  %s5643_s9 = smov 0.0  }
  0x98   : > { %v985_v5 = vld [vmem:[#allocation4 + $0x30] sm:$0xff]  ;;  %v984_v6 = vld [vmem:[#allocation4 + $0x28] sm:$0xff]  ;;  %v983_v7 = vld [vmem:[#allocation4 + $0x20] sm:$0xff]  ;;  %s7688_s20 = sld [smem:[#allocation55_spill]]  ;;  %p940_p1 = scmp.lt.s32.totalorder %s5773_s27, 3 }
  0x99   : > { %1213 = vmatpush.msra.mxu0 %v989_v1  ;;  %v982_v8 = vld [vmem:[#allocation4 + $0x18] sm:$0xff]  ;;  %v981_v9 = vld [vmem:[#allocation4 + $0x10] sm:$0xff]  ;;  %v980_v10 = vld [vmem:[#allocation4 + $0x8] sm:$0xff]  ;;  %s7689_s30 = sld [smem:[#allocation58_spill]] }
  0x9a   : > { %v979_v11 = vld [vmem:[#allocation4] sm:$0xff]  ;;  %v6032_v12 = vld [vmem:[%s6025_s2] sm:$0xff]  ;;  %v6047_v15 = vld [vmem:[%s6025_s2 + $0x18] sm:$0xff]  ;;  %s7695_s27 = smov (!%p940_p1, %s5773_s27), 3 }
  0x9b   : > { %1214 = vmatpush.msra.mxu0 %v988_v2  ;;  %v6037_v13 = vld [vmem:[%s6025_s2 + $0x8] sm:$0xff]  ;;  %v6042_v14 = vld [vmem:[%s6025_s2 + $0x10] sm:$0xff]  ;;  %v6052_v16 = vld [vmem:[%s6025_s2 + $0x20] sm:$0xff]  ;;  %v991_v44 = vmul.f32 %v6032_v12, %v6032_v12  ;;  %v994_v50 = vmul.f32 %v6047_v15, %v6047_v15 }
  0x9c   : > { %v6057_v17 = vld [vmem:[%s6025_s2 + $0x28] sm:$0xff]  ;;  %v6062_v18 = vld [vmem:[%s6025_s2 + $0x30] sm:$0xff]  ;;  %v6067_v19 = vld [vmem:[%s6025_s2 + $0x38] sm:$0xff]  ;;  %v992_v46 = vmul.f32 %v6037_v13, %v6037_v13  ;;  %v993_v48 = vmul.f32 %v6042_v14, %v6042_v14  ;;  %v995_v52 = vmul.f32 %v6052_v16, %v6052_v16 }
  0x9d   : > { %1215 = vmatpush.msra.mxu0 %v987_v3  ;;  %v6072_v20 = vld [vmem:[%s6025_s2 + $0x40] sm:$0xff]  ;;  %v6077_v21 = vld [vmem:[%s6025_s2 + $0x48] sm:$0xff]  ;;  %v6082_v22 = vld [vmem:[%s6025_s2 + $0x50] sm:$0xff]  ;;  %v996_v54 = vmul.f32 %v6057_v17, %v6057_v17  ;;  %v997_v56 = vmul.f32 %v6062_v18, %v6062_v18  ;;  %v998_v58 = vmul.f32 %v6067_v19, %v6067_v19 }
  0x9e   : > { %v6087_v23 = vld [vmem:[%s6025_s2 + $0x58] sm:$0xff]  ;;  %v6095_v24 = vld [vmem:[%s6092_s29] sm:$0xff]  ;;  %v6100_v25 = vld [vmem:[%s6092_s29 + $0x8] sm:$0xff]  ;;  %v999_v60 = vmul.f32 %v6072_v20, %v6072_v20  ;;  %v1000_v62 = vmul.f32 %v6077_v21, %v6077_v21  ;;  %v1001_v0 = vmul.f32 %v6082_v22, %v6082_v22 }
  0x9f   : > { %1216 = vmatpush.msra.mxu0 %v986_v4  ;;  %v6105_v26 = vld [vmem:[%s6092_s29 + $0x10] sm:$0xff]  ;;  %v6110_v27 = vld [vmem:[%s6092_s29 + $0x18] sm:$0xff]  ;;  %v6115_v29 = vld [vmem:[%s6092_s29 + $0x20] sm:$0xff]  ;;  %v1002_v2 = vmul.f32 %v6087_v23, %v6087_v23  ;;  %v1003_v4 = vmul.f32 %v6095_v24, %v6095_v24 }
  0xa0   : > { %v6120_v31 = vld [vmem:[%s6092_s29 + $0x28] sm:$0xff]  ;;  %v6125_v33 = vld [vmem:[%s6092_s29 + $0x30] sm:$0xff]  ;;  %v6130_v35 = vld [vmem:[%s6092_s29 + $0x38] sm:$0xff] }
  0xa1   : > { %1217 = vmatpush.msra.mxu0 %v985_v5  ;;  %v6135_v37 = vld [vmem:[%s6092_s29 + $0x40] sm:$0xff]  ;;  %v6140_v39 = vld [vmem:[%s6092_s29 + $0x48] sm:$0xff]  ;;  %v6145_v41 = vld [vmem:[%s6092_s29 + $0x50] sm:$0xff] }
  0xa2   : > { %v6150_v43 = vld [vmem:[%s6092_s29 + $0x58] sm:$0xff] }
  0xa3   : > { %1218 = vmatpush.msra.mxu0 %v984_v6  ;;  %v1004_v6 = vmul.f32 %v6100_v25, %v6100_v25 }
  0xa5   : > { %1219 = vmatpush.msra.mxu0 %v983_v7 }
  0xa7   : > { %1220 = vmatpush.msra.mxu0 %v982_v8  ;;  %v1005_v8 = vmul.f32 %v6105_v26, %v6105_v26 }
  0xa9   : > { %1221 = vmatpush.msra.mxu0 %v981_v9 }
  0xab   : > { %1222 = vmatpush.msra.mxu0 %v980_v10  ;;  %v1006_v10 = vmul.f32 %v6110_v27, %v6110_v27 }
  0xad   : > { %1223 = vmatpush.msra.mxu0 %v979_v11 }
  0xae   : > { %4411 = vmatmul.msk.f32.vlgmr.msra.gmra.mxu0 %vm1027_vm0, %v6032_v12 }
  0xb6   : > { %4412 = vmatmul.msk.f32.gmra.mxu0 %vm1027_vm0, %v6037_v13 }
  0xbe   : > { %4413 = vmatmul.msk.f32.gmra.mxu0 %vm1027_vm0, %v6042_v14 }
  0xc6   : > { %4414 = vmatmul.msk.f32.gmra.mxu0 %vm1027_vm0, %v6047_v15 }
  0xce   : > { %4415 = vmatmul.msk.f32.gmra.mxu0 %vm1027_vm0, %v6052_v16 }
  0xd6   : > { %4416 = vmatmul.msk.f32.gmra.mxu0 %vm1027_vm0, %v6057_v17 }
  0xde   : > { %4417 = vmatmul.msk.f32.gmra.mxu0 %vm1027_vm0, %v6062_v18 }
  0xe6   : > { %4418 = vmatmul.msk.f32.gmra.mxu0 %vm1027_vm0, %v6067_v19 }
  0xee   : > { %4419 = vmatmul.msk.f32.gmra.mxu0 %vm1027_vm0, %v6072_v20 }
  0xf6   : > { %4420 = vmatmul.msk.f32.gmra.mxu0 %vm1027_vm0, %v6077_v21 }
  0xfe   : > { %4421 = vmatmul.msk.f32.gmra.mxu0 %vm1027_vm0, %v6082_v22 }
 0x106   : > { %4422 = vmatmul.msk.f32.gmra.mxu0 %vm1027_vm0, %v6087_v23 }
 0x10e   : > { %4423 = vmatmul.msk.f32.gmra.mxu0 %vm1027_vm0, %v6095_v24 }
 0x116   : > { %4424 = vmatmul.msk.f32.gmra.mxu0 %vm1027_vm0, %v6100_v25 }
 0x11e   : > { %4425 = vmatmul.msk.f32.gmra.mxu0 %vm1027_vm0, %v6105_v26 }
 0x126   : > { %4426 = vmatmul.msk.f32.gmra.mxu0 %vm1027_vm0, %v6110_v27 }
 0x12b   : > { %v1225_v28 = vpop.f32.mrf.mxu0 }
 0x12e   : > { %4427 = vmatmul.msk.f32.gmra.mxu0 %vm1027_vm0, %v6115_v29 }
 0x133   : > { %v1228_v30 = vpop.f32.mrf.mxu0 }
 0x136   : > { %4428 = vmatmul.msk.f32.gmra.mxu0 %vm1027_vm0, %v6120_v31 }
 0x13b   : > { %v1231_v32 = vpop.f32.mrf.mxu0 }
 0x13e   : > { %4429 = vmatmul.msk.f32.gmra.mxu0 %vm1027_vm0, %v6125_v33 }
 0x143   : > { %v1234_v34 = vpop.f32.mrf.mxu0 }
 0x146   : > { %4430 = vmatmul.msk.f32.gmra.mxu0 %vm1027_vm0, %v6130_v35 }
 0x14b   : > { %v1237_v36 = vpop.f32.mrf.mxu0 }
 0x14e   : > { %4431 = vmatmul.msk.f32.gmra.mxu0 %vm1027_vm0, %v6135_v37 }
 0x153   : > { %v1240_v38 = vpop.f32.mrf.mxu0 }
 0x156   : > { %4432 = vmatmul.msk.f32.gmra.mxu0 %vm1027_vm0, %v6140_v39 }
 0x15b   : > { %v1243_v40 = vpop.f32.mrf.mxu0 }
 0x15e   : > { %4433 = vmatmul.msk.f32.gmra.mxu0 %vm1027_vm0, %v6145_v41 }
 0x163   : > { %v1246_v42 = vpop.f32.mrf.mxu0 }
 0x166   : > { %4434 = vmatmul.msk.f32.gmra.mxu0 %vm1027_vm0, %v6150_v43 }
 0x16b   : > { %v1249_v45 = vpop.f32.mrf.mxu0 }
 0x16e   : > { %4435 = vmatmul.msk.f32.gmra.mxu0 %vm1027_vm0, %v991_v44  ;;  %v1011_v44 = vmul.f32 %v6135_v37, %v6135_v37 }
 0x173   : > { %v1252_v47 = vpop.f32.mrf.mxu0 }
 0x176   : > { %4436 = vmatmul.msk.f32.gmra.mxu0 %vm1027_vm0, %v992_v46  ;;  %v1012_v46 = vmul.f32 %v6140_v39, %v6140_v39 }
 0x17b   : > { %v1255_v49 = vpop.f32.mrf.mxu0 }
 0x17e   : > { %4437 = vmatmul.msk.f32.gmra.mxu0 %vm1027_vm0, %v993_v48  ;;  %v1013_v48 = vmul.f32 %v6145_v41, %v6145_v41 }
 0x183   : > { %v1258_v51 = vpop.f32.mrf.mxu0 }
 0x184   : > { %1445 = vmatpush.msra.mxu1 %v1258_v51 }
 0x186   : > { %4438 = vmatmul.msk.f32.gmra.mxu0 %vm1027_vm0, %v994_v50  ;;  %1446 = vmatpush.msra.mxu1 %v1255_v49  ;;  %v1014_v50 = vmul.f32 %v6150_v43, %v6150_v43 }
 0x188   : > { %1447 = vmatpush.msra.mxu1 %v1252_v47 }
 0x18a   : > { %1448 = vmatpush.msra.mxu1 %v1249_v45 }
 0x18b   : > { %v1261_v53 = vpop.f32.mrf.mxu0 }
 0x18c   : > { %1449 = vmatpush.msra.mxu1 %v1246_v42 }
 0x18e   : > { %4439 = vmatmul.msk.f32.gmra.mxu0 %vm1027_vm0, %v995_v52  ;;  %1450 = vmatpush.msra.mxu1 %v1243_v40  ;;  %v1010_v40 = vmul.f32 %v6130_v35, %v6130_v35  ;;  %v1015_v52 = vmul.f32 %v6095_v24, %v6032_v12 }
 0x190   : > { %1451 = vmatpush.msra.mxu1 %v1240_v38 }
 0x192   : > { %1452 = vmatpush.msra.mxu1 %v1237_v36  ;;  %v1009_v36 = vmul.f32 %v6125_v33, %v6125_v33 }
 0x193   : > { %v1264_v55 = vpop.f32.mrf.mxu0 }
 0x194   : > { %1453 = vmatpush.msra.mxu1 %v1234_v34 }
 0x196   : > { %4440 = vmatmul.msk.f32.gmra.mxu0 %vm1027_vm0, %v996_v54  ;;  %1454 = vmatpush.msra.mxu1 %v1231_v32  ;;  %v1008_v32 = vmul.f32 %v6120_v31, %v6120_v31  ;;  %v1016_v54 = vmul.f32 %v6100_v25, %v6037_v13 }
 0x198   : > { %1455 = vmatpush.msra.mxu1 %v1228_v30 }
 0x19a   : > { %1456 = vmatpush.msra.mxu1 %v1225_v28  ;;  %v1007_v28 = vmul.f32 %v6115_v29, %v6115_v29 }
 0x19b   : > { %v1267_v57 = vpop.f32.mrf.mxu0 }
 0x19e   : > { %4441 = vmatmul.msk.f32.gmra.mxu0 %vm1027_vm0, %v997_v56  ;;  %v1017_v56 = vmul.f32 %v6105_v26, %v6042_v14 }
 0x1a3   : > { %v1270_v59 = vpop.f32.mrf.mxu0 }
 0x1a6   : > { %4442 = vmatmul.msk.f32.gmra.mxu0 %vm1027_vm0, %v998_v58 }
 0x1ab   : > { %v1273_v61 = vpop.f32.mrf.mxu0 }
 0x1ae   : > { %4443 = vmatmul.msk.f32.gmra.mxu0 %vm1027_vm0, %v999_v60  ;;  %v6247_v60 = vld [vmem:[#allocation2 + $0x8] sm:$0xff] }
 0x1b3   : > { %v1276_v63 = vpop.f32.mrf.mxu0 }
 0x1b6   : > { %4444 = vmatmul.msk.f32.gmra.mxu0 %vm1027_vm0, %v1000_v62  ;;  %v1019_v62 = vmul.f32 %v6115_v29, %v6052_v16 }
 0x1bb   : > { %v1279_v1 = vpop.f32.mrf.mxu0 }
 0x1be   : > { %4445 = vmatmul.msk.f32.gmra.mxu0 %vm1027_vm0, %v1001_v0 }
 0x1c3   : > { %v1282_v3 = vpop.f32.mrf.mxu0 }
 0x1c6   : > { %4446 = vmatmul.msk.f32.gmra.mxu0 %vm1027_vm0, %v1002_v2  ;;  %v6267_v2 = vld [vmem:[#allocation2 + $0x18] sm:$0xff] }
 0x1cb   : > { %v1285_v5 = vpop.f32.mrf.mxu0 }
 0x1ce   : > { %4447 = vmatmul.msk.f32.gmra.mxu0 %vm1027_vm0, %v1003_v4  ;;  %v1021_v4 = vmul.f32 %v6125_v33, %v6062_v18 }
 0x1d3   : > { %v1288_v7 = vpop.f32.mrf.mxu0 }
 0x1d6   : > { %4448 = vmatmul.msk.f32.gmra.mxu0 %vm1027_vm0, %v1004_v6 }
 0x1db   : > { %v1291_v9 = vpop.f32.mrf.mxu0 }
 0x1de   : > { %4449 = vmatmul.msk.f32.gmra.mxu0 %vm1027_vm0, %v1005_v8  ;;  %v6293_v8 = vld [vmem:[#allocation2 + $0x28] sm:$0xff] }
 0x1e3   : > { %v1294_v11 = vpop.f32.mrf.mxu0 }
 0x1e4   : > { %1498 = vmatpush.msra.mxu2 %v1294_v11  ;;  %v6306_v11 = vld [vmem:[#allocation2 + $0x30] sm:$0xff] }
 0x1e6   : > { %4450 = vmatmul.msk.f32.gmra.mxu0 %vm1027_vm0, %v1006_v10  ;;  %1499 = vmatpush.msra.mxu2 %v1291_v9  ;;  %v1023_v10 = vmul.f32 %v6135_v37, %v6072_v20 }
 0x1e8   : > { %1500 = vmatpush.msra.mxu2 %v1288_v7  ;;  %v1022_v7 = vmul.f32 %v6130_v35, %v6067_v19 }
 0x1ea   : > { %1501 = vmatpush.msra.mxu2 %v1285_v5  ;;  %v6280_v5 = vld [vmem:[#allocation2 + $0x20] sm:$0xff] }
 0x1eb   : > { %v6204_v30 = vpop.f32.mrf.mxu0 }
 0x1ec   : > { %1502 = vmatpush.msra.mxu2 %v1282_v3 }
 0x1ee   : > { %4451 = vmatmul.msk.f32.gmra.mxu0 %vm1027_vm0, %v1007_v28  ;;  %1503 = vmatpush.msra.mxu2 %v1279_v1  ;;  %v1020_v1 = vmul.f32 %v6120_v31, %v6057_v17 }
 0x1f0   : > { %1504 = vmatpush.msra.mxu2 %v1276_v63  ;;  %v6256_v63 = vld [vmem:[#allocation2 + $0x10] sm:$0xff] }
 0x1f2   : > { %1505 = vmatpush.msra.mxu2 %v1273_v61 }
 0x1f3   : > { %v6209_v34 = vpop.f32.mrf.mxu0 }
 0x1f4   : > { %1506 = vmatpush.msra.mxu2 %v1270_v59  ;;  %v1018_v59 = vmul.f32 %v6110_v27, %v6047_v15 }
 0x1f6   : > { %4452 = vmatmul.msk.f32.gmra.mxu0 %vm1027_vm0, %v1008_v32  ;;  %1507 = vmatpush.msra.mxu2 %v1267_v57  ;;  %v6238_v57 = vld [vmem:[#allocation2] sm:$0xff]  ;;  %v6319_v32 = vld [vmem:[#allocation2 + $0x38] sm:$0xff] }
 0x1f7   : > { %4471 = vmatmul.msk.f32.vlgmr.msra.gmra.mxu1 %vm1027_vm0, %v6238_v57 }
 0x1f8   : > { %1508 = vmatpush.msra.mxu2 %v1264_v55 }
 0x1fa   : > { %1509 = vmatpush.msra.mxu2 %v1261_v53 }
 0x1fb   : > { %v1303_v38 = vpop.f32.mrf.mxu0  ;;  %4483 = vmatmul.msk.f32.vlgmr.msra.gmra.mxu2 %vm1027_vm0, %v6238_v57 }
 0x1fe   : > { %4453 = vmatmul.msk.f32.gmra.mxu0 %vm1027_vm0, %v1009_v36  ;;  %v1025_v36 = vmul.f32 %v6145_v41, %v6082_v22 }
 0x1ff   : > { %4472 = vmatmul.msk.f32.gmra.mxu1 %vm1027_vm0, %v6247_v60 }
 0x203   : > { %v1306_v42 = vpop.f32.mrf.mxu0  ;;  %4484 = vmatmul.msk.f32.gmra.mxu2 %vm1027_vm0, %v6247_v60 }
 0x206   : > { %4454 = vmatmul.msk.f32.gmra.mxu0 %vm1027_vm0, %v1010_v40 }
 0x207   : > { %4473 = vmatmul.msk.f32.gmra.mxu1 %vm1027_vm0, %v6256_v63 }
 0x20b   : > { %v1309_v45 = vpop.f32.mrf.mxu0  ;;  %4485 = vmatmul.msk.f32.gmra.mxu2 %vm1027_vm0, %v6256_v63 }
 0x20e   : > { %4455 = vmatmul.msk.f32.gmra.mxu0 %vm1027_vm0, %v1011_v44  ;;  %v6343_v44 = vld [vmem:[#allocation2 + $0x48] sm:$0xff] }
 0x20f   : > { %4474 = vmatmul.msk.f32.gmra.mxu1 %vm1027_vm0, %v6267_v2 }
 0x213   : > { %v1312_v47 = vpop.f32.mrf.mxu0  ;;  %4486 = vmatmul.msk.f32.gmra.mxu2 %vm1027_vm0, %v6267_v2 }
 0x216   : > { %4456 = vmatmul.msk.f32.gmra.mxu0 %vm1027_vm0, %v1012_v46  ;;  %v2059_v46 = vld [vmem:[#allocation19 + $0x58] sm:$0xff] }
 0x217   : > { %4475 = vmatmul.msk.f32.gmra.mxu1 %vm1027_vm0, %v6280_v5 }
 0x21b   : > { %v1315_v49 = vpop.f32.mrf.mxu0  ;;  %4487 = vmatmul.msk.f32.gmra.mxu2 %vm1027_vm0, %v6280_v5 }
 0x21e   : > { %4457 = vmatmul.msk.f32.gmra.mxu0 %vm1027_vm0, %v1013_v48  ;;  %v2057_v48 = vld [vmem:[#allocation19 + $0x48] sm:$0xff] }
 0x21f   : > { %4476 = vmatmul.msk.f32.gmra.mxu1 %vm1027_vm0, %v6293_v8 }
 0x223   : > { %v1318_v51 = vpop.f32.mrf.mxu0  ;;  %4488 = vmatmul.msk.f32.gmra.mxu2 %vm1027_vm0, %v6293_v8 }
 0x226   : > { %4458 = vmatmul.msk.f32.gmra.mxu0 %vm1027_vm0, %v1014_v50  ;;  %v6352_v50 = vld [vmem:[#allocation2 + $0x50] sm:$0xff] }
 0x227   : > { %4477 = vmatmul.msk.f32.gmra.mxu1 %vm1027_vm0, %v6306_v11 }
 0x22b   : > { %v1321_v53 = vpop.f32.mrf.mxu0  ;;  %4489 = vmatmul.msk.f32.gmra.mxu2 %vm1027_vm0, %v6306_v11 }
 0x22e   : > { %4459 = vmatmul.msk.f32.gmra.mxu0 %vm1027_vm0, %v1015_v52  ;;  %v2055_v52 = vld [vmem:[#allocation19 + $0x38] sm:$0xff] }
 0x22f   : > { %4478 = vmatmul.msk.f32.gmra.mxu1 %vm1027_vm0, %v6319_v32 }
 0x233   : > { %v1324_v55 = vpop.f32.mrf.mxu0  ;;  %4490 = vmatmul.msk.f32.gmra.mxu2 %vm1027_vm0, %v6319_v32 }
 0x236   : > { %4460 = vmatmul.msk.f32.gmra.mxu0 %vm1027_vm0, %v1016_v54  ;;  %v2053_v54 = vld [vmem:[#allocation19 + $0x28] sm:$0xff] }
 0x23b   : > { %v1327_v58 = vpop.f32.mrf.mxu0 }
 0x23e   : > { %4461 = vmatmul.msk.f32.gmra.mxu0 %vm1027_vm0, %v1017_v56  ;;  %v6360_v56 = vld [vmem:[#allocation2 + $0x58] sm:$0xf] }
 0x243   : > { %v1330_v61 = vpop.f32.mrf.mxu0 }
 0x244   : > { %1551 = vmatpush.msra.mxu3 %v1330_v61  ;;  %v2050_v61 = vld [vmem:[#allocation19 + $0x10] sm:$0xff] }
 0x246   : > { %4462 = vmatmul.msk.f32.gmra.mxu0 %vm1027_vm0, %v1018_v59  ;;  %1552 = vmatpush.msra.mxu3 %v1327_v58  ;;  %v2051_v59 = vld [vmem:[#allocation19 + $0x18] sm:$0xff] }
 0x248   : > { %1553 = vmatpush.msra.mxu3 %v1324_v55  ;;  %v2052_v55 = vld [vmem:[#allocation19 + $0x20] sm:$0xff] }
 0x24a   : > { %1554 = vmatpush.msra.mxu3 %v1321_v53  ;;  %v2054_v53 = vld [vmem:[#allocation19 + $0x30] sm:$0xff] }
 0x24b   : > { %v6258_v0 = vpop.f32.mrf.mxu0 }
 0x24c   : > { %1555 = vmatpush.msra.mxu3 %v1318_v51 }
 0x24e   : > { %4463 = vmatmul.msk.f32.gmra.mxu0 %vm1027_vm0, %v1019_v62  ;;  %1556 = vmatpush.msra.mxu3 %v1315_v49  ;;  %v2056_v49 = vld [vmem:[#allocation19 + $0x40] sm:$0xff]  ;;  %v2049_v62 = vld [vmem:[#allocation19 + $0x8] sm:$0xff] }
 0x250   : > { %1557 = vmatpush.msra.mxu3 %v1312_v47  ;;  %v2058_v47 = vld [vmem:[#allocation19 + $0x50] sm:$0xff] }
 0x252   : > { %1558 = vmatpush.msra.mxu3 %v1309_v45 }
 0x253   : > { %v6269_v3 = vpop.f32.mrf.mxu0 }
 0x254   : > { %1559 = vmatpush.msra.mxu3 %v1306_v42  ;;  %v1026_v42 = vmul.f32 %v6150_v43, %v6087_v23 }
 0x256   : > { %4464 = vmatmul.msk.f32.gmra.mxu0 %vm1027_vm0, %v1020_v1  ;;  %1560 = vmatpush.msra.mxu3 %v1303_v38  ;;  %v6332_v38 = vld [vmem:[#allocation2 + $0x40] sm:$0xff] }
 0x257   : > { %4479 = vmatmul.msk.f32.gmra.mxu1 %vm1027_vm0, %v6332_v38  ;;  %4491 = vmatmul.msk.f32.gmra.mxu2 %vm1027_vm0, %v6332_v38  ;;  %v2048_v1 = vld [vmem:[#allocation19] sm:$0xff] }
 0x258   : > { %1561 = vmatpush.msra.mxu3 %v6209_v34 }
 0x25a   : > { %1562 = vmatpush.msra.mxu3 %v6204_v30  ;;  %v1024_v30 = vmul.f32 %v6140_v39, %v6077_v21 }
 0x25b   : > { %v6282_v6 = vpop.f32.mrf.mxu0  ;;  %4495 = vmatmul.msk.f32.vlgmr.msra.gmra.mxu3 %vm1027_vm0, %v6238_v57 }
 0x25c   : > { %2064 = vmatpush.msrb.mxu3 %v2059_v46 }
 0x25e   : > { %4465 = vmatmul.msk.f32.gmra.mxu0 %vm1027_vm0, %v1021_v4  ;;  %2065 = vmatpush.msrb.mxu3 %v2058_v47 }
 0x25f   : > { %4480 = vmatmul.msk.f32.gmra.mxu1 %vm1027_vm0, %v6343_v44  ;;  %4492 = vmatmul.msk.f32.gmra.mxu2 %vm1027_vm0, %v6343_v44 }
 0x260   : > { %2066 = vmatpush.msrb.mxu3 %v2057_v48 }
 0x262   : > { %2067 = vmatpush.msrb.mxu3 %v2056_v49 }
 0x263   : > { %v6295_v9 = vpop.f32.mrf.mxu0  ;;  %4496 = vmatmul.msk.f32.gmra.mxu3 %vm1027_vm0, %v6247_v60 }
 0x264   : > { %2068 = vmatpush.msrb.mxu3 %v2055_v52 }
 0x266   : > { %4466 = vmatmul.msk.f32.gmra.mxu0 %vm1027_vm0, %v1022_v7  ;;  %2069 = vmatpush.msrb.mxu3 %v2054_v53 }
 0x267   : > { %4481 = vmatmul.msk.f32.gmra.mxu1 %vm1027_vm0, %v6352_v50  ;;  %4493 = vmatmul.msk.f32.gmra.mxu2 %vm1027_vm0, %v6352_v50 }
 0x268   : > { %2070 = vmatpush.msrb.mxu3 %v2053_v54 }
 0x26a   : > { %2071 = vmatpush.msrb.mxu3 %v2052_v55 }
 0x26b   : > { %v6308_v28 = vpop.f32.mrf.mxu0  ;;  %4497 = vmatmul.msk.f32.gmra.mxu3 %vm1027_vm0, %v6256_v63 }
 0x26c   : > { %2072 = vmatpush.msrb.mxu3 %v2051_v59 }
 0x26e   : > { %4467 = vmatmul.msk.f32.gmra.mxu0 %vm1027_vm0, %v1023_v10  ;;  %2073 = vmatpush.msrb.mxu3 %v2050_v61 }
 0x26f   : > { %4482 = vmatmul.msk.f32.gmra.mxu1 %vm1027_vm0, %v6360_v56  ;;  %4494 = vmatmul.msk.f32.gmra.mxu2 %vm1027_vm0, %v6360_v56 }
 0x270   : > { %2074 = vmatpush.msrb.mxu3 %v2049_v62 }
 0x272   : > { %2075 = vmatpush.msrb.mxu3 %v2048_v1 }
 0x273   : > { %v6321_v34 = vpop.f32.mrf.mxu0  ;;  %4498 = vmatmul.msk.f32.gmra.mxu3 %vm1027_vm0, %v6267_v2 }
 0x276   : > { %4468 = vmatmul.msk.f32.gmra.mxu0 %vm1027_vm0, %v1024_v30 }
 0x27b   : > { %v1351_v40 = vpop.f32.mrf.mxu0  ;;  %4499 = vmatmul.msk.f32.gmra.mxu3 %vm1027_vm0, %v6280_v5 }
 0x27e   : > { %4469 = vmatmul.msk.f32.gmra.mxu0 %vm1027_vm0, %v1025_v36  ;;  %v6475_v52 = vpop.f32.mrf.mxu2 }
 0x283   : > { %v1354_v45 = vpop.f32.mrf.mxu0  ;;  %4500 = vmatmul.msk.f32.gmra.mxu3 %vm1027_vm0, %v6293_v8 }
 0x286   : > { %4470 = vmatmul.msk.f32.gmra.mxu0 %vm1027_vm0, %v1026_v42 }
 0x28b   : > { %v1357_v51 = vpop.f32.mrf.mxu0  ;;  %4501 = vmatmul.msk.f32.gmra.mxu3 %vm1027_vm0, %v6306_v11 }
 0x293   : > { %v1360_v58 = vpop.f32.mrf.mxu0  ;;  %4502 = vmatmul.msk.f32.gmra.mxu3 %vm1027_vm0, %v6319_v32 }
 0x29b   : > { %v1363_v4 = vpop.f32.mrf.mxu0  ;;  %4503 = vmatmul.msk.f32.gmra.mxu3 %vm1027_vm0, %v6332_v38 }
 0x2a3   : > { %v1366_v7 = vpop.f32.mrf.mxu0  ;;  %4504 = vmatmul.msk.f32.gmra.mxu3 %vm1027_vm0, %v6343_v44 }
 0x2a4   : > { %1604 = vmatpush.msrb.mxu1 %v1366_v7 }
 0x2a6   : > { %1605 = vmatpush.msrb.mxu1 %v1363_v4 }
 0x2a8   : > { %1606 = vmatpush.msrb.mxu1 %v1360_v58 }
 0x2aa   : > { %1607 = vmatpush.msrb.mxu1 %v1357_v51 }
 0x2ab   : > { %v6372_v10 = vpop.f32.mrf.mxu0  ;;  %4505 = vmatmul.msk.f32.gmra.mxu3 %vm1027_vm0, %v6352_v50 }
 0x2ac   : > { %1608 = vmatpush.msrb.mxu1 %v1354_v45 }
 0x2ae   : > { %1609 = vmatpush.msrb.mxu1 %v1351_v40 }
 0x2b0   : > { %1610 = vmatpush.msrb.mxu1 %v6321_v34 }
 0x2b2   : > { %1611 = vmatpush.msrb.mxu1 %v6308_v28 }
 0x2b3   : > { %v1372_v30 = vpop.f32.mrf.mxu0  ;;  %4506 = vmatmul.msk.f32.gmra.mxu3 %vm1027_vm0, %v6360_v56 }
 0x2b4   : > { %1612 = vmatpush.msrb.mxu1 %v6295_v9 }
 0x2b6   : > { %1613 = vmatpush.msrb.mxu1 %v6282_v6  ;;  %v6412_v6 = vpop.f32.mrf.mxu1 }
 0x2b8   : > { %1614 = vmatpush.msrb.mxu1 %v6269_v3 }
 0x2ba   : > { %1615 = vmatpush.msrb.mxu1 %v6258_v0 }
 0x2bb   : > { %v1375_v36 = vpop.f32.mrf.mxu0  ;;  %4507 = vmatmul.msk.f32.vlgmr.msrb.gmra.mxu1 %vm1027_vm0, %v6238_v57  ;;  %4531 = vmatmul.msk.f32.vlgmr.msrb.gmra.mxu3 %vm1027_vm0, %v6032_v12 }
 0x2c3   : > { %v1378_v28 = vpop.f32.mrf.mxu0  ;;  %4508 = vmatmul.msk.f32.gmra.mxu1 %vm1027_vm0, %v6247_v60  ;;  %4532 = vmatmul.msk.f32.gmra.mxu3 %vm1027_vm0, %v6037_v13 }
 0x2cb   : > { %v1381_v9 = vpop.f32.mrf.mxu0  ;;  %4509 = vmatmul.msk.f32.gmra.mxu1 %vm1027_vm0, %v6256_v63  ;;  %4533 = vmatmul.msk.f32.gmra.mxu3 %vm1027_vm0, %v6042_v14 }
 0x2d3   : > { %v1384_v0 = vpop.f32.mrf.mxu0  ;;  %4510 = vmatmul.msk.f32.gmra.mxu1 %vm1027_vm0, %v6267_v2  ;;  %4534 = vmatmul.msk.f32.gmra.mxu3 %vm1027_vm0, %v6047_v15 }
 0x2db   : > { %v1387_v12 = vpop.f32.mrf.mxu0  ;;  %4511 = vmatmul.msk.f32.gmra.mxu1 %vm1027_vm0, %v6280_v5  ;;  %4535 = vmatmul.msk.f32.gmra.mxu3 %vm1027_vm0, %v6052_v16 }
 0x2de   : > { %v6404_v13 = vpop.f32.mrf.mxu3 }
 0x2e3   : > { %v1390_v3 = vpop.f32.mrf.mxu0  ;;  %4512 = vmatmul.msk.f32.gmra.mxu1 %vm1027_vm0, %v6293_v8  ;;  %4536 = vmatmul.msk.f32.gmra.mxu3 %vm1027_vm0, %v6057_v17  ;;  %v6424_v17 = vpop.f32.mrf.mxu1 }
 0x2e6   : > { %v6410_v14 = vpop.f32.mrf.mxu3 }
 0x2eb   : > { %v1393_v15 = vpop.f32.mrf.mxu0  ;;  %4513 = vmatmul.msk.f32.gmra.mxu1 %vm1027_vm0, %v6306_v11  ;;  %4537 = vmatmul.msk.f32.gmra.mxu3 %vm1027_vm0, %v6062_v18  ;;  %v6434_v45 = vpop.f32.mrf.mxu1 }
 0x2ee   : > { %v6418_v16 = vpop.f32.mrf.mxu3 }
 0x2f3   : > { %v1396_v34 = vpop.f32.mrf.mxu0  ;;  %4514 = vmatmul.msk.f32.gmra.mxu1 %vm1027_vm0, %v6319_v32  ;;  %4538 = vmatmul.msk.f32.gmra.mxu3 %vm1027_vm0, %v6067_v19  ;;  %v6442_v47 = vpop.f32.mrf.mxu1 }
 0x2f6   : > { %v6426_v40 = vpop.f32.mrf.mxu3 }
 0x2fb   : > { %v1399_v42 = vpop.f32.mrf.mxu0  ;;  %4515 = vmatmul.msk.f32.gmra.mxu1 %vm1027_vm0, %v6332_v38  ;;  %4539 = vmatmul.msk.f32.gmra.mxu3 %vm1027_vm0, %v6072_v20 }
 0x2fe   : > { %v6432_v18 = vpop.f32.mrf.mxu3 }
 0x303   : > { %v1402_v46 = vpop.f32.mrf.mxu0  ;;  %4516 = vmatmul.msk.f32.gmra.mxu1 %vm1027_vm0, %v6343_v44  ;;  %4540 = vmatmul.msk.f32.gmra.mxu3 %vm1027_vm0, %v6077_v21  ;;  %v6450_v21 = vpop.f32.mrf.mxu1 }
 0x304   : > { %1657 = vmatpush.msrb.mxu2 %v1402_v46 }
 0x306   : > { %v6440_v19 = vpop.f32.mrf.mxu3  ;;  %1658 = vmatpush.msrb.mxu2 %v1399_v42 }
 0x308   : > { %1659 = vmatpush.msrb.mxu2 %v1396_v34 }
 0x30a   : > { %1660 = vmatpush.msrb.mxu2 %v1393_v15 }
 0x30b   : > { %4517 = vmatmul.msk.f32.gmra.mxu1 %vm1027_vm0, %v6352_v50  ;;  %4541 = vmatmul.msk.f32.gmra.mxu3 %vm1027_vm0, %v6082_v22  ;;  %v6463_v22 = vpop.f32.mrf.mxu1 }
 0x30c   : > { %1661 = vmatpush.msrb.mxu2 %v1390_v3  ;;  %v1708_v3 = vmul.f32 %v6434_v45, %v6434_v45 }
 0x30e   : > { %v6448_v20 = vpop.f32.mrf.mxu3  ;;  %1662 = vmatpush.msrb.mxu2 %v1387_v12 }
 0x310   : > { %1663 = vmatpush.msrb.mxu2 %v1384_v0 }
 0x312   : > { %1664 = vmatpush.msrb.mxu2 %v1381_v9 }
 0x313   : > { %4518 = vmatmul.msk.f32.gmra.mxu1 %vm1027_vm0, %v6360_v56  ;;  %4542 = vmatmul.msk.f32.gmra.mxu3 %vm1027_vm0, %v6087_v23  ;;  %v6473_v51 = vpop.f32.mrf.mxu1 }
 0x314   : > { %1665 = vmatpush.msrb.mxu2 %v1378_v28 }
 0x316   : > { %v6456_v48 = vpop.f32.mrf.mxu3  ;;  %1666 = vmatpush.msrb.mxu2 %v1375_v36 }
 0x318   : > { %1667 = vmatpush.msrb.mxu2 %v1372_v30 }
 0x31a   : > { %1668 = vmatpush.msrb.mxu2 %v6372_v10 }
 0x31b   : > { %4519 = vmatmul.msk.f32.vlgmr.msrb.gmra.mxu2 %vm1027_vm0, %v6238_v57  ;;  %4543 = vmatmul.msk.f32.gmra.mxu3 %vm1027_vm0, %v6095_v24  ;;  %v6483_v57 = vpop.f32.mrf.mxu1 }
 0x31e   : > { %v6465_v49 = vpop.f32.mrf.mxu3 }
 0x323   : > { %4520 = vmatmul.msk.f32.gmra.mxu2 %vm1027_vm0, %v6247_v60  ;;  %4544 = vmatmul.msk.f32.gmra.mxu3 %vm1027_vm0, %v6100_v25  ;;  %v6485_v60 = vpop.f32.mrf.mxu2  ;;  %v6493_v53 = vpop.f32.mrf.mxu1 }
 0x324   : > { %v1719_v1 = vmul.f32 %v6485_v60, %v6485_v60 }
 0x326   : > { %v6471_v23 = vpop.f32.mrf.mxu3 }
 0x32b   : > { %4521 = vmatmul.msk.f32.gmra.mxu2 %vm1027_vm0, %v6256_v63  ;;  %4545 = vmatmul.msk.f32.gmra.mxu3 %vm1027_vm0, %v6105_v26  ;;  %v6499_v26 = vpop.f32.mrf.mxu2 }
 0x32c   : > { %v1720_v12 = vmul.f32 %v6499_v26, %v6499_v26 }
 0x32e   : > { %v6481_v24 = vpop.f32.mrf.mxu3 }
 0x333   : > { %4522 = vmatmul.msk.f32.gmra.mxu2 %vm1027_vm0, %v6267_v2  ;;  %4546 = vmatmul.msk.f32.gmra.mxu3 %vm1027_vm0, %v6110_v27  ;;  %v6507_v27 = vpop.f32.mrf.mxu1  ;;  %v6511_v54 = vpop.f32.mrf.mxu2 }
 0x336   : > { %v6491_v25 = vpop.f32.mrf.mxu3 }
 0x337   : > { %7659 = vst [vmem:[#allocation40_spill] sm:$0xff] %v6491_v25 }
 0x33b   : > { %4523 = vmatmul.msk.f32.gmra.mxu2 %vm1027_vm0, %v6280_v5  ;;  %4547 = vmatmul.msk.f32.gmra.mxu3 %vm1027_vm0, %v6115_v29  ;;  %v6519_v5 = vpop.f32.mrf.mxu1 }
 0x33e   : > { %v6501_v63 = vpop.f32.mrf.mxu3 }
 0x343   : > { %4524 = vmatmul.msk.f32.gmra.mxu2 %vm1027_vm0, %v6293_v8  ;;  %4548 = vmatmul.msk.f32.gmra.mxu3 %vm1027_vm0, %v6120_v31  ;;  %v6521_v8 = vpop.f32.mrf.mxu2  ;;  %v6529_v55 = vpop.f32.mrf.mxu1 }
 0x344   : > { %7660 = vst [vmem:[#allocation41_spill] sm:$0xff] %v6529_v55 }
 0x346   : > { %v6509_v2 = vpop.f32.mrf.mxu3 }
 0x34b   : > { %4525 = vmatmul.msk.f32.gmra.mxu2 %vm1027_vm0, %v6306_v11  ;;  %4549 = vmatmul.msk.f32.gmra.mxu3 %vm1027_vm0, %v6125_v33  ;;  %v6531_v11 = vpop.f32.mrf.mxu2  ;;  %v1617_v58 = vpop.f32.mrf.mxu1 }
 0x34e   : > { %v6517_v29 = vpop.f32.mrf.mxu3 }
 0x353   : > { %4526 = vmatmul.msk.f32.gmra.mxu2 %vm1027_vm0, %v6319_v32  ;;  %4550 = vmatmul.msk.f32.gmra.mxu3 %vm1027_vm0, %v6130_v35  ;;  %v6543_v35 = vpop.f32.mrf.mxu2 }
 0x356   : > { %v6527_v31 = vpop.f32.mrf.mxu3 }
 0x35b   : > { %4527 = vmatmul.msk.f32.gmra.mxu2 %vm1027_vm0, %v6332_v38  ;;  %4551 = vmatmul.msk.f32.gmra.mxu3 %vm1027_vm0, %v6135_v37  ;;  %v1620_v37 = vpop.f32.mrf.mxu1  ;;  %v6551_v38 = vpop.f32.mrf.mxu2 }
 0x35c   : > { %v1755_v30 = vsub.f32 %v1620_v37, %v1719_v1 }
 0x35e   : > { %v6537_v33 = vpop.f32.mrf.mxu3 }
 0x363   : > { %4528 = vmatmul.msk.f32.gmra.mxu2 %vm1027_vm0, %v6343_v44  ;;  %4552 = vmatmul.msk.f32.gmra.mxu3 %vm1027_vm0, %v6140_v39  ;;  %v1623_v44 = vpop.f32.mrf.mxu1  ;;  %v6559_v61 = vpop.f32.mrf.mxu2 }
 0x364   : > { %v1756_v46 = vsub.f32 %v1623_v44, %v1720_v12  ;;  %v1722_v12 = vmul.f32 %v6521_v8, %v6521_v8 }
 0x366   : > { %v6545_v32 = vpop.f32.mrf.mxu3 }
 0x36b   : > { %4529 = vmatmul.msk.f32.gmra.mxu2 %vm1027_vm0, %v6352_v50  ;;  %4553 = vmatmul.msk.f32.gmra.mxu3 %vm1027_vm0, %v6145_v41  ;;  %v1718_v50 = vmul.f32 %v6475_v52, %v6475_v52  ;;  %v1706_v41 = vmul.f32 %v6412_v6, %v6412_v6  ;;  %v1626_v4 = vpop.f32.mrf.mxu1 }
 0x36d   : > { %v1754_v7 = vsub.f32 %v1617_v58, %v1718_v50  ;;  %v1742_v10 = vsub.f32 %v6404_v13, %v1706_v41  ;;  %v1744_v13 = vsub.f32 %v6418_v16, %v1708_v3  ;;  %v1721_v50 = vmul.f32 %v6511_v54, %v6511_v54 }
 0x36e   : > { %v6553_v59 = vpop.f32.mrf.mxu3  ;;  %v1709_v41 = vmul.f32 %v6442_v47, %v6442_v47  ;;  %v1730_v3 = vmul.f32 %v6475_v52, %v6412_v6  ;;  %v1723_v52 = vmul.f32 %v6531_v11, %v6531_v11 }
 0x36f   : > { %v1802_v28 = vadd.f32 %v1754_v7, %v1742_v10  ;;  %v1804_v37 = vadd.f32 %v1756_v46, %v1744_v13  ;;  %v1757_v44 = vsub.f32 %v1626_v4, %v1721_v50 }
 0x370   : > { %v1745_v10 = vsub.f32 %v6426_v40, %v1709_v41  ;;  %v1710_v40 = vmul.f32 %v6450_v21, %v6450_v21 }
 0x371   : > { %v6577_v15 = vadd.f32 0.0009, %v1802_v28 }
 0x373   : > { %4530 = vmatmul.msk.f32.gmra.mxu2 %vm1027_vm0, %v6360_v56  ;;  %4554 = vmatmul.msk.f32.gmra.mxu3 %vm1027_vm0, %v6150_v43  ;;  %v1707_v56 = vmul.f32 %v6424_v17, %v6424_v17  ;;  %v6569_v43 = vpop.f32.mrf.mxu2  ;;  %v1629_v34 = vpop.f32.mrf.mxu1  ;;  %4965 = vrcp.f32 %v6577_v15  ;;  %vm1831_vm2 = vweird.f32 %v6577_v15 }
 0x375   : > { %v1743_v36 = vsub.f32 %v6410_v14, %v1707_v56  ;;  %v6592_v56 = vadd.f32 0.0009, %v1804_v37  ;;  %v1758_v37 = vsub.f32 %v1629_v34, %v1722_v12  ;;  %v1835_v34 = vand.u32 2147483647, %v6577_v15 }
 0x376   : > { %v2098_v39 = vpop.f32.mrf.mxu3 }
 0x377   : > { %v1803_v0 = vadd.f32 %v1755_v30, %v1743_v36  ;;  %vm6652_vm5 = vcmp.eq.f32.partialorder %v1835_v34, 8.507059e+37  ;;  %vm1861_vm11 = vweird.f32 %v6592_v56 }
 0x379   : > { %v6579_v42 = vadd.f32 0.0009, %v1803_v0  ;;  %v6590_v1 = vpop.eup %4965  ;;  %v1805_v0 = vadd.f32 %v1757_v44, %v1745_v10  ;;  %v1746_v44 = vsub.f32 %v6432_v18, %v1710_v40 }
 0x37a   : > { %v1827_v28 = vmul.f32 %v6590_v1, %v6577_v15  ;;  %vm1832_vm1 = vweird.f32 %v6590_v1 }
 0x37b   : > { %v6581_v58 = vpop.f32.mrf.mxu2  ;;  %4967 = vrcp.f32 %v6579_v42  ;;  %v6594_v7 = vpop.f32.mrf.mxu1  ;;  %v6612_v13 = vadd.f32 0.0009, %v1805_v0  ;;  %v1806_v6 = vadd.f32 %v1758_v37, %v1746_v44  ;;  %vm6648_vm4 = vmor %vm1831_vm2, %vm1832_vm1  ;;  %vm1846_vm6 = vweird.f32 %v6579_v42 }
 0x37c   : > { %4969 = vrcp.f32 %v6592_v56  ;;  %v1828_v46 = vsub.f32 1.0, %v1827_v28  ;;  %v1850_v37 = vand.u32 2147483647, %v6579_v42  ;;  %v1724_v44 = vmul.f32 %v6543_v35, %v6543_v35 }
 0x37d   : > { %4971 = vrcp.f32 %v6612_v13  ;;  %v6637_v12 = vadd.f32 0.0009, %v1806_v6  ;;  %v1733_v6 = vmul.f32 %v6511_v54, %v6442_v47  ;;  %vm1876_vm15 = vweird.f32 %v6612_v13 }
 0x37e   : > { %v2101_v62 = vpop.f32.mrf.mxu3  ;;  %v1829_v55 = vmul.f32 %v6590_v1, %v1828_v46  ;;  %vm1851_vm8 = vcmp.eq.f32.partialorder %v1850_v37, 8.507059e+37 }
 0x37f   : > { %4973 = vrcp.f32 %v6637_v12 }
 0x380   : > { %v1830_v0 = vadd.f32 %v6590_v1, %v1829_v55  ;;  %v1867_v55 = vand.u32 2147483648, %v6592_v56 }
 0x381   : > { %v6596_v16 = vpop.eup %4967 }
 0x382   : > { %v1842_v4 = vmul.f32 %v6596_v16, %v6579_v42  ;;  %v6614_v41 = vpop.eup %4969  ;;  %vm1847_vm3 = vweird.f32 %v6596_v16 }
 0x383   : > { %v6599_v30 = vpop.f32.mrf.mxu2  ;;  %vm6670_vm7 = vmor %vm1846_vm6, %vm1847_vm3  ;;  %vm1862_vm10 = vweird.f32 %v6614_v41 }
 0x384   : > { %v1843_v50 = vsub.f32 1.0, %v1842_v4  ;;  %v1837_v4 = vand.u32 2147483648, %v6577_v15  ;;  %vm1863_vm12 = vmor %vm1861_vm11, %vm1862_vm10 }
 0x386   : > { %v2104_v9 = vpop.f32.mrf.mxu3  ;;  %v1844_v18 = vmul.f32 %v6596_v16, %v1843_v50 }
 0x388   : > { %v1845_v40 = vadd.f32 %v6596_v16, %v1844_v18  ;;  %v1712_v18 = vmul.f32 %v6473_v51, %v6473_v51 }
 0x38e   : > { %v2107_v14 = vpop.f32.mrf.mxu3 }
 0x396   : > { %v2110_v36 = vpop.f32.mrf.mxu3 }
 0x397   : > { %2171 = vmatpush.msra.mxu1 %v2110_v36 }
 0x399   : > { %2172 = vmatpush.msra.mxu1 %v2107_v14  ;;  %v6619_v14 = vpop.f32.mrf.mxu1 }
 0x39b   : > { %2173 = vmatpush.msra.mxu1 %v2104_v9  ;;  %v1711_v9 = vmul.f32 %v6463_v22, %v6463_v22 }
 0x39d   : > { %2174 = vmatpush.msra.mxu1 %v2101_v62  ;;  %v1857_v62 = vmul.f32 %v6614_v41, %v6592_v56 }
 0x39e   : > { %v1670_v10 = vpop.f32.mrf.mxu2  ;;  %v6617_v36 = vpop.f32.mrf.mxu3 }
 0x39f   : > { %v1766_v25 = vsub.f32 %v1670_v10, %v1730_v3  ;;  %2175 = vmatpush.msra.mxu1 %v2098_v39  ;;  %v1731_v39 = vmul.f32 %v6485_v60, %v6424_v17  ;;  %v1858_v17 = vsub.f32 1.0, %v1857_v62  ;;  %v6645_v60 = vpop.eup %4971  ;;  %v1838_v10 = vor.u32 1.1754944e-38, %v1837_v4 }
 0x3a0   : > { %vm1877_vm14 = vweird.f32 %v6645_v60 }
 0x3a1   : > { %2176 = vmatpush.msra.mxu1 %v6553_v59  ;;  %v1778_v28 = vmul.f32 2.0, %v1766_v25  ;;  %v1759_v59 = vsub.f32 %v6594_v7, %v1723_v52  ;;  %v1747_v25 = vsub.f32 %v6440_v19, %v1711_v9  ;;  %v1834_v19 = vsel %vm6648_vm4, %v6590_v1, %v1830_v0  ;;  %v6676_v52 = vpop.f32.mrf.mxu1  ;;  %vm1878_vm1 = vmor %vm1876_vm15, %vm1877_vm14 }
 0x3a2   : > { %v1872_v1 = vmul.f32 %v6645_v60, %v6612_v13  ;;  %v1859_v62 = vmul.f32 %v6614_v41, %v1858_v17  ;;  %v1839_v9 = vsel %vm6652_vm5, %v1838_v10, %v1834_v19  ;;  %v1868_v10 = vor.u32 1.1754944e-38, %v1867_v55 }
 0x3a3   : > { %2177 = vmatpush.msra.mxu1 %v6545_v32  ;;  %v1790_v3 = vadd.f32 0.0009, %v1778_v28  ;;  %v1807_v50 = vadd.f32 %v1759_v59, %v1747_v25  ;;  %v1760_v59 = vsub.f32 %v6619_v14, %v1724_v44  ;;  %vm1891_vm4 = vweird.f32 %v6637_v12 }
 0x3a4   : > { %v1860_v17 = vadd.f32 %v6614_v41, %v1859_v62 }
 0x3a5   : > { %2178 = vmatpush.msra.mxu1 %v6537_v33  ;;  %v1852_v33 = vand.u32 2147483648, %v6579_v42  ;;  %v1840_v28 = vmul.f32 %v1839_v9, %v1790_v3  ;;  %v1725_v3 = vmul.f32 %v6551_v38, %v6551_v38 }
 0x3a6   : > { %v1673_v15 = vpop.f32.mrf.mxu2  ;;  %v6658_v7 = vpop.f32.mrf.mxu3 }
 0x3a7   : > { %v1767_v46 = vsub.f32 %v1673_v15, %v1731_v39  ;;  %2179 = vmatpush.msra.mxu1 %v6527_v31  ;;  %v1849_v31 = vsel %vm6670_vm7, %v6596_v16, %v1845_v40  ;;  %v1853_v34 = vor.u32 1.1754944e-38, %v1852_v33  ;;  %v1732_v39 = vmul.f32 %v6499_v26, %v6434_v45  ;;  %v6690_v16 = vld [vmem:[#allocation18] sm:$0xff]  ;;  %v6698_v26 = vpop.eup %4973 }
 0x3a8   : > { %v1873_v45 = vsub.f32 1.0, %v1872_v1  ;;  %v1865_v33 = vand.u32 2147483647, %v6592_v56  ;;  %v1713_v56 = vmul.f32 %v6483_v57, %v6483_v57  ;;  %vm1892_vm3 = vweird.f32 %v6698_v26 }
 0x3a9   : > { %v1779_v42 = vmul.f32 2.0, %v1767_v46  ;;  %2180 = vmatpush.msra.mxu1 %v6517_v29  ;;  %v6692_v29 = vadd.f32 0.0009, %v1807_v50  ;;  %v1854_v4 = vsel %vm1851_vm8, %v1853_v34, %v1849_v31  ;;  %v1887_v46 = vmul.f32 %v6698_v26, %v6637_v12  ;;  %v1641_v1 = vpop.f32.mrf.mxu1  ;;  %v6723_v31 = vld [vmem:[#allocation18 + $0x8] sm:$0xff]  ;;  %vm1893_vm5 = vmor %vm1891_vm4, %vm1892_vm3 }
 0x3aa   : > { %v1864_v50 = vsel %vm1863_vm12, %v6614_v41, %v1860_v17  ;;  %v1874_v44 = vmul.f32 %v6645_v60, %v1873_v45  ;;  %vm1866_vm13 = vcmp.eq.f32.partialorder %v1865_v33, 8.507059e+37  ;;  %v1749_v47 = vsub.f32 %v6456_v48, %v1713_v56 }
 0x3ab   : > { %v1791_v0 = vadd.f32 0.0009, %v1779_v42  ;;  %2181 = vmatpush.msra.mxu1 %v6509_v2  ;;  %v1748_v2 = vsub.f32 %v6448_v20, %v1712_v18  ;;  %4975 = vrcp.f32 %v6692_v29  ;;  %v1761_v18 = vsub.f32 %v6676_v52, %v1725_v3 }
 0x3ac   : > { %v1869_v9 = vsel %vm1866_vm13, %v1868_v10, %v1864_v50  ;;  %v1875_v34 = vadd.f32 %v6645_v60, %v1874_v44  ;;  %v1726_v48 = vmul.f32 %v6559_v61, %v6559_v61  ;;  %vm1906_vm8 = vweird.f32 %v6692_v29 }
 0x3ad   : > { %v1855_v40 = vmul.f32 %v1854_v4, %v1791_v0  ;;  %2182 = vmatpush.msra.mxu1 %v6501_v63  ;;  %v2007_v63 = vsel %vm2006_vm9, %v1840_v28, 0.0  ;;  %v1808_v20 = vadd.f32 %v1760_v59, %v1748_v2  ;;  %v1882_v0 = vand.u32 2147483648, %v6612_v13 }
 0x3ae   : > { %v1676_v25 = vpop.f32.mrf.mxu2  ;;  %v6703_v14 = vpop.f32.mrf.mxu3  ;;  %4555 = vmatmul.msk.f32.vlgmr.msra.gmra.mxu1 %vm1027_vm0, %v6690_v16  ;;  %v1809_v17 = vadd.f32 %v1761_v18, %v1749_v47  ;;  %v1879_v55 = vsel %vm1878_vm1, %v6645_v60, %v1875_v34  ;;  %v1895_v18 = vand.u32 2147483647, %v6637_v12 }
 0x3af   : > { %v2008_v32 = vsel %vm2006_vm9, %v1855_v40, 0.0  ;;  %v1768_v15 = vsub.f32 %v1676_v25, %v1732_v39  ;;  %v6725_v62 = vadd.f32 0.0009, %v1808_v20  ;;  %v1888_v39 = vsub.f32 1.0, %v1887_v46  ;;  %v6754_v20 = vld [vmem:[#allocation18 + $0x10] sm:$0xff] }
 0x3b0   : > { %v2009_v19 = vadd.f32 %v2008_v32, %v2007_v63  ;;  %v1880_v40 = vand.u32 2147483647, %v6612_v13  ;;  %v1714_v13 = vmul.f32 %v6493_v53, %v6493_v53  ;;  %v1883_v32 = vor.u32 1.1754944e-38, %v1882_v0 }
 0x3b1   : > { %v1780_v37 = vmul.f32 2.0, %v1768_v15  ;;  %v6730_v28 = vpop.eup %4975  ;;  %4977 = vrcp.f32 %v6725_v62  ;;  %v1889_v63 = vmul.f32 %v6698_v26, %v1888_v39  ;;  %v1734_v15 = vmul.f32 %v6521_v8, %v6450_v21 }
 0x3b2   : > { %v1902_v2 = vmul.f32 %v6730_v28, %v6692_v29  ;;  %vm1881_vm2 = vcmp.eq.f32.partialorder %v1880_v40, 8.507059e+37  ;;  %v6756_v3 = vadd.f32 0.0009, %v1809_v17  ;;  %v1750_v10 = vsub.f32 %v6465_v49, %v1714_v13  ;;  %v6784_v40 = vld [vmem:[#allocation18 + $0x18] sm:$0xff] }
 0x3b3   : > { %v1792_v42 = vadd.f32 0.0009, %v1780_v37  ;;  %v1884_v46 = vsel %vm1881_vm2, %v1883_v32, %v1879_v55  ;;  %v1644_v37 = vpop.f32.mrf.mxu1  ;;  %v1890_v60 = vadd.f32 %v6698_v26, %v1889_v63  ;;  %v1897_v8 = vand.u32 2147483648, %v6637_v12 }
 0x3b4   : > { %v1903_v44 = vsub.f32 1.0, %v1902_v2  ;;  %4979 = vrcp.f32 %v6756_v3  ;;  %v1727_v49 = vmul.f32 %v6569_v43, %v6569_v43  ;;  %v1715_v12 = vmul.f32 %v6507_v27, %v6507_v27 }
 0x3b5   : > { %v1870_v41 = vmul.f32 %v1869_v9, %v1792_v42  ;;  %v1894_v47 = vsel %vm1893_vm5, %v6698_v26, %v1890_v60  ;;  %v1898_v0 = vor.u32 1.1754944e-38, %v1897_v8  ;;  %vm1896_vm6 = vcmp.eq.f32.partialorder %v1895_v18, 8.507059e+37 }
 0x3b6   : > { %v1679_v54 = vpop.f32.mrf.mxu2  ;;  %v6734_v59 = vpop.f32.mrf.mxu3  ;;  %4556 = vmatmul.msk.f32.gmra.mxu1 %vm1027_vm0, %v6723_v31  ;;  %vm1907_vm7 = vweird.f32 %v6730_v28  ;;  %v1751_v63 = vsub.f32 %v6471_v23, %v1715_v12  ;;  %v1728_v23 = vmul.f32 %v6581_v58, %v6581_v58  ;;  %v1736_v8 = vmul.f32 %v6543_v35, %v6473_v51 }
 0x3b7   : > { %v2010_v52 = vsel %vm2006_vm9, %v1870_v41, 0.0  ;;  %v1769_v4 = vsub.f32 %v1679_v54, %v1733_v6  ;;  %v6760_v56 = vpop.eup %4977  ;;  %v1904_v54 = vmul.f32 %v6730_v28, %v1903_v44  ;;  %vm1908_vm10 = vmor %vm1906_vm8, %vm1907_vm7  ;;  %v1927_v51 = vand.u32 2147483648, %v6725_v62 }
 0x3b8   : > { %v2011_v45 = vadd.f32 %v2010_v52, %v2009_v19  ;;  %v1762_v19 = vsub.f32 %v1641_v1, %v1726_v48  ;;  %v1917_v34 = vmul.f32 %v6760_v56, %v6725_v62  ;;  %v1735_v52 = vmul.f32 %v6531_v11, %v6463_v22 }
 0x3b9   : > { %v1781_v25 = vmul.f32 2.0, %v1769_v4  ;;  %v1763_v48 = vsub.f32 %v1644_v37, %v1727_v49  ;;  %v1905_v26 = vadd.f32 %v6730_v28, %v1904_v54  ;;  %v1912_v22 = vand.u32 2147483648, %v6692_v29 }
 0x3ba   : > { %v1810_v9 = vadd.f32 %v1762_v19, %v1750_v10  ;;  %v6790_v55 = vpop.eup %4979  ;;  %v1910_v19 = vand.u32 2147483647, %v6692_v29  ;;  %v1716_v29 = vmul.f32 %v6519_v5, %v6519_v5  ;;  %vm1922_vm12 = vweird.f32 %v6760_v56 }
 0x3bb   : > { %v1793_v33 = vadd.f32 0.0009, %v1781_v25  ;;  %v1918_v25 = vsub.f32 1.0, %v1917_v34  ;;  %v1647_v32 = vpop.f32.mrf.mxu1  ;;  %v1909_v44 = vsel %vm1908_vm10, %v6730_v28, %v1905_v26  ;;  %vm1921_vm13 = vweird.f32 %v6725_v62 }
 0x3bc   : > { %v6786_v17 = vadd.f32 0.0009, %v1810_v9  ;;  %vm1911_vm11 = vcmp.eq.f32.partialorder %v1910_v19, 8.507059e+37  ;;  %v1764_v9 = vsub.f32 %v1647_v32, %v1728_v23  ;;  %vm1923_vm14 = vmor %vm1921_vm13, %vm1922_vm12  ;;  %v1737_v32 = vmul.f32 %v6551_v38, %v6483_v57 }
 0x3bd   : > { %v1885_v50 = vmul.f32 %v1884_v46, %v1793_v33  ;;  %v1811_v46 = vadd.f32 %v1763_v48, %v1751_v63  ;;  %v1919_v10 = vmul.f32 %v6760_v56, %v1918_v25  ;;  %vm1937_vm1 = vweird.f32 %v6790_v55 }
 0x3be   : > { %v1682_v21 = vpop.f32.mrf.mxu2  ;;  %v6764_v6 = vpop.f32.mrf.mxu3  ;;  %4557 = vmatmul.msk.f32.gmra.mxu1 %vm1027_vm0, %v6754_v20  ;;  %4981 = vrcp.f32 %v6786_v17  ;;  %v1942_v57 = vand.u32 2147483648, %v6756_v3  ;;  %vm1936_vm2 = vweird.f32 %v6756_v3 }
 0x3bf   : > { %v2012_v1 = vsel %vm2006_vm9, %v1885_v50, 0.0  ;;  %v1770_v42 = vsub.f32 %v1682_v21, %v1734_v15  ;;  %v1932_v50 = vmul.f32 %v6790_v55, %v6756_v3  ;;  %v1913_v21 = vor.u32 1.1754944e-38, %v1912_v22  ;;  %vm1938_vm3 = vmor %vm1936_vm2, %vm1937_vm1 }
 0x3c0   : > { %v2013_v41 = vadd.f32 %v2012_v1, %v2011_v45  ;;  %v1899_v45 = vsel %vm1896_vm6, %v1898_v0, %v1894_v47  ;;  %v6816_v18 = vadd.f32 0.0009, %v1811_v46  ;;  %v1920_v28 = vadd.f32 %v6760_v56, %v1919_v10 }
 0x3c1   : > { %v1782_v39 = vmul.f32 2.0, %v1770_v42  ;;  %v6814_v42 = vld [vmem:[#allocation18 + $0x20] sm:$0xff]  ;;  %v1914_v49 = vsel %vm1911_vm11, %v1913_v21, %v1909_v44  ;;  %v1933_v34 = vsub.f32 1.0, %v1932_v50  ;;  %v1752_v47 = vsub.f32 %v6481_v24, %v1716_v29 }
 0x3c2   : > { %4983 = vrcp.f32 %v6816_v18  ;;  %v1729_v24 = vmul.f32 %v6599_v30, %v6599_v30  ;;  %v1924_v25 = vsel %vm1923_vm14, %v6760_v56, %v1920_v28  ;;  %v1928_v22 = vor.u32 1.1754944e-38, %v1927_v51  ;;  %v7668_v44 = vld [vmem:[#allocation40_spill] sm:$0xff] }
 0x3c3   : > { %v1794_v4 = vadd.f32 0.0009, %v1782_v39  ;;  %v1934_v63 = vmul.f32 %v6790_v55, %v1933_v34  ;;  %v1738_v51 = vmul.f32 %v6559_v61, %v6493_v53  ;;  %vm1951_vm6 = vweird.f32 %v6786_v17 }
 0x3c4   : > { %v6820_v39 = vpop.eup %4981  ;;  %vm1966_vm11 = vweird.f32 %v6816_v18 }
 0x3c5   : > { %v1900_v2 = vmul.f32 %v1899_v45, %v1794_v4  ;;  %v1812_v4 = vadd.f32 %v1764_v9, %v1752_v47  ;;  %v1947_v45 = vmul.f32 %v6820_v39, %v6786_v17  ;;  %v1935_v56 = vadd.f32 %v6790_v55, %v1934_v63 }
 0x3c6   : > { %v1685_v13 = vpop.f32.mrf.mxu2  ;;  %v6794_v11 = vpop.f32.mrf.mxu3  ;;  %4558 = vmatmul.msk.f32.gmra.mxu1 %vm1027_vm0, %v6784_v40  ;;  %vm1952_vm5 = vweird.f32 %v6820_v39 }
 0x3c7   : > { %v2014_v15 = vsel %vm2006_vm9, %v1900_v2, 0.0  ;;  %v1771_v33 = vsub.f32 %v1685_v13, %v1735_v52  ;;  %v1925_v52 = vand.u32 2147483647, %v6725_v62  ;;  %v1650_v2 = vpop.f32.mrf.mxu1  ;;  %v7667_v62 = vld [vmem:[#allocation41_spill] sm:$0xff]  ;;  %v6846_v19 = vadd.f32 0.0009, %v1812_v4  ;;  %vm1953_vm7 = vmor %vm1951_vm6, %vm1952_vm5 }
 0x3c8   : > { %v2015_v37 = vadd.f32 %v2014_v15, %v2013_v41  ;;  %v1717_v13 = vmul.f32 %v7667_v62, %v7667_v62  ;;  %v1765_v46 = vsub.f32 %v1650_v2, %v1729_v24  ;;  %v1948_v50 = vsub.f32 1.0, %v1947_v45 }
 0x3c9   : > { %v1783_v60 = vmul.f32 2.0, %v1771_v33  ;;  %vm1926_vm15 = vcmp.eq.f32.partialorder %v1925_v52, 8.507059e+37  ;;  %v6844_v33 = vld [vmem:[#allocation18 + $0x28] sm:$0xff]  ;;  %4985 = vrcp.f32 %v6846_v19  ;;  %v1939_v34 = vsel %vm1938_vm3, %v6790_v55, %v1935_v56 }
 0x3ca   : > { %v1929_v23 = vsel %vm1926_vm15, %v1928_v22, %v1924_v25  ;;  %v1753_v10 = vsub.f32 %v7668_v44, %v1717_v13  ;;  %v1949_v47 = vmul.f32 %v6820_v39, %v1948_v50  ;;  %v1957_v45 = vand.u32 2147483648, %v6786_v17 }
 0x3cb   : > { %v1795_v1 = vadd.f32 0.0009, %v1783_v60  ;;  %v6850_v60 = vpop.eup %4983  ;;  %vm1981_vm15 = vweird.f32 %v6846_v19 }
 0x3cc   : > { %v1813_v9 = vadd.f32 %v1765_v46, %v1753_v10  ;;  %v1950_v4 = vadd.f32 %v6820_v39, %v1949_v47  ;;  %v1739_v46 = vmul.f32 %v6569_v43, %v6507_v27  ;;  %vm1967_vm10 = vweird.f32 %v6850_v60 }
 0x3cd   : > { %v1915_v41 = vmul.f32 %v1914_v49, %v1795_v1  ;;  %v1940_v1 = vand.u32 2147483647, %v6756_v3  ;;  %v1970_v27 = vand.u32 2147483647, %v6816_v18  ;;  %vm1968_vm12 = vmor %vm1966_vm11, %vm1967_vm10 }
 0x3ce   : > { %v1688_v54 = vpop.f32.mrf.mxu2  ;;  %v6824_v35 = vpop.f32.mrf.mxu3  ;;  %4559 = vmatmul.msk.f32.gmra.mxu1 %vm1027_vm0, %v6814_v42  ;;  %v1954_v22 = vsel %vm1953_vm7, %v6820_v39, %v1950_v4  ;;  %v1985_v4 = vand.u32 2147483647, %v6846_v19  ;;  %vm2028_vm7 = vcmask 748544  }
 0x3cf   : > { %v2016_v12 = vsel %vm2006_vm9, %v1915_v41, 0.0  ;;  %v1772_v0 = vsub.f32 %v1688_v54, %v1736_v8  ;;  %v1962_v41 = vmul.f32 %v6850_v60, %v6816_v18  ;;  %v1943_v54 = vor.u32 1.1754944e-38, %v1942_v57 }
 0x3d0   : > { %v2017_v48 = vadd.f32 %v2016_v12, %v2015_v37  ;;  %vm1941_vm4 = vcmp.eq.f32.partialorder %v1940_v1, 8.507059e+37  ;;  %v6870_v12 = vadd.f32 0.0009, %v1813_v9  ;;  %vm1971_vm13 = vcmp.eq.f32.partialorder %v1970_v27, 8.507059e+37 }
 0x3d1   : > { %v1784_v26 = vmul.f32 2.0, %v1772_v0  ;;  %v1944_v0 = vsel %vm1941_vm4, %v1943_v54, %v1939_v34  ;;  %v1963_v24 = vsub.f32 1.0, %v1962_v41  ;;  %vm1986_vm2 = vcmp.eq.f32.partialorder %v1985_v4, 8.507059e+37 }
 0x3d2   : > { %4987 = vrcp.f32 %v6870_v12  ;;  %vm1996_vm4 = vweird.f32 %v6870_v12 }
 0x3d3   : > { %v1796_v15 = vadd.f32 0.0009, %v1784_v26  ;;  %v1955_v26 = vand.u32 2147483647, %v6786_v17 }
 0x3d5   : > { %v1930_v37 = vmul.f32 %v1929_v23, %v1796_v15  ;;  %v1958_v15 = vor.u32 1.1754944e-38, %v1957_v45  ;;  %vm1956_vm8 = vcmp.eq.f32.partialorder %v1955_v26, 8.507059e+37 }
 0x3d6   : > { %v1691_v29 = vpop.f32.mrf.mxu2  ;;  %v6854_v38 = vpop.f32.mrf.mxu3  ;;  %4560 = vmatmul.msk.f32.gmra.mxu1 %vm1027_vm0, %v6844_v33 }
 0x3d7   : > { %v2018_v21 = vsel %vm2006_vm9, %v1930_v37, 0.0  ;;  %v1773_v8 = vsub.f32 %v1691_v29, %v1737_v32  ;;  %v1964_v32 = vmul.f32 %v6850_v60, %v1963_v24  ;;  %v1959_v37 = vsel %vm1956_vm8, %v1958_v15, %v1954_v22 }
 0x3d8   : > { %v2019_v49 = vadd.f32 %v2018_v21, %v2017_v48  ;;  %v6874_v48 = vpop.eup %4985  ;;  %v1972_v29 = vand.u32 2147483648, %v6816_v18 }
 0x3d9   : > { %v1785_v28 = vmul.f32 2.0, %v1773_v8  ;;  %v1977_v63 = vmul.f32 %v6874_v48, %v6846_v19  ;;  %v1965_v56 = vadd.f32 %v6850_v60, %v1964_v32  ;;  %v4988_v44 = vpop.eup %4987  ;;  %vm1982_vm14 = vweird.f32 %v6874_v48 }
 0x3da   : > { %v1973_v41 = vor.u32 1.1754944e-38, %v1972_v29  ;;  %vm1983_vm1 = vmor %vm1981_vm15, %vm1982_vm14  ;;  %vm1997_vm3 = vweird.f32 %v4988_v44  ;;  %v2002_v32 = vand.u32 2147483648, %v6870_v12 }
 0x3db   : > { %v1797_v3 = vadd.f32 0.0009, %v1785_v28  ;;  %v1978_v50 = vsub.f32 1.0, %v1977_v63  ;;  %v1969_v1 = vsel %vm1968_vm12, %v6850_v60, %v1965_v56  ;;  %v1740_v28 = vmul.f32 %v6581_v58, %v6519_v5  ;;  %vm1998_vm5 = vmor %vm1996_vm4, %vm1997_vm3 }
 0x3dc   : > { %v1974_v47 = vsel %vm1971_vm13, %v1973_v41, %v1969_v1  ;;  %v1987_v60 = vand.u32 2147483648, %v6846_v19 }
 0x3dd   : > { %v1945_v52 = vmul.f32 %v1944_v0, %v1797_v3  ;;  %v1979_v9 = vmul.f32 %v6874_v48, %v1978_v50 }
 0x3de   : > { %v1694_v55 = vpop.f32.mrf.mxu2  ;;  %v6877_v2 = vpop.f32.mrf.mxu3 }
 0x3df   : > { %v2020_v53 = vsel %vm2006_vm9, %v1945_v52, 0.0  ;;  %v1774_v61 = vsub.f32 %v1694_v55, %v1738_v51  ;;  %v1980_v51 = vadd.f32 %v6874_v48, %v1979_v9 }
 0x3e0   : > { %v2021_v25 = vadd.f32 %v2020_v53, %v2019_v49  ;;  %v1992_v49 = vmul.f32 %v4988_v44, %v6870_v12  ;;  %v1988_v53 = vor.u32 1.1754944e-38, %v1987_v60 }
 0x3e1   : > { %v1786_v13 = vmul.f32 2.0, %v1774_v61  ;;  %v1984_v55 = vsel %vm1983_vm1, %v6874_v48, %v1980_v51  ;;  %v1741_v61 = vmul.f32 %v6599_v30, %v7667_v62  ;;  %v2000_v48 = vand.u32 2147483647, %v6870_v12 }
 0x3e2   : > { %v1993_v18 = vsub.f32 1.0, %v1992_v49 }
 0x3e3   : > { %v1798_v23 = vadd.f32 0.0009, %v1786_v13  ;;  %vm2001_vm6 = vcmp.eq.f32.partialorder %v2000_v48, 8.507059e+37 }
 0x3e4   : > { %v1994_v45 = vmul.f32 %v4988_v44, %v1993_v18 }
 0x3e5   : > { %v1960_v17 = vmul.f32 %v1959_v37, %v1798_v23  ;;  %v2003_v37 = vor.u32 1.1754944e-38, %v2002_v32 }
 0x3e6   : > { %v1697_v10 = vpop.f32.mrf.mxu2  ;;  %v2140_v39 = vpop.f32.mrf.mxu3  ;;  %v1995_v13 = vadd.f32 %v4988_v44, %v1994_v45  ;;  %v7017_v45 = vld [vmem:[#allocation6 + $0x10] sm:$0xff] }
 0x3e7   : > { %v2022_v57 = vsel %vm2006_vm9, %v1960_v17, 0.0  ;;  %v1775_v21 = vsub.f32 %v1697_v10, %v1739_v46  ;;  %v2248_v10 = vld [vmem:[#allocation7 + $0x28] sm:$0xff] }
 0x3e8   : > { %v2023_v43 = vadd.f32 %v2022_v57, %v2021_v25  ;;  %v1989_v25 = vsel %vm1986_vm2, %v1988_v53, %v1984_v55  ;;  %v1999_v23 = vsel %vm1998_vm5, %v4988_v44, %v1995_v13  ;;  %2368 = vmatpush.msrb.mxu1 %v2248_v10  ;;  %v2247_v44 = vld [vmem:[#allocation7 + $0x20] sm:$0xff] }
 0x3e9   : > { %v1787_v8 = vmul.f32 2.0, %v1775_v21  ;;  %v2004_v56 = vsel %vm2001_vm6, %v2003_v37, %v1999_v23 }
 0x3ea   : > { %2369 = vmatpush.msrb.mxu1 %v2247_v44 }
 0x3eb   : > { %v1799_v34 = vadd.f32 0.0009, %v1787_v8 }
 0x3ed   : > { %v1975_v54 = vmul.f32 %v1974_v47, %v1799_v34 }
 0x3ee   : > { %v1700_v3 = vpop.f32.mrf.mxu2  ;;  %v2143_v0 = vpop.f32.mrf.mxu3 }
 0x3ef   : > { %v1776_v52 = vsub.f32 %v1700_v3, %v1740_v28  ;;  %v2024_v5 = vsel %vm2006_vm9, %v1975_v54, 0.0 }
 0x3f0   : > { %v2025_v58 = vadd.f32 %v2024_v5, %v2023_v43  ;;  %v7003_v5 = vld [vmem:[#allocation6] sm:$0xff] }
 0x3f1   : > { %v1788_v24 = vmul.f32 2.0, %v1776_v52 }
 0x3f3   : > { %v1800_v26 = vadd.f32 0.0009, %v1788_v24  ;;  %v7010_v24 = vld [vmem:[#allocation6 + $0x8] sm:$0xff] }
 0x3f5   : > { %v1990_v63 = vmul.f32 %v1989_v25, %v1800_v26 }
 0x3f6   : > { %v1703_v22 = vpop.f32.mrf.mxu2  ;;  %v2146_v19 = vpop.f32.mrf.mxu3 }
 0x3f7   : > { %v1777_v15 = vsub.f32 %v1703_v22, %v1741_v61  ;;  %2206 = vmatpush.msra.mxu2 %v2146_v19  ;;  %v2026_v46 = vsel %vm2006_vm9, %v1990_v63, 0.0  ;;  %vm2267_vm9 = vcmask 392192   ;;  %v7024_v61 = vld [vmem:[#allocation6 + $0x18] sm:$0xff]  ;;  %v7031_v63 = vld [vmem:[#allocation6 + $0x20] sm:$0xff]  ;;  %v7038_v19 = vld [vmem:[#allocation6 + $0x28] sm:$0xf] }
 0x3f8   : > { %v2027_v30 = vadd.f32 %v2026_v46, %v2025_v58 }
 0x3f9   : > { %v1789_v62 = vmul.f32 2.0, %v1777_v15  ;;  %2207 = vmatpush.msra.mxu2 %v2143_v0 }
 0x3fb   : > { %v1801_v17 = vadd.f32 0.0009, %v1789_v62  ;;  %2208 = vmatpush.msra.mxu2 %v2140_v39  ;;  %v2246_v39 = vld [vmem:[#allocation7 + $0x18] sm:$0xff] }
 0x3fc   : > { %2370 = vmatpush.msrb.mxu1 %v2246_v39 }
 0x3fd   : > { %2209 = vmatpush.msra.mxu2 %v6877_v2  ;;  %v2005_v50 = vmul.f32 %v2004_v56, %v1801_v17  ;;  %v2245_v2 = vld [vmem:[#allocation7 + $0x10] sm:$0xff] }
 0x3fe   : > { %2371 = vmatpush.msrb.mxu1 %v2245_v2 }
 0x3ff   : > { %2210 = vmatpush.msra.mxu2 %v6854_v38  ;;  %v2029_v12 = vsel %vm2028_vm7, %v2005_v50, 0.0  ;;  %v2244_v38 = vld [vmem:[#allocation7 + $0x8] sm:$0xff] }
 0x400   : > { %v2030_v29 = vadd.f32 %v2029_v12, %v2027_v30  ;;  %2372 = vmatpush.msrb.mxu1 %v2244_v38 }
 0x401   : > { %2211 = vmatpush.msra.mxu2 %v6824_v35 }
 0x402   : > { %2031 = vadd.xlane.f32.xlu0 %v2030_v29 }
 0x403   : > { %2212 = vmatpush.msra.mxu2 %v6794_v11 }
 0x405   : > { %2213 = vmatpush.msra.mxu2 %v6764_v6  ;;  %v2243_v6 = vld [vmem:[#allocation7] sm:$0xff] }
 0x406   : > { %2373 = vmatpush.msrb.mxu1 %v2243_v6 }
 0x407   : > { %2214 = vmatpush.msra.mxu2 %v6734_v59 }
 0x409   : > { %2215 = vmatpush.msra.mxu2 %v6703_v14 }
 0x40b   : > { %2216 = vmatpush.msra.mxu2 %v6658_v7 }
 0x40d   : > { %2217 = vmatpush.msra.mxu2 %v6617_v36 }
 0x40e   : > { %4561 = vmatmul.msk.f32.vlgmr.msra.gmra.mxu2 %vm1027_vm0, %v6690_v16 }
 0x416   : > { %4562 = vmatmul.msk.f32.gmra.mxu2 %vm1027_vm0, %v6723_v31 }
 0x41e   : > { %4563 = vmatmul.msk.f32.gmra.mxu2 %vm1027_vm0, %v6754_v20 }
 0x426   : > { %4564 = vmatmul.msk.f32.gmra.mxu2 %vm1027_vm0, %v6784_v40 }
 0x42b   : > { %v6930_v7 = vpop.f32.mrf.mxu1 }
 0x42c   : > { %4567 = vmatmul.msk.f32.vlgmr.msrb.gmra.mxu1 %vm2267_vm9, %v6930_v7  ;;  %v2249_v34 = vmul.f32 %v6930_v7, %v6930_v7 }
 0x42e   : > { %4565 = vmatmul.msk.f32.gmra.mxu2 %vm1027_vm0, %v6814_v42 }
 0x433   : > { %v6936_v36 = vpop.f32.mrf.mxu1 }
 0x434   : > { %4568 = vmatmul.msk.f32.gmra.mxu1 %vm2267_vm9, %v6936_v36  ;;  %v2250_v54 = vmul.f32 %v6936_v36, %v6936_v36 }
 0x436   : > { %4566 = vmatmul.msk.f32.gmra.mxu2 %vm1027_vm0, %v6844_v33 }
 0x43b   : > { %v6942_v16 = vpop.f32.mrf.mxu1 }
 0x43c   : > { %4569 = vmatmul.msk.f32.gmra.mxu1 %vm2267_vm9, %v6942_v16  ;;  %v2251_v18 = vmul.f32 %v6942_v16, %v6942_v16 }
 0x443   : > { %v6946_v14 = vpop.f32.mrf.mxu1 }
 0x444   : > { %4570 = vmatmul.msk.f32.gmra.mxu1 %vm2267_vm9, %v6946_v14  ;;  %v2252_v60 = vmul.f32 %v6946_v14, %v6946_v14 }
 0x44b   : > { %v6950_v31 = vpop.f32.mrf.mxu1 }
 0x44c   : > { %4571 = vmatmul.msk.f32.gmra.mxu1 %vm2267_vm9, %v6950_v31  ;;  %v2253_v0 = vmul.f32 %v6950_v31, %v6950_v31 }
 0x453   : > { %v6954_v59 = vpop.f32.mrf.mxu1 }
 0x454   : > { %4572 = vmatmul.msk.f32.gmra.mxu1 %vm2267_vm9, %v6954_v59  ;;  %v2254_v52 = vmul.f32 %v6954_v59, %v6954_v59 }
 0x475   : > { %v2032_v20 = vpop.xlane.xlu0 %2031 }
 0x476   : > { %v2033_v40 = vrot.slane %v2032_v20, 4 }
 0x478   : > { %v2034_v11 = vadd.f32 %v2033_v40, %v2032_v20 }
 0x47a   : > { %v2035_v42 = vrot.slane %v2034_v11, 2 }
 0x47c   : > { %v2036_v35 = vadd.f32 %v2035_v42, %v2034_v11 }
 0x47e   : > { %v2037_v33 = vrot.slane %v2036_v35, 1 }
 0x480   : > { %v2038_v57 = vadd.f32 %v2037_v33, %v2036_v35  ;;  %v2840_v33 = vld [vmem:[#allocation22 + $0x28] sm:$0xff] }
 0x482   : > { %4747 = vpush %v2038_v57  ;;  %v2839_v57 = vld [vmem:[#allocation22 + $0x20] sm:$0xff] }
 0x491   : > { %v6958_v21 = vpop.f32.mrf.mxu2 }
 0x492   : > { %4573 = vmatmul.msk.f32.gmra.mxu1 %vm2267_vm9, %v6958_v21  ;;  %v2255_v4 = vmul.f32 %v6958_v21, %v6958_v21  ;;  %v2261_v15 = vmul.f32 %v6958_v21, %v6930_v7 }
 0x499   : > { %v6962_v27 = vpop.f32.mrf.mxu2 }
 0x49a   : > { %4574 = vmatmul.msk.f32.gmra.mxu1 %vm2267_vm9, %v6962_v27  ;;  %v2256_v58 = vmul.f32 %v6962_v27, %v6962_v27  ;;  %v2262_v46 = vmul.f32 %v6962_v27, %v6936_v36 }
 0x4a1   : > { %v6966_v43 = vpop.f32.mrf.mxu2 }
 0x4a2   : > { %4575 = vmatmul.msk.f32.gmra.mxu1 %vm2267_vm9, %v6966_v43  ;;  %v2257_v55 = vmul.f32 %v6966_v43, %v6966_v43  ;;  %v2263_v62 = vmul.f32 %v6966_v43, %v6942_v16 }
 0x4a9   : > { %v6970_v8 = vpop.f32.mrf.mxu2  ;;  %v2375_v1 = vpop.f32.mrf.mxu1 }
 0x4aa   : > { %4576 = vmatmul.msk.f32.gmra.mxu1 %vm2267_vm9, %v6970_v8  ;;  %v2258_v53 = vmul.f32 %v6970_v8, %v6970_v8  ;;  %v2264_v37 = vmul.f32 %v6970_v8, %v6946_v14 }
 0x4b1   : > { %v6974_v9 = vpop.f32.mrf.mxu2  ;;  %v2378_v49 = vpop.f32.mrf.mxu1 }
 0x4b2   : > { %4577 = vmatmul.msk.f32.gmra.mxu1 %vm2267_vm9, %v6974_v9  ;;  %v2259_v25 = vmul.f32 %v6974_v9, %v6974_v9  ;;  %v2265_v56 = vmul.f32 %v6974_v9, %v6950_v31 }
 0x4b3   : > { %s4748_s1 = spop %4747 }
 0x4b4   : > { %s2040_s7 = smul.f32 0.00011814745, %s4748_s1 }
 0x4b6   : > { %s2041_s4 = smax.f32 %s5643_s9, %s2040_s7 }
 0x4b9   : > { %v6978_v41 = vpop.f32.mrf.mxu2  ;;  %v2381_v28 = vpop.f32.mrf.mxu1 }
 0x4ba   : > { %4578 = vmatmul.msk.f32.gmra.mxu1 %vm2267_vm9, %v6978_v41  ;;  %v2260_v22 = vmul.f32 %v6978_v41, %v6978_v41  ;;  %v2266_v10 = vmul.f32 %v6978_v41, %v6954_v59 }
 0x4c1   : > { %v2384_v47 = vpop.f32.mrf.mxu1 }
 0x4c2   : > { %4579 = vmatmul.msk.f32.gmra.mxu1 %vm2267_vm9, %v2249_v34 }
 0x4c9   : > { %v2387_v51 = vpop.f32.mrf.mxu1 }
 0x4ca   : > { %4580 = vmatmul.msk.f32.gmra.mxu1 %vm2267_vm9, %v2250_v54  ;;  %v2835_v54 = vld [vmem:[#allocation22] sm:$0xff] }
 0x4d1   : > { %v2390_v3 = vpop.f32.mrf.mxu1 }
 0x4d2   : > { %4581 = vmatmul.msk.f32.gmra.mxu1 %vm2267_vm9, %v2251_v18  ;;  %2493 = vmatpush.msrb.mxu2 %v2390_v3 }
 0x4d4   : > { %2494 = vmatpush.msrb.mxu2 %v2387_v51 }
 0x4d6   : > { %2495 = vmatpush.msrb.mxu2 %v2384_v47  ;;  %v2836_v47 = vld [vmem:[#allocation22 + $0x8] sm:$0xff] }
 0x4d8   : > { %2496 = vmatpush.msrb.mxu2 %v2381_v28 }
 0x4da   : > { %4582 = vmatmul.msk.f32.gmra.mxu1 %vm2267_vm9, %v2252_v60  ;;  %2497 = vmatpush.msrb.mxu2 %v2378_v49  ;;  %v2837_v49 = vld [vmem:[#allocation22 + $0x10] sm:$0xff] }
 0x4dc   : > { %2498 = vmatpush.msrb.mxu2 %v2375_v1  ;;  %v2838_v1 = vld [vmem:[#allocation22 + $0x18] sm:$0xff] }
 0x4dd   : > { %4597 = vmatmul.msk.f32.vlgmr.msrb.gmra.mxu2 %vm2267_vm9, %v7003_v5 }
 0x4e2   : > { %4583 = vmatmul.msk.f32.gmra.mxu1 %vm2267_vm9, %v2253_v0 }
 0x4e5   : > { %4598 = vmatmul.msk.f32.gmra.mxu2 %vm2267_vm9, %v7010_v24 }
 0x4ea   : > { %4584 = vmatmul.msk.f32.gmra.mxu1 %vm2267_vm9, %v2254_v52 }
 0x4ed   : > { %4599 = vmatmul.msk.f32.gmra.mxu2 %vm2267_vm9, %v7017_v45 }
 0x4f2   : > { %4585 = vmatmul.msk.f32.gmra.mxu1 %vm2267_vm9, %v2255_v4 }
 0x4f5   : > { %4600 = vmatmul.msk.f32.gmra.mxu2 %vm2267_vm9, %v7024_v61 }
 0x4fa   : > { %4586 = vmatmul.msk.f32.gmra.mxu1 %vm2267_vm9, %v2256_v58 }
 0x4fd   : > { %4601 = vmatmul.msk.f32.gmra.mxu2 %vm2267_vm9, %v7031_v63 }
 0x502   : > { %4587 = vmatmul.msk.f32.gmra.mxu1 %vm2267_vm9, %v2257_v55 }
 0x505   : > { %4602 = vmatmul.msk.f32.gmra.mxu2 %vm2267_vm9, %v7038_v19 }
 0x50a   : > { %4588 = vmatmul.msk.f32.gmra.mxu1 %vm2267_vm9, %v2258_v53 }
 0x50f   : > { %v2393_v26 = vpop.f32.mrf.mxu1 }
 0x512   : > { %4589 = vmatmul.msk.f32.gmra.mxu1 %vm2267_vm9, %v2259_v25 }
 0x517   : > { %v2396_v13 = vpop.f32.mrf.mxu1 }
 0x51a   : > { %4590 = vmatmul.msk.f32.gmra.mxu1 %vm2267_vm9, %v2260_v22 }
 0x51f   : > { %v2399_v32 = vpop.f32.mrf.mxu1 }
 0x522   : > { %4591 = vmatmul.msk.f32.gmra.mxu1 %vm2267_vm9, %v2261_v15 }
 0x527   : > { %v2402_v48 = vpop.f32.mrf.mxu1 }
 0x52a   : > { %4592 = vmatmul.msk.f32.gmra.mxu1 %vm2267_vm9, %v2262_v46 }
 0x52f   : > { %v2405_v30 = vpop.f32.mrf.mxu1 }
 0x532   : > { %4593 = vmatmul.msk.f32.gmra.mxu1 %vm2267_vm9, %v2263_v62 }
 0x537   : > { %v2408_v23 = vpop.f32.mrf.mxu1 }
 0x538   : > { %2528 = vmatpush.msra.mxu2 %v2408_v23 }
 0x53a   : > { %4594 = vmatmul.msk.f32.gmra.mxu1 %vm2267_vm9, %v2264_v37  ;;  %2529 = vmatpush.msra.mxu2 %v2405_v30 }
 0x53c   : > { %2530 = vmatpush.msra.mxu2 %v2402_v48 }
 0x53e   : > { %2531 = vmatpush.msra.mxu2 %v2399_v32 }
 0x53f   : > { %v2411_v17 = vpop.f32.mrf.mxu1 }
 0x540   : > { %2532 = vmatpush.msra.mxu2 %v2396_v13 }
 0x542   : > { %4595 = vmatmul.msk.f32.gmra.mxu1 %vm2267_vm9, %v2265_v56  ;;  %2533 = vmatpush.msra.mxu2 %v2393_v26 }
 0x543   : > { %4603 = vmatmul.msk.f32.vlgmr.msra.gmra.mxu2 %vm2267_vm9, %v7003_v5 }
 0x547   : > { %v2414_v50 = vpop.f32.mrf.mxu1 }
 0x54a   : > { %4596 = vmatmul.msk.f32.gmra.mxu1 %vm2267_vm9, %v2266_v10 }
 0x54b   : > { %4604 = vmatmul.msk.f32.gmra.mxu2 %vm2267_vm9, %v7010_v24 }
 0x54f   : > { %v2417_v12 = vpop.f32.mrf.mxu1 }
 0x553   : > { %4605 = vmatmul.msk.f32.gmra.mxu2 %vm2267_vm9, %v7017_v45 }
 0x557   : > { %v2420_v29 = vpop.f32.mrf.mxu1 }
 0x55b   : > { %4606 = vmatmul.msk.f32.gmra.mxu2 %vm2267_vm9, %v7024_v61 }
 0x55f   : > { %v2423_v44 = vpop.f32.mrf.mxu1 }
 0x560   : > { %v7088_v34 = vpop.f32.mrf.mxu2 }
 0x563   : > { %4607 = vmatmul.msk.f32.gmra.mxu2 %vm2267_vm9, %v7031_v63 }
 0x567   : > { %v2426_v39 = vpop.f32.mrf.mxu1 }
 0x568   : > { %2563 = vmatpush.msra.mxu3 %v2426_v39  ;;  %v7092_v18 = vpop.f32.mrf.mxu2 }
 0x56a   : > { %2564 = vmatpush.msra.mxu3 %v2423_v44 }
 0x56b   : > { %4608 = vmatmul.msk.f32.gmra.mxu2 %vm2267_vm9, %v7038_v19 }
 0x56c   : > { %2565 = vmatpush.msra.mxu3 %v2420_v29 }
 0x56e   : > { %2566 = vmatpush.msra.mxu3 %v2417_v12 }
 0x56f   : > { %v2429_v2 = vpop.f32.mrf.mxu1 }
 0x570   : > { %2567 = vmatpush.msra.mxu3 %v2414_v50  ;;  %v7098_v60 = vpop.f32.mrf.mxu2 }
 0x571   : > { %v2660_v30 = vmul.f32 %v7098_v60, %v7098_v60 }
 0x572   : > { %2568 = vmatpush.msra.mxu3 %v2411_v17 }
 0x573   : > { %4609 = vmatmul.msk.f32.vlgmr.msra.gmra.mxu3 %vm2267_vm9, %v7003_v5 }
 0x577   : > { %v2432_v38 = vpop.f32.mrf.mxu1 }
 0x578   : > { %v7102_v52 = vpop.f32.mrf.mxu2 }
 0x579   : > { %v2661_v17 = vmul.f32 %v7102_v52, %v7102_v52 }
 0x57b   : > { %4610 = vmatmul.msk.f32.gmra.mxu3 %vm2267_vm9, %v7010_v24 }
 0x57f   : > { %v2435_v6 = vpop.f32.mrf.mxu1 }
 0x580   : > { %v7108_v4 = vpop.f32.mrf.mxu2 }
 0x583   : > { %4611 = vmatmul.msk.f32.gmra.mxu3 %vm2267_vm9, %v7017_v45 }
 0x587   : > { %v2438_v20 = vpop.f32.mrf.mxu1 }
 0x588   : > { %v7114_v58 = vpop.f32.mrf.mxu2 }
 0x58b   : > { %4612 = vmatmul.msk.f32.gmra.mxu3 %vm2267_vm9, %v7024_v61 }
 0x58f   : > { %v2441_v40 = vpop.f32.mrf.mxu1 }
 0x593   : > { %4613 = vmatmul.msk.f32.gmra.mxu3 %vm2267_vm9, %v7031_v63 }
 0x597   : > { %v2444_v11 = vpop.f32.mrf.mxu1 }
 0x598   : > { %2598 = vmatpush.msrb.mxu2 %v2444_v11 }
 0x59a   : > { %2599 = vmatpush.msrb.mxu2 %v2441_v40 }
 0x59b   : > { %4614 = vmatmul.msk.f32.gmra.mxu3 %vm2267_vm9, %v7038_v19 }
 0x59c   : > { %2600 = vmatpush.msrb.mxu2 %v2438_v20 }
 0x59e   : > { %2601 = vmatpush.msrb.mxu2 %v2435_v6 }
 0x59f   : > { %v2447_v42 = vpop.f32.mrf.mxu1 }
 0x5a0   : > { %2602 = vmatpush.msrb.mxu2 %v2432_v38 }
 0x5a2   : > { %2603 = vmatpush.msrb.mxu2 %v2429_v2  ;;  %v2662_v2 = vmul.f32 %v7108_v4, %v7108_v4 }
 0x5a3   : > { %4615 = vmatmul.msk.f32.vlgmr.msrb.gmra.mxu2 %vm2267_vm9, %v7003_v5 }
 0x5a4   : > { %2851 = vmatpush.msra.mxu2 %v2840_v33 }
 0x5a6   : > { %2852 = vmatpush.msra.mxu2 %v2839_v57 }
 0x5a7   : > { %v2450_v35 = vpop.f32.mrf.mxu1 }
 0x5a8   : > { %2853 = vmatpush.msra.mxu2 %v2838_v1  ;;  %v2663_v1 = vmul.f32 %v7114_v58, %v7114_v58 }
 0x5aa   : > { %2854 = vmatpush.msra.mxu2 %v2837_v49 }
 0x5ab   : > { %4616 = vmatmul.msk.f32.gmra.mxu2 %vm2267_vm9, %v7010_v24 }
 0x5ac   : > { %2855 = vmatpush.msra.mxu2 %v2836_v47 }
 0x5ae   : > { %2856 = vmatpush.msra.mxu2 %v2835_v54 }
 0x5af   : > { %v2453_v28 = vpop.f32.mrf.mxu1 }
 0x5b3   : > { %4617 = vmatmul.msk.f32.gmra.mxu2 %vm2267_vm9, %v7017_v45 }
 0x5b7   : > { %v2456_v51 = vpop.f32.mrf.mxu1 }
 0x5bb   : > { %4618 = vmatmul.msk.f32.gmra.mxu2 %vm2267_vm9, %v7024_v61 }
 0x5bf   : > { %v2459_v3 = vpop.f32.mrf.mxu1 }
 0x5c3   : > { %4619 = vmatmul.msk.f32.gmra.mxu2 %vm2267_vm9, %v7031_v63 }
 0x5c7   : > { %v2462_v0 = vpop.f32.mrf.mxu1 }
 0x5c8   : > { %2633 = vmatpush.msrb.mxu3 %v2462_v0 }
 0x5ca   : > { %2634 = vmatpush.msrb.mxu3 %v2459_v3 }
 0x5cb   : > { %4620 = vmatmul.msk.f32.gmra.mxu2 %vm2267_vm9, %v7038_v19 }
 0x5cc   : > { %2635 = vmatpush.msrb.mxu3 %v2456_v51 }
 0x5ce   : > { %2636 = vmatpush.msrb.mxu3 %v2453_v28 }
 0x5d0   : > { %2637 = vmatpush.msrb.mxu3 %v2450_v35 }
 0x5d2   : > { %2638 = vmatpush.msrb.mxu3 %v2447_v42 }
 0x5d3   : > { %4621 = vmatmul.msk.f32.vlgmr.msrb.gmra.mxu3 %vm2267_vm9, %v7003_v5  ;;  %4627 = vmatmul.msk.f32.vlgmr.msra.gmra.mxu2 %vm2267_vm9, %v6930_v7  ;;  %v7124_v7 = vpop.f32.mrf.mxu2 }
 0x5d4   : > { %v2664_v25 = vmul.f32 %v7124_v7, %v7124_v7 }
 0x5db   : > { %4622 = vmatmul.msk.f32.gmra.mxu3 %vm2267_vm9, %v7010_v24  ;;  %4628 = vmatmul.msk.f32.gmra.mxu2 %vm2267_vm9, %v6936_v36  ;;  %v7130_v36 = vpop.f32.mrf.mxu2 }
 0x5e3   : > { %4623 = vmatmul.msk.f32.gmra.mxu3 %vm2267_vm9, %v7017_v45  ;;  %4629 = vmatmul.msk.f32.gmra.mxu2 %vm2267_vm9, %v6942_v16  ;;  %v7136_v16 = vpop.f32.mrf.mxu2 }
 0x5e4   : > { %v2666_v15 = vmul.f32 %v7136_v16, %v7136_v16 }
 0x5eb   : > { %4624 = vmatmul.msk.f32.gmra.mxu3 %vm2267_vm9, %v7024_v61  ;;  %4630 = vmatmul.msk.f32.gmra.mxu2 %vm2267_vm9, %v6946_v14  ;;  %v7140_v14 = vpop.f32.mrf.mxu2 }
 0x5ec   : > { %v2667_v62 = vmul.f32 %v7140_v14, %v7140_v14 }
 0x5f3   : > { %4625 = vmatmul.msk.f32.gmra.mxu3 %vm2267_vm9, %v7031_v63  ;;  %4631 = vmatmul.msk.f32.gmra.mxu2 %vm2267_vm9, %v6950_v31  ;;  %v7146_v31 = vpop.f32.mrf.mxu2 }
 0x5f4   : > { %v2668_v10 = vmul.f32 %v7146_v31, %v7146_v31 }
 0x5f6   : > { %v2570_v5 = vpop.f32.mrf.mxu3 }
 0x5fb   : > { %4626 = vmatmul.msk.f32.gmra.mxu3 %vm2267_vm9, %v7038_v19  ;;  %4632 = vmatmul.msk.f32.gmra.mxu2 %vm2267_vm9, %v6954_v59  ;;  %v7150_v59 = vpop.f32.mrf.mxu2 }
 0x5fc   : > { %v2669_v35 = vmul.f32 %v7150_v59, %v7150_v59 }
 0x603   : > { %4633 = vmatmul.msk.f32.gmra.mxu2 %vm2267_vm9, %v6958_v21  ;;  %v2573_v21 = vpop.f32.mrf.mxu3 }
 0x60b   : > { %4634 = vmatmul.msk.f32.gmra.mxu2 %vm2267_vm9, %v6962_v27  ;;  %v2576_v55 = vpop.f32.mrf.mxu3 }
 0x60c   : > { %v2678_v56 = vsub.f32 %v2576_v55, %v2660_v30 }
 0x613   : > { %4635 = vmatmul.msk.f32.gmra.mxu2 %vm2267_vm9, %v6966_v43  ;;  %v2579_v43 = vpop.f32.mrf.mxu3 }
 0x614   : > { %v2679_v29 = vsub.f32 %v2579_v43, %v2661_v17 }
 0x61b   : > { %4636 = vmatmul.msk.f32.gmra.mxu2 %vm2267_vm9, %v6970_v8  ;;  %v2582_v61 = vpop.f32.mrf.mxu3  ;;  %v2665_v8 = vmul.f32 %v7130_v36, %v7130_v36 }
 0x61c   : > { %v2680_v11 = vsub.f32 %v2582_v61, %v2662_v2 }
 0x623   : > { %4637 = vmatmul.msk.f32.gmra.mxu2 %vm2267_vm9, %v6974_v9  ;;  %v2659_v9 = vmul.f32 %v7092_v18, %v7092_v18  ;;  %v2585_v19 = vpop.f32.mrf.mxu3 }
 0x624   : > { %v2681_v47 = vsub.f32 %v2585_v19, %v2663_v1  ;;  %v2672_v19 = vmul.f32 %v7136_v16, %v7098_v60 }
 0x625   : > { %v2677_v22 = vsub.f32 %v2573_v21, %v2659_v9 }
 0x626   : > { %v2605_v24 = vpop.f32.mrf.mxu2 }
 0x627   : > { %v2682_v13 = vsub.f32 %v2605_v24, %v2664_v25 }
 0x62b   : > { %4638 = vmatmul.msk.f32.gmra.mxu2 %vm2267_vm9, %v6978_v41  ;;  %v2658_v41 = vmul.f32 %v7088_v34, %v7088_v34 }
 0x62d   : > { %v2676_v48 = vsub.f32 %v2570_v5, %v2658_v41  ;;  %v2671_v41 = vmul.f32 %v7130_v36, %v7092_v18 }
 0x62e   : > { %v2608_v27 = vpop.f32.mrf.mxu2 }
 0x62f   : > { %v2683_v63 = vsub.f32 %v2608_v27, %v2665_v8  ;;  %v2706_v23 = vadd.f32 %v2682_v13, %v2676_v48 }
 0x631   : > { %v2707_v46 = vadd.f32 %v2683_v63, %v2677_v22  ;;  %v7176_v44 = vadd.f32 0.0009, %v2706_v23  ;;  %v2670_v63 = vmul.f32 %v7124_v7, %v7088_v34  ;;  %v7241_v34 = vmul.f32 %v7150_v59, %v7114_v58 }
 0x633   : > { %v7174_v12 = vadd.f32 0.0009, %v2707_v46  ;;  %v2729_v13 = vand.u32 2147483648, %v7176_v44  ;;  %v7237_v46 = vmul.f32 %v7146_v31, %v7108_v4  ;;  %vm2723_vm0 = vweird.f32 %v7176_v44 }
 0x634   : > { %v2727_v60 = vand.u32 2147483647, %v7176_v44 }
 0x635   : > { %4989 = vrcp.f32 %v7174_v12  ;;  %v2744_v7 = vand.u32 2147483648, %v7174_v12  ;;  %v7249_v16 = vor.u32 1.1754944e-38, %v2729_v13  ;;  %vm2738_vm11 = vweird.f32 %v7174_v12 }
 0x636   : > { %v2611_v45 = vpop.f32.mrf.mxu2  ;;  %4991 = vrcp.f32 %v7176_v44  ;;  %vm7279_vm15 = vcmp.eq.f32.partialorder %v2727_v60, 8.507059e+37 }
 0x637   : > { %v2684_v37 = vsub.f32 %v2611_v45, %v2666_v15 }
 0x639   : > { %v2708_v39 = vadd.f32 %v2684_v37, %v2678_v56 }
 0x63b   : > { %v7186_v42 = vadd.f32 0.0009, %v2708_v39  ;;  %v7195_v28 = vpop.eup %4989 }
 0x63c   : > { %v7201_v0 = vpop.eup %4991  ;;  %v2734_v21 = vmul.f32 %v7195_v28, %v7174_v12  ;;  %vm2739_vm8 = vweird.f32 %v7195_v28 }
 0x63d   : > { %4993 = vrcp.f32 %v7186_v42  ;;  %v2719_v24 = vmul.f32 %v7201_v0, %v7176_v44  ;;  %vm2724_vm10 = vweird.f32 %v7201_v0  ;;  %v2757_v17 = vand.u32 2147483647, %v7186_v42  ;;  %vm7263_vm12 = vmor %vm2738_vm11, %vm2739_vm8 }
 0x63e   : > { %v2614_v53 = vpop.f32.mrf.mxu2  ;;  %v2735_v43 = vsub.f32 1.0, %v2734_v21  ;;  %vm7275_vm14 = vmor %vm2723_vm0, %vm2724_vm10  ;;  %vm2753_vm1 = vweird.f32 %v7186_v42 }
 0x63f   : > { %v2685_v50 = vsub.f32 %v2614_v53, %v2667_v62  ;;  %v2720_v61 = vsub.f32 1.0, %v2719_v24  ;;  %vm7294_vm3 = vcmp.eq.f32.partialorder %v2757_v17, 8.507059e+37 }
 0x640   : > { %v2736_v22 = vmul.f32 %v7195_v28, %v2735_v43 }
 0x641   : > { %v2709_v40 = vadd.f32 %v2685_v50, %v2679_v29  ;;  %v2721_v15 = vmul.f32 %v7201_v0, %v2720_v61  ;;  %v2759_v29 = vand.u32 2147483648, %v7186_v42 }
 0x643   : > { %v7190_v57 = vadd.f32 0.0009, %v2709_v40  ;;  %v7209_v27 = vpop.eup %4993  ;;  %v2722_v31 = vadd.f32 %v7201_v0, %v2721_v15 }
 0x644   : > { %v2749_v53 = vmul.f32 %v7209_v27, %v7186_v42  ;;  %vm2754_vm2 = vweird.f32 %v7209_v27 }
 0x645   : > { %4995 = vrcp.f32 %v7190_v57  ;;  %v2726_v44 = vsel %vm7275_vm14, %v7201_v0, %v2722_v31  ;;  %vm7303_vm5 = vmor %vm2753_vm1, %vm2754_vm2  ;;  %vm2768_vm6 = vweird.f32 %v7190_v57  ;;  %v2772_v61 = vand.u32 2147483647, %v7190_v57 }
 0x646   : > { %v2617_v26 = vpop.f32.mrf.mxu2  ;;  %v2750_v48 = vsub.f32 1.0, %v2749_v53 }
 0x647   : > { %v2686_v38 = vsub.f32 %v2617_v26, %v2668_v10  ;;  %vm2773_vm10 = vcmp.eq.f32.partialorder %v2772_v61, 8.507059e+37 }
 0x648   : > { %v2751_v59 = vmul.f32 %v7209_v27, %v2750_v48 }
 0x649   : > { %v2710_v33 = vadd.f32 %v2686_v38, %v2680_v11 }
 0x64b   : > { %v7197_v54 = vadd.f32 0.0009, %v2710_v33  ;;  %v7213_v45 = vpop.eup %4995  ;;  %v2752_v33 = vadd.f32 %v7209_v27, %v2751_v59 }
 0x64c   : > { %v2764_v9 = vmul.f32 %v7213_v45, %v7190_v57  ;;  %vm2769_vm4 = vweird.f32 %v7213_v45 }
 0x64d   : > { %4997 = vrcp.f32 %v7197_v54  ;;  %v2756_v53 = vsel %vm7303_vm5, %v7209_v27, %v2752_v33  ;;  %vm7314_vm0 = vmor %vm2768_vm6, %vm2769_vm4  ;;  %vm2783_vm8 = vweird.f32 %v7197_v54  ;;  %v2789_v15 = vand.u32 2147483648, %v7197_v54 }
 0x64e   : > { %v2620_v32 = vpop.f32.mrf.mxu2  ;;  %v2765_v36 = vsub.f32 1.0, %v2764_v9  ;;  %vm2970_vm4 = vcmask 195584  }
 0x64f   : > { %v2687_v49 = vsub.f32 %v2620_v32, %v2669_v35  ;;  %v2673_v32 = vmul.f32 %v7140_v14, %v7102_v52  ;;  %v2742_v52 = vand.u32 2147483647, %v7174_v12  ;;  %v2737_v14 = vadd.f32 %v7195_v28, %v2736_v22 }
 0x650   : > { %v2745_v12 = vor.u32 1.1754944e-38, %v2744_v7  ;;  %v2766_v39 = vmul.f32 %v7213_v45, %v2765_v36  ;;  %v2790_v59 = vor.u32 1.1754944e-38, %v2789_v15 }
 0x651   : > { %v2711_v5 = vadd.f32 %v2687_v49, %v2681_v47  ;;  %vm7267_vm13 = vcmp.eq.f32.partialorder %v2742_v52, 8.507059e+37  ;;  %v2741_v40 = vsel %vm7263_vm12, %v7195_v28, %v2737_v14  ;;  %vm2808_vm12 = vcmask 359424  }
 0x652   : > { %v2767_v0 = vadd.f32 %v7213_v45, %v2766_v39 }
 0x653   : > { %v7211_v55 = vadd.f32 0.0009, %v2711_v5  ;;  %v7219_v25 = vpop.eup %4997  ;;  %v2760_v5 = vor.u32 1.1754944e-38, %v2759_v29 }
 0x654   : > { %v2779_v18 = vmul.f32 %v7219_v25, %v7197_v54  ;;  %vm2784_vm7 = vweird.f32 %v7219_v25  ;;  %v2771_v27 = vsel %vm7314_vm0, %v7213_v45, %v2767_v0 }
 0x655   : > { %4999 = vrcp.f32 %v7211_v55  ;;  %v2761_v7 = vsel %vm7294_vm3, %v2760_v5, %v2756_v53  ;;  %vm2785_vm11 = vmor %vm2783_vm8, %vm2784_vm7  ;;  %v2802_v50 = vand.u32 2147483647, %v7211_v55  ;;  %vm2818_vm3 = vcmask 355328   ;;  %v2833_v5 = vld [vmem:[#allocation21 + $0x8] sm:$0xff] }
 0x656   : > { %v7180_v6 = vpop.f32.mrf.mxu3  ;;  %v7182_v20 = vpop.f32.mrf.mxu2  ;;  %v2780_v56 = vsub.f32 1.0, %v2779_v18 }
 0x657   : > { %v2688_v23 = vsub.f32 %v7180_v6, %v2670_v63  ;;  %vm2803_vm2 = vcmp.eq.f32.partialorder %v2802_v50, 8.507059e+37 }
 0x658   : > { %v2781_v28 = vmul.f32 %v7219_v25, %v2780_v56 }
 0x659   : > { %v2694_v1 = vmul.f32 2.0, %v2688_v23 }
 0x65b   : > { %v7253_v58 = vpop.eup %4999 }
 0x65c   : > { %v2794_v35 = vmul.f32 %v7253_v58, %v7211_v55  ;;  %vm2799_vm14 = vweird.f32 %v7253_v58 }
 0x65e   : > { %v2643_v51 = vpop.f32.mrf.mxu3  ;;  %v7199_v3 = vpop.f32.mrf.mxu2  ;;  %v2795_v43 = vsub.f32 1.0, %v2794_v35 }
 0x65f   : > { %v2689_v4 = vsub.f32 %v2643_v51, %v2671_v41  ;;  %v2746_v51 = vsel %vm7267_vm13, %v2745_v12, %v2741_v40  ;;  %v2700_v41 = vadd.f32 0.0009, %v2694_v1 }
 0x660   : > { %v2796_v52 = vmul.f32 %v7253_v58, %v2795_v43  ;;  %v2958_v43 = vld [vmem:[#allocation10] sm:$0xff] }
 0x661   : > { %v2695_v6 = vmul.f32 2.0, %v2689_v4 }
 0x662   : > { %v2797_v23 = vadd.f32 %v7253_v58, %v2796_v52 }
 0x663   : > { %v2701_v21 = vadd.f32 0.0009, %v2695_v6 }
 0x665   : > { %v2747_v48 = vmul.f32 %v2746_v51, %v2701_v21  ;;  %v2834_v21 = vld [vmem:[#allocation21 + $0x10] sm:$0xff] }
 0x666   : > { %v2646_v26 = vpop.f32.mrf.mxu3  ;;  %v7217_v8 = vpop.f32.mrf.mxu2 }
 0x667   : > { %v2690_v37 = vsub.f32 %v2646_v26, %v2672_v19  ;;  %v2774_v26 = vand.u32 2147483648, %v7190_v57  ;;  %v2787_v57 = vand.u32 2147483647, %v7197_v54 }
 0x669   : > { %v2696_v49 = vmul.f32 2.0, %v2690_v37  ;;  %v2775_v45 = vor.u32 1.1754944e-38, %v2774_v26  ;;  %vm2788_vm13 = vcmp.eq.f32.partialorder %v2787_v57, 8.507059e+37 }
 0x66b   : > { %v2702_v13 = vadd.f32 0.0009, %v2696_v49  ;;  %v2776_v31 = vsel %vm2773_vm10, %v2775_v45, %v2771_v27 }
 0x66d   : > { %v2762_v4 = vmul.f32 %v2761_v7, %v2702_v13 }
 0x66e   : > { %v2649_v30 = vpop.f32.mrf.mxu3  ;;  %v7259_v62 = vpop.f32.mrf.mxu2 }
 0x66f   : > { %v2691_v11 = vsub.f32 %v2649_v30, %v2673_v32  ;;  %v2782_v32 = vadd.f32 %v7219_v25, %v2781_v28  ;;  %v2810_v30 = vsel %vm2808_vm12, %v2747_v48, 0.0  ;;  %v2812_v12 = vsel %vm2808_vm12, %v2762_v4, 0.0 }
 0x671   : > { %v2697_v24 = vmul.f32 2.0, %v2691_v11  ;;  %v2786_v14 = vsel %vm2785_vm11, %v7219_v25, %v2782_v32  ;;  %v2804_v25 = vand.u32 2147483648, %v7211_v55 }
 0x672   : > { %v2791_v37 = vsel %vm2788_vm13, %v2790_v59, %v2786_v14 }
 0x673   : > { %v2703_v18 = vadd.f32 0.0009, %v2697_v24  ;;  %v2805_v11 = vor.u32 1.1754944e-38, %v2804_v25 }
 0x676   : > { %v2652_v9 = vpop.f32.mrf.mxu3  ;;  %v2870_v63 = vpop.f32.mrf.mxu2 }
 0x677   : > { %v2692_v19 = vsub.f32 %v2652_v9, %v7237_v46  ;;  %v2731_v46 = vsel %vm7279_vm15, %v7249_v16, %v2726_v44  ;;  %v2777_v16 = vmul.f32 %v2776_v31, %v2703_v18  ;;  %vm2798_vm15 = vweird.f32 %v7211_v55 }
 0x678   : > { %v2732_v36 = vmul.f32 %v2731_v46, %v2700_v41  ;;  %vm2800_vm1 = vmor %vm2798_vm15, %vm2799_vm14 }
 0x679   : > { %v2698_v60 = vmul.f32 2.0, %v2692_v19  ;;  %v2801_v6 = vsel %vm2800_vm1, %v7253_v58, %v2797_v23  ;;  %v2814_v40 = vsel %vm2808_vm12, %v2777_v16, 0.0  ;;  %v2832_v58 = vld [vmem:[#allocation21] sm:$0xff]  ;;  %vm3292_vm1 = vcmask 162816  }
 0x67a   : > { %v2809_v10 = vsel %vm2808_vm12, %v2732_v36, 0.0  ;;  %v2806_v33 = vsel %vm2803_vm2, %v2805_v11, %v2801_v6  ;;  %v2955_v16 = vld [vmem:[#allocation9] sm:$0xff] }
 0x67b   : > { %v2704_v54 = vadd.f32 0.0009, %v2698_v60  ;;  %v2811_v2 = vadd.f32 %v2810_v30, %v2809_v10  ;;  %v3314_v10 = vld [vmem:[#allocation25 + $0x10] sm:$0xff] }
 0x67d   : > { %v2792_v29 = vmul.f32 %v2791_v37, %v2704_v54  ;;  %v2813_v35 = vadd.f32 %v2812_v12, %v2811_v2  ;;  %v2956_v37 = vld [vmem:[#allocation9 + $0x8] sm:$0xff] }
 0x67e   : > { %v2655_v17 = vpop.f32.mrf.mxu3  ;;  %v2873_v56 = vpop.f32.mrf.mxu2  ;;  %v3313_v12 = vld [vmem:[#allocation25 + $0x8] sm:$0xff] }
 0x67f   : > { %v2693_v39 = vsub.f32 %v2655_v17, %v7241_v34  ;;  %2913 = vmatpush.msra.mxu3 %v2873_v56  ;;  %v2816_v55 = vsel %vm2808_vm12, %v2792_v29, 0.0  ;;  %v2815_v1 = vadd.f32 %v2814_v40, %v2813_v35  ;;  %v2957_v56 = vld [vmem:[#allocation9 + $0x10] sm:$0xf] }
 0x681   : > { %v2699_v38 = vmul.f32 2.0, %v2693_v39  ;;  %2914 = vmatpush.msra.mxu3 %v2870_v63  ;;  %v2817_v47 = vadd.f32 %v2816_v55, %v2815_v1  ;;  %v3312_v39 = vld [vmem:[#allocation25] sm:$0xff] }
 0x683   : > { %v2705_v44 = vadd.f32 0.0009, %v2699_v38  ;;  %2915 = vmatpush.msra.mxu3 %v7259_v62 }
 0x685   : > { %2916 = vmatpush.msra.mxu3 %v7217_v8  ;;  %v2807_v34 = vmul.f32 %v2806_v33, %v2705_v44 }
 0x686   : > { %v2876_v49 = vpop.f32.mrf.mxu2 }
 0x687   : > { %2917 = vmatpush.msra.mxu3 %v7199_v3  ;;  %v2819_v28 = vsel %vm2818_vm3, %v2807_v34, 0.0  ;;  %v2959_v3 = vld [vmem:[#allocation10 + $0x8] sm:$0xff]  ;;  %vm3296_vm3 = vcmask 158720  }
 0x688   : > { %v2820_v51 = vadd.f32 %v2819_v28, %v2817_v47 }
 0x689   : > { %2918 = vmatpush.msra.mxu3 %v7182_v20  ;;  %v2960_v20 = vld [vmem:[#allocation10 + $0x10] sm:$0xff] }
 0x68a   : > { %4639 = vmatmul.msk.f32.vlgmr.msra.gmra.mxu3 %vm2267_vm9, %v2832_v58  ;;  %2821 = vadd.xlane.f32.xlu0 %v2820_v51 }
 0x68e   : > { %v2879_v62 = vpop.f32.mrf.mxu2 }
 0x692   : > { %4640 = vmatmul.msk.f32.gmra.mxu3 %vm2267_vm9, %v2833_v5 }
 0x696   : > { %v2882_v0 = vpop.f32.mrf.mxu2 }
 0x69a   : > { %4641 = vmatmul.msk.f32.gmra.mxu3 %vm2267_vm9, %v2834_v21 }
 0x69e   : > { %v2885_v8 = vpop.f32.mrf.mxu2 }
 0x6a6   : > { %v2888_v42 = vpop.f32.mrf.mxu2 }
 0x6ae   : > { %v2891_v24 = vpop.f32.mrf.mxu2 }
 0x6af   : > { %2939 = vmatpush.msrb.mxu3 %v2891_v24 }
 0x6b1   : > { %2940 = vmatpush.msrb.mxu3 %v2888_v42 }
 0x6b3   : > { %2941 = vmatpush.msrb.mxu3 %v2885_v8 }
 0x6b5   : > { %2942 = vmatpush.msrb.mxu3 %v2882_v0 }
 0x6b7   : > { %2943 = vmatpush.msrb.mxu3 %v2879_v62 }
 0x6b9   : > { %2944 = vmatpush.msrb.mxu3 %v2876_v49 }
 0x6ba   : > { %4642 = vmatmul.msk.f32.vlgmr.msrb.gmra.mxu3 %vm2267_vm9, %v2832_v58 }
 0x6bb   : > { %3029 = vmatpush.msra.mxu3 %v2960_v20 }
 0x6bd   : > { %3030 = vmatpush.msra.mxu3 %v2959_v3 }
 0x6bf   : > { %3031 = vmatpush.msra.mxu3 %v2958_v43 }
 0x6c2   : > { %4643 = vmatmul.msk.f32.gmra.mxu3 %vm2267_vm9, %v2833_v5 }
 0x6ca   : > { %4644 = vmatmul.msk.f32.gmra.mxu3 %vm2267_vm9, %v2834_v21  ;;  %vm3418_vm9 = vcmask 1043456  }
 0x6fd   : > { %v2822_v53 = vpop.xlane.xlu0 %2821 }
 0x6fe   : > { %v2823_v61 = vrot.slane %v2822_v53, 4 }
 0x700   : > { %v2824_v26 = vadd.f32 %v2823_v61, %v2822_v53 }
 0x702   : > { %v2825_v9 = vrot.slane %v2824_v26, 2 }
 0x704   : > { %v2826_v63 = vadd.f32 %v2825_v9, %v2824_v26 }
 0x706   : > { %v2827_v41 = vrot.slane %v2826_v63, 1 }
 0x708   : > { %v2828_v13 = vadd.f32 %v2827_v41, %v2826_v63 }
 0x70a   : > { %4749 = vpush %v2828_v13 }
 0x70d   : > { %v7357_v22 = vpop.f32.mrf.mxu3 }
 0x70e   : > { %4645 = vmatmul.msk.f32.vlgmr.msra.gmra.mxu3 %vm2970_vm4, %v7357_v22  ;;  %v2961_v48 = vmul.f32 %v7357_v22, %v7357_v22 }
 0x715   : > { %v7361_v19 = vpop.f32.mrf.mxu3 }
 0x716   : > { %4646 = vmatmul.msk.f32.gmra.mxu3 %vm2970_vm4, %v7361_v19  ;;  %v2962_v18 = vmul.f32 %v7361_v19, %v7361_v19 }
 0x71d   : > { %v7365_v32 = vpop.f32.mrf.mxu3 }
 0x71e   : > { %4647 = vmatmul.msk.f32.gmra.mxu3 %vm2970_vm4, %v7365_v32  ;;  %v2963_v60 = vmul.f32 %v7365_v32, %v7365_v32 }
 0x73b   : > { %s4750_s8 = spop %4749 }
 0x73c   : > { %s2830_s25 = smul.f32 0.0005165289, %s4750_s8 }
 0x73d   : > { %v7369_v27 = vpop.f32.mrf.mxu3 }
 0x73e   : > { %4648 = vmatmul.msk.f32.gmra.mxu3 %vm2970_vm4, %v7369_v27  ;;  %v2964_v52 = vmul.f32 %v7369_v27, %v7369_v27  ;;  %v2967_v45 = vmul.f32 %v7369_v27, %v7357_v22  ;;  %s2831_s17 = smax.f32 %s5643_s9, %s2830_s25 }
 0x745   : > { %v7373_v57 = vpop.f32.mrf.mxu3 }
 0x746   : > { %4649 = vmatmul.msk.f32.gmra.mxu3 %vm2970_vm4, %v7373_v57  ;;  %v2965_v46 = vmul.f32 %v7373_v57, %v7373_v57  ;;  %v2968_v36 = vmul.f32 %v7373_v57, %v7361_v19 }
 0x74d   : > { %v7377_v15 = vpop.f32.mrf.mxu3 }
 0x74e   : > { %4650 = vmatmul.msk.f32.gmra.mxu3 %vm2970_vm4, %v7377_v15  ;;  %v2966_v7 = vmul.f32 %v7377_v15, %v7377_v15  ;;  %v2969_v54 = vmul.f32 %v7377_v15, %v7365_v32 }
 0x756   : > { %4651 = vmatmul.msk.f32.gmra.mxu3 %vm2970_vm4, %v2961_v48 }
 0x75e   : > { %4652 = vmatmul.msk.f32.gmra.mxu3 %vm2970_vm4, %v2962_v18 }
 0x766   : > { %4653 = vmatmul.msk.f32.gmra.mxu3 %vm2970_vm4, %v2963_v60 }
 0x76e   : > { %4654 = vmatmul.msk.f32.gmra.mxu3 %vm2970_vm4, %v2964_v52 }
 0x776   : > { %4655 = vmatmul.msk.f32.gmra.mxu3 %vm2970_vm4, %v2965_v46 }
 0x77e   : > { %4656 = vmatmul.msk.f32.gmra.mxu3 %vm2970_vm4, %v2966_v7  ;;  %v7453_v7 = vld [vmem:[#allocation24] sm:$0xff] }
 0x786   : > { %4657 = vmatmul.msk.f32.gmra.mxu3 %vm2970_vm4, %v2967_v45 }
 0x78e   : > { %4658 = vmatmul.msk.f32.gmra.mxu3 %vm2970_vm4, %v2968_v36 }
 0x791   : > { %v3033_v4 = vpop.f32.mrf.mxu3 }
 0x796   : > { %4659 = vmatmul.msk.f32.gmra.mxu3 %vm2970_vm4, %v2969_v54 }
 0x799   : > { %v3036_v14 = vpop.f32.mrf.mxu3 }
 0x7a1   : > { %v3039_v31 = vpop.f32.mrf.mxu3 }
 0x7a2   : > { %3100 = vmatpush.msrb.mxu0 %v3039_v31 }
 0x7a4   : > { %3101 = vmatpush.msrb.mxu0 %v3036_v14 }
 0x7a6   : > { %3102 = vmatpush.msrb.mxu0 %v3033_v4 }
 0x7a7   : > { %4660 = vmatmul.msk.f32.vlgmr.msrb.gmra.mxu0 %vm2970_vm4, %v2955_v16 }
 0x7af   : > { %4661 = vmatmul.msk.f32.gmra.mxu0 %vm2970_vm4, %v2956_v37 }
 0x7b7   : > { %4662 = vmatmul.msk.f32.gmra.mxu0 %vm2970_vm4, %v2957_v56 }
 0x7c1   : > { %v3042_v59 = vpop.f32.mrf.mxu3 }
 0x7c9   : > { %v3045_v30 = vpop.f32.mrf.mxu3 }
 0x7d1   : > { %v3048_v23 = vpop.f32.mrf.mxu3 }
 0x7d2   : > { %3126 = vmatpush.msra.mxu1 %v3048_v23 }
 0x7d4   : > { %3127 = vmatpush.msra.mxu1 %v3045_v30 }
 0x7d6   : > { %3128 = vmatpush.msra.mxu1 %v3042_v59 }
 0x7d7   : > { %4663 = vmatmul.msk.f32.vlgmr.msra.gmra.mxu1 %vm2970_vm4, %v2955_v16 }
 0x7d9   : > { %v3051_v17 = vpop.f32.mrf.mxu3 }
 0x7df   : > { %4664 = vmatmul.msk.f32.gmra.mxu1 %vm2970_vm4, %v2956_v37 }
 0x7e1   : > { %v3054_v50 = vpop.f32.mrf.mxu3 }
 0x7e7   : > { %4665 = vmatmul.msk.f32.gmra.mxu1 %vm2970_vm4, %v2957_v56 }
 0x7e9   : > { %v3057_v25 = vpop.f32.mrf.mxu3 }
 0x7ea   : > { %3152 = vmatpush.msrb.mxu2 %v3057_v25  ;;  %v3311_v25 = vld [vmem:[#allocation24 + $0x8] sm:$0xf] }
 0x7ec   : > { %3153 = vmatpush.msrb.mxu2 %v3054_v50 }
 0x7ee   : > { %3154 = vmatpush.msrb.mxu2 %v3051_v17 }
 0x7ef   : > { %4666 = vmatmul.msk.f32.vlgmr.msrb.gmra.mxu2 %vm2970_vm4, %v2955_v16 }
 0x7f0   : > { %3328 = vmatpush.msra.mxu2 %v3314_v10 }
 0x7f1   : > { %v3060_v29 = vpop.f32.mrf.mxu3 }
 0x7f2   : > { %3329 = vmatpush.msra.mxu2 %v3313_v12 }
 0x7f4   : > { %3330 = vmatpush.msra.mxu2 %v3312_v39 }
 0x7f7   : > { %4667 = vmatmul.msk.f32.gmra.mxu2 %vm2970_vm4, %v2956_v37 }
 0x7f9   : > { %v3063_v2 = vpop.f32.mrf.mxu3 }
 0x7ff   : > { %4668 = vmatmul.msk.f32.gmra.mxu2 %vm2970_vm4, %v2957_v56 }
 0x801   : > { %v3066_v38 = vpop.f32.mrf.mxu3 }
 0x802   : > { %3178 = vmatpush.msra.mxu0 %v3066_v38 }
 0x804   : > { %3179 = vmatpush.msra.mxu0 %v3063_v2 }
 0x806   : > { %3180 = vmatpush.msra.mxu0 %v3060_v29 }
 0x807   : > { %4675 = vmatmul.msk.f32.vlgmr.msra.gmra.mxu2 %vm2970_vm4, %v7357_v22  ;;  %4669 = vmatmul.msk.f32.vlgmr.msra.gmra.mxu0 %vm2970_vm4, %v2955_v16 }
 0x809   : > { %v3069_v6 = vpop.f32.mrf.mxu3 }
 0x80f   : > { %4676 = vmatmul.msk.f32.gmra.mxu2 %vm2970_vm4, %v7361_v19  ;;  %4670 = vmatmul.msk.f32.gmra.mxu0 %vm2970_vm4, %v2956_v37 }
 0x811   : > { %v3072_v40 = vpop.f32.mrf.mxu3 }
 0x817   : > { %4677 = vmatmul.msk.f32.gmra.mxu2 %vm2970_vm4, %v7365_v32  ;;  %4671 = vmatmul.msk.f32.gmra.mxu0 %vm2970_vm4, %v2957_v56 }
 0x819   : > { %v3075_v11 = vpop.f32.mrf.mxu3 }
 0x81a   : > { %3204 = vmatpush.msrb.mxu1 %v3075_v11 }
 0x81c   : > { %3205 = vmatpush.msrb.mxu1 %v3072_v40 }
 0x81e   : > { %3206 = vmatpush.msrb.mxu1 %v3069_v6 }
 0x81f   : > { %4672 = vmatmul.msk.f32.vlgmr.msrb.gmra.mxu1 %vm2970_vm4, %v2955_v16  ;;  %4678 = vmatmul.msk.f32.gmra.mxu2 %vm2970_vm4, %v7369_v27 }
 0x824   : > { %v3104_v35 = vpop.f32.mrf.mxu0 }
 0x825   : > { %v3217_v58 = vmul.f32 %v3104_v35, %v3104_v35 }
 0x827   : > { %4673 = vmatmul.msk.f32.gmra.mxu1 %vm2970_vm4, %v2956_v37  ;;  %4679 = vmatmul.msk.f32.gmra.mxu2 %vm2970_vm4, %v7373_v57  ;;  %v7444_v57 = vld [vmem:[#allocation13 + $0x8] sm:$0xf] }
 0x828   : > { %4695 = vmatpush.msk.msrb.mxu3 %vm3418_vm9, %v7444_v57 }
 0x82c   : > { %v3107_v44 = vpop.f32.mrf.mxu0 }
 0x82d   : > { %v3218_v0 = vmul.f32 %v3107_v44, %v3107_v44 }
 0x82f   : > { %4674 = vmatmul.msk.f32.gmra.mxu1 %vm2970_vm4, %v2957_v56  ;;  %4680 = vmatmul.msk.f32.gmra.mxu2 %vm2970_vm4, %v7377_v15 }
 0x834   : > { %v7435_v33 = vpop.f32.mrf.mxu0 }
 0x835   : > { %v3219_v26 = vmul.f32 %v7435_v33, %v7435_v33 }
 0x854   : > { %v3130_v34 = vpop.f32.mrf.mxu1 }
 0x855   : > { %v3220_v47 = vmul.f32 %v3130_v34, %v3130_v34  ;;  %v3223_v36 = vmul.f32 %v3130_v34, %v3104_v35 }
 0x85c   : > { %v3133_v51 = vpop.f32.mrf.mxu1 }
 0x85d   : > { %v3221_v21 = vmul.f32 %v3133_v51, %v3133_v51  ;;  %v3224_v14 = vmul.f32 %v3133_v51, %v3107_v44 }
 0x864   : > { %v3136_v53 = vpop.f32.mrf.mxu1 }
 0x865   : > { %v3222_v63 = vmul.f32 %v3136_v53, %v3136_v53  ;;  %v3225_v35 = vmul.f32 %v3136_v53, %v7435_v33 }
 0x872   : > { %v3156_v55 = vpop.f32.mrf.mxu2 }
 0x873   : > { %v3226_v5 = vsub.f32 %v3156_v55, %v3217_v58 }
 0x87a   : > { %v3159_v1 = vpop.f32.mrf.mxu2 }
 0x87b   : > { %v3227_v20 = vsub.f32 %v3159_v1, %v3218_v0 }
 0x882   : > { %v3162_v49 = vpop.f32.mrf.mxu2 }
 0x883   : > { %v3228_v22 = vsub.f32 %v3162_v49, %v3219_v26 }
 0x884   : > { %v3182_v28 = vpop.f32.mrf.mxu0 }
 0x885   : > { %v3229_v62 = vsub.f32 %v3182_v28, %v3220_v47 }
 0x887   : > { %v3241_v42 = vadd.f32 %v3229_v62, %v3226_v5 }
 0x889   : > { %v7437_v43 = vadd.f32 0.0009, %v3241_v42 }
 0x88a   : > { %v3332_v8 = vpop.f32.mrf.mxu2 }
 0x88b   : > { %5001 = vrcp.f32 %v7437_v43  ;;  %v3256_v6 = vand.u32 2147483647, %v7437_v43  ;;  %v3258_v40 = vand.u32 2147483648, %v7437_v43  ;;  %vm3252_vm8 = vweird.f32 %v7437_v43 }
 0x88c   : > { %v3185_v24 = vpop.f32.mrf.mxu0 }
 0x88d   : > { %v3230_v3 = vsub.f32 %v3185_v24, %v3221_v21  ;;  %vm3257_vm13 = vcmp.eq.f32.partialorder %v3256_v6, 8.507059e+37  ;;  %v3259_v28 = vor.u32 1.1754944e-38, %v3258_v40 }
 0x88f   : > { %v3242_v61 = vadd.f32 %v3230_v3, %v3227_v20 }
 0x891   : > { %v3245_v9 = vadd.f32 0.0009, %v3242_v61  ;;  %v7442_v27 = vpop.eup %5001 }
 0x892   : > { %v3335_v41 = vpop.f32.mrf.mxu2  ;;  %v3248_v52 = vmul.f32 %v7442_v27, %v7437_v43  ;;  %vm3253_vm6 = vweird.f32 %v7442_v27 }
 0x893   : > { %5003 = vrcp.f32 %v3245_v9  ;;  %vm3267_vm7 = vweird.f32 %v3245_v9  ;;  %v3271_v10 = vand.u32 2147483647, %v3245_v9  ;;  %v3273_v12 = vand.u32 2147483648, %v3245_v9  ;;  %vm7478_vm10 = vmor %vm3252_vm8, %vm3253_vm6 }
 0x894   : > { %v3188_v13 = vpop.f32.mrf.mxu0  ;;  %v3249_v4 = vsub.f32 1.0, %v3248_v52  ;;  %vm3704_vm8 = vcmask 64512  }
 0x895   : > { %v3231_v19 = vsub.f32 %v3188_v13, %v3222_v63  ;;  %vm3272_vm11 = vcmp.eq.f32.partialorder %v3271_v10, 8.507059e+37  ;;  %v3274_v34 = vor.u32 1.1754944e-38, %v3273_v12 }
 0x896   : > { %v3250_v23 = vmul.f32 %v7442_v27, %v3249_v4 }
 0x897   : > { %v3243_v32 = vadd.f32 %v3231_v19, %v3228_v22 }
 0x898   : > { %v3251_v39 = vadd.f32 %v7442_v27, %v3250_v23 }
 0x899   : > { %v5004_v15 = vpop.eup %5003  ;;  %v7446_v48 = vadd.f32 0.0009, %v3243_v32  ;;  %v3403_v32 = vld [vmem:[#allocation13] sm:$0xff] }
 0x89a   : > { %v3263_v18 = vmul.f32 %v5004_v15, %v3245_v9  ;;  %v3338_v60 = vpop.f32.mrf.mxu2  ;;  %vm3268_vm5 = vweird.f32 %v5004_v15  ;;  %v3255_v33 = vsel %vm7478_vm10, %v7442_v27, %v3251_v39  ;;  %3544 = vmatpush.msrb.mxu3 %v3403_v32  ;;  %vm3823_vm10 = vcmask 48128  }
 0x89b   : > { %5005 = vrcp.f32 %v7446_v48  ;;  %3369 = vmatpush.msrb.mxu0 %v3338_v60  ;;  %vm7467_vm0 = vmor %vm3267_vm7, %vm3268_vm5  ;;  %v3288_v5 = vand.u32 2147483648, %v7446_v48  ;;  %vm3282_vm14 = vweird.f32 %v7446_v48  ;;  %v3260_v42 = vsel %vm3257_vm13, %v3259_v28, %v3255_v33 }
 0x89c   : > { %v3208_v46 = vpop.f32.mrf.mxu1  ;;  %v3264_v45 = vsub.f32 1.0, %v3263_v18  ;;  %vm3411_vm5 = vcmask 97280  }
 0x89d   : > { %3370 = vmatpush.msrb.mxu0 %v3335_v41  ;;  %v3232_v16 = vsub.f32 %v3208_v46, %v3223_v36  ;;  %v3289_v43 = vor.u32 1.1754944e-38, %v3288_v5 }
 0x89e   : > { %v3265_v31 = vmul.f32 %v5004_v15, %v3264_v45 }
 0x89f   : > { %3371 = vmatpush.msrb.mxu0 %v3332_v8  ;;  %v3235_v29 = vmul.f32 2.0, %v3232_v16  ;;  %v3286_v8 = vand.u32 2147483647, %v7446_v48 }
 0x8a0   : > { %4681 = vmatmul.msk.f32.vlgmr.msrb.gmra.mxu0 %vm2970_vm4, %v7453_v7  ;;  %v3266_v50 = vadd.f32 %v5004_v15, %v3265_v31 }
 0x8a1   : > { %v5006_v54 = vpop.eup %5005  ;;  %4685 = vmatpush.msk.msra.mxu0 %vm3418_vm9, %v7444_v57  ;;  %v3238_v47 = vadd.f32 0.0009, %v3235_v29  ;;  %vm3287_vm2 = vcmp.eq.f32.partialorder %v3286_v8, 8.507059e+37 }
 0x8a2   : > { %v7459_v59 = vpop.f32.mrf.mxu2  ;;  %v3278_v30 = vmul.f32 %v5006_v54, %v7446_v48  ;;  %v3270_v55 = vsel %vm7467_vm0, %v5004_v15, %v3266_v50  ;;  %vm3283_vm12 = vweird.f32 %v5006_v54 }
 0x8a3   : > { %v3275_v51 = vsel %vm3272_vm11, %v3274_v34, %v3270_v55  ;;  %vm3284_vm15 = vmor %vm3282_vm14, %vm3283_vm12  ;;  %v3261_v24 = vmul.f32 %v3260_v42, %v3238_v47  ;;  %3437 = vmatpush.msra.mxu0 %v3403_v32  ;;  %v3717_v34 = vld [vmem:[%s7688_s20] sm:$0x3f]  ;;  %s942_s20 = scalar_lea.vmem %s7689_s30, %s7695_s27 }
 0x8a4   : > { %v3211_v37 = vpop.f32.mrf.mxu1  ;;  %v3279_v17 = vsub.f32 1.0, %v3278_v30 }
 0x8a5   : > { %v3233_v56 = vsub.f32 %v3211_v37, %v3224_v14  ;;  %v3293_v41 = vsel %vm3292_vm1, %v3261_v24, 0.0 }
 0x8a6   : > { %v3280_v38 = vmul.f32 %v5006_v54, %v3279_v17 }
 0x8a7   : > { %v3236_v2 = vmul.f32 2.0, %v3233_v56 }
 0x8a8   : > { %4682 = vmatmul.msk.f32.gmra.mxu0 %vm2970_vm4, %v3311_v25  ;;  %v3281_v58 = vadd.f32 %v5006_v54, %v3280_v38 }
 0x8a9   : > { %v3239_v44 = vadd.f32 0.0009, %v3236_v2  ;;  %v3719_v2 = vld [vmem:[%s7687_s6 + $0x8] sm:$0xf] }
 0x8aa   : > { %v3344_v49 = vpop.f32.mrf.mxu2  ;;  %v3285_v3 = vsel %vm3284_vm15, %v5006_v54, %v3281_v58 }
 0x8ab   : > { %v3276_v0 = vmul.f32 %v3275_v51, %v3239_v44  ;;  %v3290_v9 = vsel %vm3287_vm2, %v3289_v43, %v3285_v3 }
 0x8ac   : > { %v3214_v62 = vpop.f32.mrf.mxu1 }
 0x8ad   : > { %v3234_v21 = vsub.f32 %v3214_v62, %v3225_v35  ;;  %v3294_v61 = vsel %vm3292_vm1, %v3276_v0, 0.0 }
 0x8ae   : > { %v3295_v13 = vadd.f32 %v3294_v61, %v3293_v41 }
 0x8af   : > { %v3237_v20 = vmul.f32 2.0, %v3234_v21 }
 0x8b1   : > { %v3240_v53 = vadd.f32 0.0009, %v3237_v20 }
 0x8b2   : > { %v3347_v26 = vpop.f32.mrf.mxu2 }
 0x8b3   : > { %3392 = vmatpush.msra.mxu1 %v3347_v26  ;;  %v3291_v63 = vmul.f32 %v3290_v9, %v3240_v53 }
 0x8b5   : > { %3393 = vmatpush.msra.mxu1 %v3344_v49  ;;  %v3297_v22 = vsel %vm3296_vm3, %v3291_v63, 0.0 }
 0x8b6   : > { %v3298_v19 = vadd.f32 %v3297_v22, %v3295_v13 }
 0x8b7   : > { %3394 = vmatpush.msra.mxu1 %v7459_v59  ;;  %v3402_v59 = vld [vmem:[#allocation12] sm:$0xff] }
 0x8b8   : > { %3299 = vadd.xlane.f32.xlu1 %v3298_v19  ;;  %4683 = vmatmul.msk.f32.vlgmr.msra.gmra.mxu1 %vm2970_vm4, %v7453_v7  ;;  %v3819_v19 = vld [vmem:[#allocation16] sm:$0x3f] }
 0x8c0   : > { %4684 = vmatmul.msk.f32.gmra.mxu1 %vm2970_vm4, %v3311_v25 }
 0x91d   : > { %v7492_v27 = vpop.f32.mrf.mxu0 }
 0x91e   : > { %v3405_v15 = vmul.f32 %v7492_v27, %v7492_v27  ;;  %4686 = vmatmul.msk.f32.vlgmr.msra.gmra.mxu0 %vm3411_vm5, %v7492_v27 }
 0x920   : > { %4696 = vmatmul.msk.f32.vlgmr.msrb.gmra.mxu3 %vm3411_vm5, %v3405_v15 }
 0x925   : > { %v7499_v48 = vpop.f32.mrf.mxu0 }
 0x926   : > { %v3406_v18 = vmul.f32 %v7499_v48, %v7499_v48  ;;  %4687 = vmatmul.msk.f32.gmra.mxu0 %vm3411_vm5, %v7499_v48 }
 0x928   : > { %4697 = vmatmul.msk.f32.gmra.mxu3 %vm3411_vm5, %v3406_v18 }
 0x92b   : > { %v3300_v60 = vpop.xlane.xlu1 %3299 }
 0x92c   : > { %v3301_v52 = vrot.slane %v3300_v60, 4 }
 0x92e   : > { %v3302_v46 = vadd.f32 %v3301_v52, %v3300_v60 }
 0x930   : > { %v3303_v7 = vrot.slane %v3302_v46, 2 }
 0x932   : > { %v3304_v45 = vadd.f32 %v3303_v7, %v3302_v46 }
 0x934   : > { %v3305_v36 = vrot.slane %v3304_v45, 1 }
 0x935   : > { %v3396_v16 = vpop.f32.mrf.mxu1 }
 0x936   : > { %v3306_v4 = vadd.f32 %v3305_v36, %v3304_v45  ;;  %v3409_v37 = vmul.f32 %v3396_v16, %v7492_v27  ;;  %v3407_v12 = vmul.f32 %v3396_v16, %v3396_v16 }
 0x938   : > { %4751 = vpush %v3306_v4 }
 0x93d   : > { %v3399_v23 = vpop.f32.mrf.mxu1 }
 0x93e   : > { %v3410_v17 = vmul.f32 %v3399_v23, %v7499_v48  ;;  %v3408_v39 = vmul.f32 %v3399_v23, %v3399_v23 }
 0x969   : > { %s4752_s24 = spop %4751 }
 0x96a   : > { %s3308_s28 = smul.f32 0.0025, %s4752_s24 }
 0x96c   : > { %s3309_s2 = smax.f32 %s5643_s9, %s3308_s28 }
 0x99b   : > { %v3439_v54 = vpop.f32.mrf.mxu0 }
 0x9a3   : > { %v3442_v14 = vpop.f32.mrf.mxu0  ;;  %v3546_v31 = vpop.f32.mrf.mxu3 }
 0x9a4   : > { %4688 = vmatpush.msk.msrb.mxu1 %vm3418_vm9, %v3442_v14 }
 0x9a6   : > { %3466 = vmatpush.msrb.mxu1 %v3439_v54  ;;  %v3818_v54 = vld [vmem:[#allocation15] sm:$0x3] }
 0x9a7   : > { %4689 = vmatmul.msk.f32.vlgmr.msrb.gmra.mxu1 %vm3411_vm5, %v3402_v59 }
 0x9a8   : > { %4690 = vmatpush.msk.msra.mxu1 %vm3418_vm9, %v7444_v57 }
 0x9aa   : > { %3492 = vmatpush.msra.mxu1 %v3403_v32 }
 0x9ab   : > { %v3549_v30 = vpop.f32.mrf.mxu3 }
 0x9ac   : > { %4705 = vmatpush.msk.msrb.mxu1 %vm3418_vm9, %v7444_v57  ;;  %4698 = vmatpush.msk.msrb.mxu0 %vm3418_vm9, %v3549_v30 }
 0x9ae   : > { %3648 = vmatpush.msrb.mxu1 %v3403_v32  ;;  %3570 = vmatpush.msrb.mxu0 %v3546_v31 }
 0x9af   : > { %4691 = vmatmul.msk.f32.vlgmr.msra.gmra.mxu1 %vm3411_vm5, %v3396_v16  ;;  %4699 = vmatmul.msk.f32.vlgmr.msrb.gmra.mxu0 %vm3411_vm5, %v3402_v59 }
 0x9b7   : > { %4692 = vmatmul.msk.f32.gmra.mxu1 %vm3411_vm5, %v3399_v23 }
 0x9bf   : > { %4706 = vmatmul.msk.f32.vlgmr.msrb.gmra.mxu1 %vm3411_vm5, %v3409_v37 }
 0x9c7   : > { %4707 = vmatmul.msk.f32.gmra.mxu1 %vm3411_vm5, %v3410_v17 }
 0xa24   : > { %v3468_v56 = vpop.f32.mrf.mxu1 }
 0xa25   : > { %v3679_v47 = vmul.f32 %v3468_v56, %v3468_v56 }
 0xa2c   : > { %v3494_v50 = vpop.f32.mrf.mxu1  ;;  %v3572_v49 = vpop.f32.mrf.mxu0 }
 0xa2d   : > { %v3682_v28 = vsub.f32 %v3572_v49, %v3679_v47 }
 0xa34   : > { %v3497_v25 = vpop.f32.mrf.mxu1 }
 0xa35   : > { %4693 = vmatpush.msk.msrb.mxu2 %vm3418_vm9, %v3497_v25 }
 0xa37   : > { %3518 = vmatpush.msrb.mxu2 %v3494_v50 }
 0xa38   : > { %4694 = vmatmul.msk.f32.vlgmr.msrb.gmra.mxu2 %vm3411_vm5, %v3402_v59 }
 0xa39   : > { %4700 = vmatpush.msk.msra.mxu2 %vm3418_vm9, %v7444_v57  ;;  %v3718_v57 = vld [vmem:[%s7687_s6] sm:$0xff] }
 0xa3b   : > { %3596 = vmatpush.msra.mxu2 %v3403_v32 }
 0xa3c   : > { %v3650_v10 = vpop.f32.mrf.mxu1 }
 0xa40   : > { %4701 = vmatmul.msk.f32.vlgmr.msra.gmra.mxu2 %vm3411_vm5, %v3407_v12 }
 0xa44   : > { %v3653_v29 = vpop.f32.mrf.mxu1 }
 0xa45   : > { %4708 = vmatpush.msk.msra.mxu3 %vm3418_vm9, %v3653_v29 }
 0xa47   : > { %3674 = vmatpush.msra.mxu3 %v3650_v10 }
 0xa48   : > { %4702 = vmatmul.msk.f32.gmra.mxu2 %vm3411_vm5, %v3408_v39  ;;  %4709 = vmatmul.msk.f32.vlgmr.msra.gmra.mxu3 %vm3411_vm5, %v3402_v59 }
 0xa49   : > { %4715 = vmatpush.msk.msrb.mxu3 %vm3418_vm9, %v3719_v2 }
 0xa4b   : > { %3787 = vmatpush.msrb.mxu3 %v3718_v57 }
 0xa50   : > { %4716 = vmatmul.msk.f32.vlgmr.msrb.gmra.mxu3 %vm3411_vm5, %v3396_v16 }
 0xa58   : > { %4717 = vmatmul.msk.f32.gmra.mxu3 %vm3411_vm5, %v3399_v23 }
 0xabb   : > { %v3520_v38 = vpop.f32.mrf.mxu2 }
 0xabc   : > { %v3681_v40 = vmul.f32 %v3520_v38, %v3468_v56  ;;  %v3680_v33 = vmul.f32 %v3520_v38, %v3520_v38 }
 0xac3   : > { %v3598_v6 = vpop.f32.mrf.mxu2 }
 0xacb   : > { %v3601_v11 = vpop.f32.mrf.mxu2  ;;  %v3676_v35 = vpop.f32.mrf.mxu3 }
 0xacc   : > { %4703 = vmatpush.msk.msra.mxu0 %vm3418_vm9, %v3601_v11  ;;  %v3684_v44 = vsub.f32 %v3676_v35, %v3681_v40 }
 0xace   : > { %3622 = vmatpush.msra.mxu0 %v3598_v6  ;;  %v3685_v3 = vmul.f32 2.0, %v3684_v44 }
 0xacf   : > { %4704 = vmatmul.msk.f32.vlgmr.msra.gmra.mxu0 %vm3411_vm5, %v3402_v59 }
 0xad0   : > { %4710 = vmatpush.msk.msrb.mxu0 %vm3418_vm9, %v3719_v2  ;;  %v3686_v9 = vadd.f32 0.0009, %v3685_v3 }
 0xad2   : > { %3738 = vmatpush.msrb.mxu0 %v3718_v57 }
 0xad3   : > { %v3789_v55 = vpop.f32.mrf.mxu3 }
 0xad7   : > { %4711 = vmatmul.msk.f32.vlgmr.msrb.gmra.mxu0 %vm3411_vm5, %v7492_v27 }
 0xadb   : > { %v3792_v1 = vpop.f32.mrf.mxu3 }
 0xadc   : > { %4718 = vmatpush.msk.msra.mxu1 %vm3418_vm9, %v3792_v1 }
 0xade   : > { %3813 = vmatpush.msra.mxu1 %v3789_v55 }
 0xadf   : > { %4712 = vmatmul.msk.f32.gmra.mxu0 %vm3411_vm5, %v7499_v48  ;;  %4719 = vmatmul.msk.f32.vlgmr.msra.gmra.mxu1 %vm3411_vm5, %v3717_v34 }
 0xb4c   : > { %v3624_v58 = vpop.f32.mrf.mxu0 }
 0xb4d   : > { %v3683_v51 = vsub.f32 %v3624_v58, %v3680_v33 }
 0xb4f   : > { %v3687_v62 = vadd.f32 %v3683_v51, %v3682_v28 }
 0xb51   : > { %v3688_v5 = vadd.f32 0.0009, %v3687_v62 }
 0xb53   : > { %5007 = vrcp.f32 %v3688_v5  ;;  %v3700_v20 = vand.u32 2147483648, %v3688_v5  ;;  %v3698_v53 = vand.u32 2147483647, %v3688_v5  ;;  %vm3694_vm6 = vweird.f32 %v3688_v5 }
 0xb54   : > { %v3740_v0 = vpop.f32.mrf.mxu0 }
 0xb55   : > { %v3701_v26 = vor.u32 1.1754944e-38, %v3700_v20  ;;  %vm3699_vm0 = vcmp.eq.f32.partialorder %v3698_v53, 8.507059e+37 }
 0xb59   : > { %v5008_v21 = vpop.eup %5007 }
 0xb5a   : > { %v3690_v8 = vmul.f32 %v5008_v21, %v3688_v5  ;;  %vm3695_vm4 = vweird.f32 %v5008_v21 }
 0xb5b   : > { %vm3696_vm7 = vmor %vm3694_vm6, %vm3695_vm4 }
 0xb5c   : > { %v3743_v42 = vpop.f32.mrf.mxu0  ;;  %v3691_v24 = vsub.f32 1.0, %v3690_v8  ;;  %v3815_v32 = vpop.f32.mrf.mxu1 }
 0xb5d   : > { %4713 = vmatpush.msk.msrb.mxu2 %vm3418_vm9, %v3743_v42  ;;  %vm3827_vm9 = vcmask 1045504   ;;  %v3821_v27 = vmul.f32 %v3815_v32, %v3815_v32 }
 0xb5e   : > { %v3692_v43 = vmul.f32 %v5008_v21, %v3691_v24  ;;  %4724 = vmatpush.msk.msrb.mxu1 %vm3827_vm9, %v3819_v19  ;;  %4728 = vmatpush.msk.msra.mxu3 %vm3827_vm9, %v3819_v19 }
 0xb5f   : > { %3767 = vmatpush.msrb.mxu2 %v3740_v0  ;;  %4725 = vmatmul.msk.f32.vlgmr.msrb.gmra.mxu1 %vm3823_vm10, %v3815_v32 }
 0xb60   : > { %4714 = vmatmul.msk.f32.vlgmr.msrb.gmra.mxu2 %vm3411_vm5, %v3717_v34  ;;  %v3693_v61 = vadd.f32 %v5008_v21, %v3692_v43  ;;  %4732 = vmatpush.msk.msra.mxu1 %vm3827_vm9, %v3819_v19  ;;  %vm4106_vm5 = vcmask 9216  }
 0xb61   : > { %4720 = vmatpush.msk.msra.mxu2 %vm3827_vm9, %v3819_v19  ;;  %4736 = vmatpush.msk.msrb.mxu3 %vm3827_vm9, %v3819_v19 }
 0xb62   : > { %v3697_v63 = vsel %vm3696_vm7, %v5008_v21, %v3693_v61 }
 0xb63   : > { %v3702_v41 = vsel %vm3699_vm0, %v3701_v26, %v3697_v63 }
 0xb64   : > { %v3703_v13 = vmul.f32 %v3702_v41, %v3686_v9 }
 0xb66   : > { %v3705_v22 = vsel %vm3704_vm8, %v3703_v13, 0.0 }
 0xb67   : > { %3706 = vadd.xlane.f32.xlu1 %v3705_v22  ;;  %4733 = vmatmul.msk.f32.vlgmr.msra.gmra.mxu1 %vm3823_vm10, %v3821_v27 }
 0xbda   : > { %v3707_v15 = vpop.xlane.xlu1 %3706 }
 0xbdb   : > { %v3708_v48 = vrot.slane %v3707_v15, 4 }
 0xbdc   : > { %v3897_v14 = vpop.f32.mrf.mxu1 }
 0xbdd   : > { %v3709_v18 = vadd.f32 %v3708_v48, %v3707_v15  ;;  %4726 = vmatpush.msk.msrb.mxu2 %vm3827_vm9, %v3897_v14 }
 0xbdf   : > { %v3710_v60 = vrot.slane %v3709_v18, 2 }
 0xbe1   : > { %v3711_v52 = vadd.f32 %v3710_v60, %v3709_v18  ;;  %v4119_v18 = vlaneseq }
 0xbe3   : > { %v3769_v46 = vpop.f32.mrf.mxu2  ;;  %v3712_v7 = vrot.slane %v3711_v52, 1  ;;  %v4120_v60 = vand.u32 127, %v4119_v18 }
 0xbe4   : > { %v3820_v45 = vmul.f32 %v3769_v46, %v3769_v46  ;;  %4721 = vmatmul.msk.f32.vlgmr.msra.gmra.mxu2 %vm3823_vm10, %v3769_v46  ;;  %v3822_v4 = vmul.f32 %v3815_v32, %v3769_v46  ;;  %v3989_v31 = vpop.f32.mrf.mxu1  ;;  %v4122_v46 = vstv %s2041_s4 }
 0xbe5   : > { %v3713_v36 = vadd.f32 %v3712_v7, %v3711_v52  ;;  %4734 = vmatpush.msk.msra.mxu2 %vm3827_vm9, %v3989_v31  ;;  %vm4125_vm4 = vcmp.eq.s32.totalorder %v4120_v60, 1  ;;  %v4126_v52 = vstv %s2831_s17  ;;  %vm4121_vm6 = vcmp.eq.s32.totalorder %v4120_v60, 0 }
 0xbe6   : > { %4729 = vmatmul.msk.f32.vlgmr.msra.gmra.mxu3 %vm3823_vm10, %v3820_v45  ;;  %vm4129_vm7 = vcmp.eq.s32.totalorder %v4120_v60, 2  ;;  %v4130_v7 = vstv %s3309_s2  ;;  %v4127_v45 = vsel %vm4125_vm4, %v4126_v52, 0.0  ;;  %vm4133_vm0 = vcmp.eq.s32.totalorder %v4120_v60, 3 }
 0xbe7   : > { %4753 = vpush %v3713_v36  ;;  %vm4137_vm8 = vcmp.eq.s32.totalorder %v4120_v60, 4 }
 0xbec   : > { %4727 = vmatmul.msk.f32.vlgmr.msrb.gmra.mxu2 %vm3823_vm10, %v3818_v54 }
 0xbee   : > { %4737 = vmatmul.msk.f32.vlgmr.msrb.gmra.mxu3 %vm3823_vm10, %v3822_v4  ;;  %v4123_v4 = vsel %vm4121_vm6, %v4122_v46, 0.0 }
 0xbef   : > { %v4128_v14 = vadd.f32 %v4127_v45, %v4123_v4 }
 0xbf4   : > { %4735 = vmatmul.msk.f32.vlgmr.msra.gmra.mxu2 %vm3823_vm10, %v3818_v54 }
 0xc18   : > { %s4754_s19 = spop %4753 }
 0xc19   : > { %s3715_s3 = smul.f32 0.015625, %s4754_s19 }
 0xc1b   : > { %s3716_s29 = smax.f32 %s5643_s9, %s3715_s3 }
 0xc1c   : > { %v4134_v36 = vstv %s3716_s29 }
 0xc1d   : > { %v4135_v31 = vsel %vm4133_vm0, %v4134_v36, 0.0 }
 0xc67   : > { %v3848_v59 = vpop.f32.mrf.mxu2 }
 0xc68   : > { %4722 = vmatpush.msk.msra.mxu0 %vm3827_vm9, %v3848_v59 }
 0xc69   : > { %4723 = vmatmul.msk.f32.vlgmr.msra.gmra.mxu0 %vm3823_vm10, %v3818_v54  ;;  %v3943_v30 = vpop.f32.mrf.mxu3 }
 0xc6a   : > { %4730 = vmatpush.msk.msrb.mxu0 %vm3827_vm9, %v3943_v30 }
 0xc6f   : > { %v3920_v23 = vpop.f32.mrf.mxu2 }
 0xc70   : > { %v4062_v37 = vmul.f32 %v3920_v23, %v3920_v23 }
 0xc71   : > { %4731 = vmatmul.msk.f32.vlgmr.msrb.gmra.mxu0 %vm3823_vm10, %v3818_v54  ;;  %v4035_v16 = vpop.f32.mrf.mxu3 }
 0xc72   : > { %4738 = vmatpush.msk.msra.mxu0 %vm3827_vm9, %v4035_v16 }
 0xc77   : > { %v4012_v10 = vpop.f32.mrf.mxu2 }
 0xc78   : > { %v4065_v39 = vsub.f32 %v4012_v10, %v4062_v37 }
 0xc79   : > { %4739 = vmatmul.msk.f32.vlgmr.msra.gmra.mxu0 %vm3823_vm10, %v3818_v54  ;;  %v4131_v54 = vsel %vm4129_vm7, %v4130_v7, 0.0 }
 0xc7a   : > { %v4132_v59 = vadd.f32 %v4131_v54, %v4128_v14 }
 0xc7c   : > { %v4136_v30 = vadd.f32 %v4135_v31, %v4132_v59 }
 0xce6   : > { %v3874_v17 = vpop.f32.mrf.mxu0 }
 0xce7   : > { %v4061_v56 = vmul.f32 %v3874_v17, %v3874_v17  ;;  %v4063_v44 = vmul.f32 %v3920_v23, %v3874_v17 }
 0xce9   : > { %v4088_v50 = vadd.f32 %v4062_v37, %v4061_v56  ;;  %v4086_v28 = vmul.f32 2.0, %v4063_v44 }
 0xceb   : > { %v4089_v25 = vadd.f32 0.0001, %v4088_v50  ;;  %v4087_v3 = vadd.f32 0.0001, %v4086_v28 }
 0xced   : > { %5009 = vrcp.f32 %v4089_v25  ;;  %v4101_v47 = vand.u32 2147483648, %v4089_v25  ;;  %vm4095_vm12 = vweird.f32 %v4089_v25  ;;  %v4099_v58 = vand.u32 2147483647, %v4089_v25 }
 0xcee   : > { %v3966_v12 = vpop.f32.mrf.mxu0 }
 0xcef   : > { %v4064_v29 = vsub.f32 %v3966_v12, %v4061_v56  ;;  %v4102_v8 = vor.u32 1.1754944e-38, %v4101_v47  ;;  %vm4100_vm1 = vcmp.eq.f32.partialorder %v4099_v58, 8.507059e+37 }
 0xcf1   : > { %v4069_v2 = vadd.f32 %v4065_v39, %v4064_v29 }
 0xcf3   : > { %v5010_v57 = vpop.eup %5009  ;;  %v4070_v38 = vadd.f32 0.0009, %v4069_v2 }
 0xcf4   : > { %v4091_v6 = vmul.f32 %v5010_v57, %v4089_v25  ;;  %vm4096_vm11 = vweird.f32 %v5010_v57 }
 0xcf5   : > { %5011 = vrcp.f32 %v4070_v38  ;;  %v4080_v51 = vand.u32 2147483647, %v4070_v38  ;;  %v4082_v62 = vand.u32 2147483648, %v4070_v38  ;;  %vm4097_vm13 = vmor %vm4095_vm12, %vm4096_vm11  ;;  %vm4076_vm15 = vweird.f32 %v4070_v38 }
 0xcf6   : > { %v4092_v40 = vsub.f32 1.0, %v4091_v6  ;;  %v4058_v35 = vpop.f32.mrf.mxu0 }
 0xcf7   : > { %v4066_v34 = vsub.f32 %v4058_v35, %v4063_v44  ;;  %v4083_v24 = vor.u32 1.1754944e-38, %v4082_v62  ;;  %vm4081_vm3 = vcmp.eq.f32.partialorder %v4080_v51, 8.507059e+37 }
 0xcf8   : > { %v4093_v11 = vmul.f32 %v5010_v57, %v4092_v40 }
 0xcf9   : > { %v4067_v5 = vmul.f32 2.0, %v4066_v34 }
 0xcfa   : > { %v4094_v49 = vadd.f32 %v5010_v57, %v4093_v11 }
 0xcfb   : > { %v5012_v55 = vpop.eup %5011  ;;  %v4068_v43 = vadd.f32 0.0009, %v4067_v5 }
 0xcfc   : > { %v4072_v1 = vmul.f32 %v5012_v55, %v4070_v38  ;;  %vm4077_vm14 = vweird.f32 %v5012_v55  ;;  %v4098_v21 = vsel %vm4097_vm13, %v5010_v57, %v4094_v49 }
 0xcfd   : > { %vm4078_vm2 = vmor %vm4076_vm15, %vm4077_vm14  ;;  %v4103_v20 = vsel %vm4100_vm1, %v4102_v8, %v4098_v21 }
 0xcfe   : > { %v4073_v33 = vsub.f32 1.0, %v4072_v1  ;;  %v4104_v9 = vmul.f32 %v4103_v20, %v4087_v3 }
 0xd00   : > { %v4074_v0 = vmul.f32 %v5012_v55, %v4073_v33 }
 0xd02   : > { %v4075_v42 = vadd.f32 %v5012_v55, %v4074_v0 }
 0xd04   : > { %v4079_v53 = vsel %vm4078_vm2, %v5012_v55, %v4075_v42 }
 0xd05   : > { %v4084_v61 = vsel %vm4081_vm3, %v4083_v24, %v4079_v53 }
 0xd06   : > { %v4085_v26 = vmul.f32 %v4084_v61, %v4068_v43 }
 0xd08   : > { %v4105_v63 = vmul.f32 %v4104_v9, %v4085_v26 }
 0xd0a   : > { %v4107_v41 = vsel %vm4106_vm5, %v4105_v63, 0.0 }
 0xd0b   : > { %4108 = vadd.xlane.f32.xlu2 %v4107_v41 }
 0xd7e   : > { %v4109_v13 = vpop.xlane.xlu2 %4108 }
 0xd7f   : > { %v4110_v22 = vrot.slane %v4109_v13, 4 }
 0xd81   : > { %v4111_v19 = vadd.f32 %v4110_v22, %v4109_v13 }
 0xd83   : > { %v4112_v32 = vrot.slane %v4111_v19, 2 }
 0xd85   : > { %v4113_v27 = vadd.f32 %v4112_v32, %v4111_v19 }
 0xd87   : > { %v4114_v15 = vrot.slane %v4113_v27, 1 }
 0xd89   : > { %v4115_v48 = vadd.f32 %v4114_v15, %v4113_v27 }
 0xd8b   : > { %4755 = vpush %v4115_v48 }
 0xdbc   : > { %s4756_s15 = spop %4755 }
 0xdbd   : > { %s4117_s21 = smul.f32 0.25, %s4756_s15 }
 0xdbf   : > { %s4118_s26 = smax.f32 %s5643_s9, %s4117_s21 }
 0xdc0   : > { %v4138_v16 = vstv %s4118_s26 }
 0xdc1   : > { %v4139_v23 = vsel %vm4137_vm8, %v4138_v16, 0.0 }
 0xdc2   : > { %v4140_v37 = vadd.f32 %v4139_v23, %v4136_v30 }
 0xdc4   : > { %4141 = vst [vmem:[%s942_s20] sm:$0x1] %v4140_v37 }
 0xdc5 PF: > { %p36_p3 = scmp.ge.s32.totalorder %s5849_s0, 6   ;;  %s7690_s1 = smov %s5615_s22 }
 0xdc6   : > { %s7691_s22 = smov %s5619_s23  ;;  %s7692_s23 = smov %s5861_s16 }
 0xdc7   : > { %s7693_s24 = smov %s5849_s0  ;;  %38 = sbr.rel (!%p36_p3) target bundleno = 28 (0x1c), region = 214 }
 0xdcc   :  { %4159 = vsyncpa [#allocation3], 1 }
 0xdcd   :  { %4161 = vsyncpa [#allocation3 + $0x1], 1 }
 0xdce   :  { %4162 = vsyncpa [#allocation5], 1 }
 0xdcf   :  { %4163 = vsyncpa [#allocation8], 1 }
 0xdd0   :  { %4164 = vsyncpa [#allocation11], 1 }
 0xdd1   :  { %4165 = vsyncpa [#allocation14], 1 }
 0xdd2   :  { %4166 = vsyncpa [#allocation17], 1 }
 0xdd3   :  { %4167 = vsyncpa [#allocation20], 1 }
 0xdd4   :  { %4168 = vsyncpa [#allocation23], 1 }
 0xdd5   :  { %4169 = vsyncpa [#allocation26], 1 }

</bundles_post_ra>
